<compile_context>
chip_gen: v6e
topology: v6e:2x2x1
jax: 0.10.0
libtpu: 0.0.40
codegen_flags: <defaults>
</compile_context>

<pallas_src>
import math
from functools import partial

import jax
import jax.numpy as jnp
from jax import lax
from jax.experimental import pallas as pl
from jax.experimental.pallas import tpu as pltpu


_BN_EPS = 1e-5
_BN_SCALE = 1.0 / math.sqrt(1.0 + _BN_EPS)   # identity-init BatchNorm, inference
_LN_EPS = 1e-6


def _round_up(x, m):
    return ((x + m - 1) // m) * m


def _pad_rows(m):
    return _round_up(m, 256) if m > 256 else _round_up(max(m, 8), 8)


def pad_act(x, mp=None, kp=None):
    """Zero-pad a 2-D activation to TPU-friendly (Mp, Kp) and cast to bf16."""
    m, k = x.shape
    mp = _pad_rows(m) if mp is None else mp
    kp = _round_up(k, 128) if kp is None else kp
    return jnp.pad(x.astype(jnp.bfloat16), ((0, mp - m), (0, kp - k)))


def make_mm(w, bias=None, scale=1.0):
    """Pre-pad + pre-cast a weight (and bias) once, folding any constant scale
    (BN at inference) into the weight."""
    K, N = w.shape
    Kp, Np = _round_up(K, 128), _round_up(N, 128)
    wp = jnp.pad((w.astype(jnp.float32) * scale).astype(jnp.bfloat16),
                 ((0, Kp - K), (0, Np - N)))
    if bias is None:
        bp = jnp.zeros((1, Np), jnp.float32)
    else:
        bp = jnp.pad(bias.astype(jnp.float32).reshape(1, N),
                     ((0, 0), (0, Np - N)))
    return {"w": wp, "b": bp}


# ----------------------------------------------------------------------------
# Fused matmul kernel: out = act( LN?(x) @ w + bias [+ add] )
# (scale is folded into w at init; bias is zero-padded)
# ----------------------------------------------------------------------------
def _fused_mm_kernel(*refs, nk, k_true, ln, act, has_add):
    if ln:
        if has_add:
            x_ref, w_ref, b_ref, a_ref, o_ref, acc_ref, xn_ref = refs
        else:
            x_ref, w_ref, b_ref, o_ref, acc_ref, xn_ref = refs
            a_ref = None
    else:
        if has_add:
            x_ref, w_ref, b_ref, a_ref, o_ref, acc_ref = refs
        else:
            x_ref, w_ref, b_ref, o_ref, acc_ref = refs
            a_ref = None
        xn_ref = None

    kidx = pl.program_id(2)

    @pl.when(kidx == 0)
    def _():
        acc_ref[...] = jnp.zeros_like(acc_ref)

    if ln:
        # nk == 1 when ln=True (full K row).  Normalize once per row-block
        # (first j tile) and cache in VMEM; padded K columns are zero so the
        # sums are exact, and their normalized values hit zero weight rows.
        @pl.when(pl.program_id(1) == 0)
        def _():
            xf = x_ref[...].astype(jnp.float32)
            s1 = jnp.sum(xf, axis=-1, keepdims=True)
            s2 = jnp.sum(xf * xf, axis=-1, keepdims=True)
            mu = s1 * (1.0 / k_true)
            var = s2 * (1.0 / k_true) - mu * mu
            xn_ref[...] = ((xf - mu) * lax.rsqrt(var + _LN_EPS)).astype(xn_ref.dtype)
        x = xn_ref[...]
    else:
        x = x_ref[...]

    acc_ref[...] += jnp.dot(x, w_ref[...], preferred_element_type=jnp.float32)

    @pl.when(kidx == nk - 1)
    def _():
        out = acc_ref[...] + b_ref[...]
        if has_add:
            out = out + a_ref[...].astype(jnp.float32)
        if act == "relu":
            out = jnp.maximum(out, 0.0)
        elif act == "gelu":
            out = jax.nn.gelu(out, approximate=True)
        o_ref[...] = out.astype(o_ref.dtype)


def fused_matmul_p(xp, mm, *, k_true=None, add=None, ln=False, act=None,
                   out_dtype=jnp.bfloat16):
    """xp: (Mp, Kp) bf16 pre-padded activations; mm: pre-padded weight/bias.
    Returns a padded (Mp, Np) output (padded rows/cols carry zeros/don't-care)."""
    Mp, Kp = xp.shape
    wp, bp = mm["w"], mm["b"]
    assert wp.shape[0] == Kp, (wp.shape, xp.shape)
    Np = wp.shape[1]

    tm = Mp if Mp <= 512 else (512 if Mp % 512 == 0 else 256)
    tn = 512 if Np % 512 == 0 else (256 if Np % 256 == 0 else 128)
    if ln:
        tk = Kp                                   # LN needs the full row
    else:
        tk = 512 if Kp % 512 == 0 else (256 if Kp % 256 == 0 else 128)
    nk = Kp // tk
    # VMEM footprint at max tiles (512^2 bf16, double-buffered) is ~5.5 MiB,
    # well under the 32 MiB scoped default on v5e/v6e/v7x.

    in_specs = [
        pl.BlockSpec((tm, tk), lambda i, j, k: (i, k)),
        pl.BlockSpec((tk, tn), lambda i, j, k: (k, j)),
        pl.BlockSpec((1, tn), lambda i, j, k: (0, j)),
    ]
    args = [xp, wp, bp]
    has_add = add is not None
    if has_add:
        assert add.shape == (Mp, Np), (add.shape, (Mp, Np))
        in_specs.append(pl.BlockSpec((tm, tn), lambda i, j, k: (i, j)))
        args.append(add)

    scratch = [pltpu.VMEM((tm, tn), jnp.float32)]
    if ln:
        scratch.append(pltpu.VMEM((tm, tk), jnp.bfloat16))

    # When LN caches into scratch across the j axis, keep j sequential
    # (arbitrary) so the cache is valid under megacore sharding (v7x 2 TCs).
    sem = ("parallel", "arbitrary" if ln else "parallel", "arbitrary")

    return pl.pallas_call(
        partial(_fused_mm_kernel, nk=nk,
                k_true=float(k_true if k_true is not None else Kp),
                ln=ln, act=act, has_add=has_add),
        out_shape=jax.ShapeDtypeStruct((Mp, Np), out_dtype),
        grid=(Mp // tm, Np // tn, nk),
        in_specs=in_specs,
        out_specs=pl.BlockSpec((tm, tn), lambda i, j, k: (i, j)),
        scratch_shapes=scratch,
        compiler_params=pltpu.CompilerParams(dimension_semantics=sem),
    )(*args)


# ----------------------------------------------------------------------------
# Batched softmax attention kernel (many batch-heads per grid step)
# ----------------------------------------------------------------------------
def _attn_kernel(q_ref, k_ref, v_ref, o_ref):
    # 1/sqrt(Dh) is pre-folded into the q columns of w_qkv / b_qkv at init.
    q = q_ref[...]
    k = k_ref[...]
    v = v_ref[...]
    s = lax.dot_general(q, k, (((2,), (2,)), ((0,), (0,))),
                        preferred_element_type=jnp.float32)      # (bh, T, T)
    m = jnp.max(s, axis=-1, keepdims=True)
    p = jnp.exp(s - m)
    denom = jnp.sum(p, axis=-1, keepdims=True)
    p = p * pl.reciprocal(denom, approx=True)                    # EUP, ~free
    o = lax.dot_general(p.astype(jnp.bfloat16), v,
                        (((2,), (1,)), ((0,), (0,))),
                        preferred_element_type=jnp.float32)      # (bh, T, Dh)
    o_ref[...] = o.astype(o_ref.dtype)


def pallas_attention(q, k, v):
    """q,k,v: (BH, T, Dh) -> softmax(q k^T) v per batch-head (scale pre-folded)."""
    BH, T, Dh = q.shape
    # Cap bh_tile so the live (bh, T, T) f32 score tensor stays <= ~2 MiB
    # (v7x 64 MiB VMEM safe).  TODO(synk): for T >= 128 switch to KV-blocked
    # (flash-style) accumulation; also pack heads along lanes for tiny Dh.
    cap = max(1, (2 * 1024 * 1024) // (T * T * 4))
    bh_tile = min(BH, cap, 128)
    BHp = _round_up(BH, bh_tile)

    def prep(a):
        return jnp.pad(a.astype(jnp.bfloat16), ((0, BHp - BH), (0, 0), (0, 0)))

    qp, kp, vp = prep(q), prep(k), prep(v)
    spec = pl.BlockSpec((bh_tile, T, Dh), lambda i: (i, 0, 0))
    out = pl.pallas_call(
        _attn_kernel,
        out_shape=jax.ShapeDtypeStruct((BHp, T, Dh), jnp.bfloat16),
        grid=(BHp // bh_tile,),
        in_specs=[spec, spec, spec],
        out_specs=spec,
        compiler_params=pltpu.CompilerParams(dimension_semantics=("parallel",)),
    )(qp, kp, vp)
    return out[:BH]


# ----------------------------------------------------------------------------
# Model blocks (channels-last (B, T, V, C), bf16, padded between chained mms)
# ----------------------------------------------------------------------------
def twin_attn_block(h0p, p, BV, T, H, hd):
    """Transformer block over the temporal axis.
    h0p: (Mp, hd_p) padded bf16, valid rows ordered (b, v, t).
    # TODO(synk): TwinSVT (LSA/GSA twin) source not provided; stand-in is one
    # standard pre-LN MHSA + MLP(ratio 4) block."""
    Dh = hd // H
    M = BV * T
    Mp = h0p.shape[0]

    # LayerNorm fused into the QKV matmul kernel (qk-scale folded into weights)
    qkv = fused_matmul_p(h0p, p["qkv"], k_true=hd, ln=True)       # (Mp, pad(3hd))
    # single relayout for the head split: (BV,T,3,H,Dh) -> (3, BV, H, T, Dh)
    qkv_h = qkv[:M, :3 * hd].reshape(BV, T, 3, H, Dh)
    qkv_h = jnp.transpose(qkv_h, (2, 0, 3, 1, 4)).reshape(3, BV * H, T, Dh)
    o = pallas_attention(qkv_h[0], qkv_h[1], qkv_h[2])            # (BV*H, T, Dh)
    o = jnp.transpose(o.reshape(BV, H, T, Dh), (0, 2, 1, 3)).reshape(M, hd)
    op = pad_act(o, mp=Mp)

    # output projection with the residual add fused into the epilogue
    x1 = fused_matmul_p(op, p["proj"], add=h0p)
    # MLP: LN + GELU fused into FC1, residual add fused into FC2
    m = fused_matmul_p(x1, p["fc1"], k_true=hd, ln=True, act="gelu")
    return fused_matmul_p(m, p["fc2"], add=x1)                    # (Mp, hd_p)


def sattn_tcn_unit(x, p, cfg):
    """One SATTN_TCN_unit.  x: (B, T, V, Cin) bf16 channels-last."""
    B, T, V, Cin = x.shape
    stride = cfg["stride"]
    Cs, Cout, hd, H = cfg["cs"], cfg["cout"], cfg["hd"], cfg["t_num_heads"]

    # --- spatial attention stand-in -----------------------------------------
    # TODO(synk): unit_sattn source not provided; stand-in = 1x1 channel
    # projection + normalized-adjacency joint mixing pre-composed into one
    # (V*Cin -> V*Cs) matmul (kron(a_hat, W)); fine for tiny V*Cin — for
    # realistic V,C use the factored channel-proj + VxV mix instead.
    y = fused_matmul_p(pad_act(x.reshape(B * T, V * Cin)), p["spatial"],
                       act="relu")
    y = y[:B * T, :V * Cs].reshape(B, T, V, Cs)

    # --- temporal attention block (rows ordered (b, v, t)) ------------------
    yt = jnp.transpose(y, (0, 2, 1, 3)).reshape(B * V * T, Cs)
    h0 = fused_matmul_p(pad_act(yt), p["pre"])                    # pre_proj + BN
    h2 = twin_attn_block(h0, p, B * V, T, H, hd)
    h3 = fused_matmul_p(h2, p["post"])                            # post_proj + BN
    # temporal stride (depthwise k=1, stride s) applied before the transpose
    # so XLA fuses the slice into the relayout.
    h3 = h3[:B * V * T, :Cs].reshape(B, V, T, Cs)[:, :, ::stride]
    Tp = h3.shape[2]
    y2 = jnp.transpose(h3, (0, 2, 1, 3))                          # (B, Tp, V, Cs)

    # --- residual / skip path (DropBlocks are identity at inference) --------
    if not cfg["residual"]:
        add = None
    elif cfg["identity_skip"]:
        assert stride == 1 and Cin == Cout, "identity skip needs stride=1, Cin==Cout"
        add = pad_act(x.reshape(B * T * V, Cin))
    else:
        xs = x[:, ::stride].reshape(B * Tp * V, Cin)
        add = fused_matmul_p(pad_act(xs), p["skip"])              # unit_tcn_skip

    # pointwise conv + BN + residual add + ReLU, all fused in one kernel
    # TODO(synk): DepthWiseConv2d source not provided; depthwise(k=1) per-
    # channel scale folded into the pointwise weight.
    out = fused_matmul_p(pad_act(y2.reshape(B * Tp * V, Cs)), p["pool"],
                         add=add, act="relu")
    return out[:B * Tp * V, :Cout].reshape(B, Tp, V, Cout)


def model_forward(x, params, layer_cfgs, num_class):
    """x: (N, C, T, V, M) float32 -> (N, num_class) logits."""
    N, C, T, V, M = x.shape
    # channels-last skeleton tensor (N*M, T, V, C); identity-init data_bn
    # reduces to one scalar scale.
    xr = jnp.transpose(x, (0, 4, 2, 3, 1)).reshape(N * M, T, V, C)
    xr = (xr * _BN_SCALE).astype(jnp.bfloat16)

    # TODO(synk): DropBlock_Ske / DropBlockT_1d are stochastic training-time
    # regularizers -> identity at inference (keep_prob unused).
    for lp, cfg in zip(params["layers"], layer_cfgs):
        xr = sattn_tcn_unit(xr, lp, cfg)

    Bc, Tc, Vc, Cc = xr.shape
    feat = xr.astype(jnp.float32).reshape(N, M, Tc * Vc, Cc).mean(axis=(1, 2))
    logits = fused_matmul_p(pad_act(feat), params["fc"], out_dtype=jnp.float32)
    return logits[:N, :num_class]


# ----------------------------------------------------------------------------
# Deterministic parameter construction (weights pre-padded / pre-cast / folded)
# ----------------------------------------------------------------------------
def _dense(key, shape):
    fan_in = shape[0]
    return (jax.random.normal(key, shape, jnp.float32) /
            jnp.sqrt(jnp.float32(fan_in)))


def build_adjacency(V):
    """Deterministic 3-subset skeleton graph: identity, forward ring, backward ring."""
    eye = jnp.eye(V, dtype=jnp.float32)
    fwd = jnp.roll(eye, 1, axis=1)
    bwd = fwd.T
    A3 = jnp.stack([eye, fwd, bwd], axis=0)              # (3, V, V)
    A_sum = jnp.sum(A3, axis=0)                          # model's self.A
    a_hat = A_sum / jnp.sum(A_sum, axis=0, keepdims=True)
    return A3, a_hat


def init_params(key, layer_cfgs, V, num_class):
    _, a_hat = build_adjacency(V)
    keys = jax.random.split(key, 10 * len(layer_cfgs) + 2)
    ki = iter(range(len(keys)))
    layers = []
    for cfg in layer_cfgs:
        cin, cout, cs, hd, H = (cfg["cin"], cfg["cout"], cfg["cs"],
                                cfg["hd"], cfg["t_num_heads"])
        Dh = hd // H

        w_spatial = _dense(keys[next(ki)], (cin, cs))

        # fold 1/sqrt(Dh) into the q columns of qkv (removes in-kernel scaling)
        w_qkv = _dense(keys[next(ki)], (hd, 3 * hd))
        b_qkv = jnp.zeros((3 * hd,), jnp.float32)
        qsc = 1.0 / math.sqrt(Dh)
        w_qkv = jnp.concatenate([w_qkv[:, :hd] * qsc, w_qkv[:, hd:]], axis=1)
        b_qkv = jnp.concatenate([b_qkv[:hd] * qsc, b_qkv[hd:]])

        pool_dw = jnp.ones((cs,), jnp.float32)            # depthwise k=1 scale
        pool_pw = _dense(keys[next(ki)], (cs, cout))

        p = {
            # adjacency pre-composed with the spatial 1x1 conv; BN scale folded
            "spatial": make_mm(jnp.kron(a_hat, w_spatial), scale=_BN_SCALE),
            "pre":  make_mm(_dense(keys[next(ki)], (cs, hd)), scale=_BN_SCALE),
            "qkv":  make_mm(w_qkv, bias=b_qkv),
            "proj": make_mm(_dense(keys[next(ki)], (hd, hd)),
                            bias=jnp.zeros((hd,), jnp.float32)),
            "fc1":  make_mm(_dense(keys[next(ki)], (hd, 4 * hd)),
                            bias=jnp.zeros((4 * hd,), jnp.float32)),
            "fc2":  make_mm(_dense(keys[next(ki)], (4 * hd, hd)),
                            bias=jnp.zeros((hd,), jnp.float32)),
            "post": make_mm(_dense(keys[next(ki)], (hd, cs)), scale=_BN_SCALE),
            "pool": make_mm(pool_dw[:, None] * pool_pw, scale=_BN_SCALE),
        }
        if cfg["residual"] and not cfg["identity_skip"]:
            skip_pw = _dense(keys[next(ki)], (cin, cout))
            p["skip"] = make_mm(skip_pw, scale=_BN_SCALE)
        layers.append(p)

    c_final = layer_cfgs[-1]["cout"]
    fc_w = jax.random.normal(keys[next(ki)], (c_final, num_class),
                             jnp.float32) * math.sqrt(2.0 / num_class)
    fc_b = jnp.zeros((num_class,), jnp.float32)
    return {"layers": layers, "fc": make_mm(fc_w, bias=fc_b)}


# ----------------------------------------------------------------------------
# Demo
# ----------------------------------------------------------------------------
if __name__ == "__main__":
    # small shapes: N=2 clips, C=3 coords, T=8 frames, V=5 joints, M=2 persons
    N, C, T, V, M = 2, 3, 8, 5, 2
    num_class = 10
    inner_dim = 8
    t_num_heads = 2

    def mk_cfg(cin, cout, stride, is_first, residual):
        cs = cout if is_first else cin            # channels after spatial attn
        return dict(cin=cin, cout=cout, stride=stride, is_first=is_first,
                    residual=residual,
                    identity_skip=(residual and cin == cout and stride == 1),
                    t_num_heads=t_num_heads, cs=cs, hd=cs * t_num_heads)

    # depth = 2: layer0 (is_first, 3->8, stride 1, no residual),
    #            layer1 (8->16, stride 2, conv residual skip)
    layer_cfgs = [
        mk_cfg(C, inner_dim, 1, True, False),
        mk_cfg(inner_dim, 2 * inner_dim, 2, False, True),
    ]

    key = jax.random.PRNGKey(0)
    k_par, k_in = jax.random.split(key)
    params = init_params(k_par, layer_cfgs, V, num_class)
    x = jax.random.normal(k_in, (N, C, T, V, M), jnp.float32)

    fwd = jax.jit(lambda xx, pp: model_forward(xx, pp, layer_cfgs, num_class))
    logits = jax.block_until_ready(fwd(x, params))
    assert logits.shape == (N, num_class)
    assert bool(jnp.all(jnp.isfinite(logits)))
    print("KERNEL_OK")
</pallas_src>

<mosaic_0001>
module attributes {stable_mosaic.version = 11 : i64} {
  func.func @_fused_mm_kernel(%arg0: i32, %arg1: i32, %arg2: i32, %arg3: memref<32x128xbf16, #tpu.memory_space<vmem>>, %arg4: memref<128x128xbf16, #tpu.memory_space<vmem>>, %arg5: memref<1x128xf32, #tpu.memory_space<vmem>>, %arg6: memref<32x128xbf16, #tpu.memory_space<vmem>>, %arg7: memref<32x128xf32, #tpu.memory_space<vmem>>) attributes {dimension_semantics = [#tpu.dimension_semantics<parallel>, #tpu.dimension_semantics<parallel>, #tpu.dimension_semantics<arbitrary>], iteration_bounds = array<i64: 1, 1, 1>, scalar_prefetch = 0 : i64, scratch_operands = 1 : i64, tpu.core_type = #tpu.core_type<tc>, window_params = [{transform_indices = @transform_0, window_bounds = array<i64: 32, 128>}, {transform_indices = @transform_1, window_bounds = array<i64: 128, 128>}, {transform_indices = @transform_2, window_bounds = array<i64: 1, 128>}, {transform_indices = @transform_3, window_bounds = array<i64: 32, 128>}]} {
    %c0_i32 = arith.constant 0 : i32
    %0 = arith.cmpi eq, %arg2, %c0_i32 : i32
    %1 = arith.extui %0 : i1 to i32
    %c0_i32_0 = arith.constant 0 : i32
    %2 = arith.cmpi ne, %1, %c0_i32_0 : i32
    scf.if %2 {
      %cst_10 = arith.constant 0.000000e+00 : f32
      %12 = vector.broadcast %cst_10 : f32 to vector<32x128xf32>
      %c0_11 = arith.constant 0 : index
      %c0_12 = arith.constant 0 : index
      %13 = vector.load %arg7[%c0_11, %c0_12] : memref<32x128xf32, #tpu.memory_space<vmem>>, vector<32x128xf32>
      tpu.vector_store %arg7[%c0_11, %c0_12], %12 {strides = array<i32>} : memref<32x128xf32, #tpu.memory_space<vmem>>, vector<32x128xf32>,
    } else {
    }
    %c0 = arith.constant 0 : index
    %c0_1 = arith.constant 0 : index
    %3 = vector.load %arg3[%c0, %c0_1] : memref<32x128xbf16, #tpu.memory_space<vmem>>, vector<32x128xbf16>
    %c0_2 = arith.constant 0 : index
    %c0_3 = arith.constant 0 : index
    %4 = vector.load %arg7[%c0_2, %c0_3] : memref<32x128xf32, #tpu.memory_space<vmem>>, vector<32x128xf32>
    %c0_4 = arith.constant 0 : index
    %c0_5 = arith.constant 0 : index
    %5 = vector.load %arg4[%c0_4, %c0_5] : memref<128x128xbf16, #tpu.memory_space<vmem>>, vector<128x128xbf16>
    %cst = arith.constant dense<0.000000e+00> : vector<32x128xf32>
    %6 = tpu.matmul %3, %5, %cst {dimension_numbers = #tpu.dot_dimension_numbers<[1], [0], [0], [1], [0, 0, 1, 1], [], []>} : vector<32x128xbf16>, vector<128x128xbf16>, vector<32x128xf32> -> vector<32x128xf32>
    %7 = arith.addf %4, %6 : vector<32x128xf32>
    %c0_6 = arith.constant 0 : index
    %c0_7 = arith.constant 0 : index
    %8 = vector.load %arg7[%c0_6, %c0_7] : memref<32x128xf32, #tpu.memory_space<vmem>>, vector<32x128xf32>
    tpu.vector_store %arg7[%c0_6, %c0_7], %7 {strides = array<i32>} : memref<32x128xf32, #tpu.memory_space<vmem>>, vector<32x128xf32>,
    %c0_i32_8 = arith.constant 0 : i32
    %9 = arith.cmpi eq, %arg2, %c0_i32_8 : i32
    %10 = arith.extui %9 : i1 to i32
    %c0_i32_9 = arith.constant 0 : i32
    %11 = arith.cmpi ne, %10, %c0_i32_9 : i32
    scf.if %11 {
      %c0_10 = arith.constant 0 : index
      %c0_11 = arith.constant 0 : index
      %12 = vector.load %arg7[%c0_10, %c0_11] : memref<32x128xf32, #tpu.memory_space<vmem>>, vector<32x128xf32>
      %c0_12 = arith.constant 0 : index
      %c0_13 = arith.constant 0 : index
      %13 = vector.load %arg5[%c0_12, %c0_13] : memref<1x128xf32, #tpu.memory_space<vmem>>, vector<1x128xf32>
      %14 = vector.broadcast %13 : vector<1x128xf32> to vector<32x128xf32>
      %15 = arith.addf %12, %14 : vector<32x128xf32>
      %cst_14 = arith.constant 0.000000e+00 : f32
      %16 = vector.broadcast %cst_14 : f32 to vector<32x128xf32>
      %17 = arith.maximumf %15, %16 : vector<32x128xf32>
      %18 = arith.truncf %17 : vector<32x128xf32> to vector<32x128xbf16>
      %c0_15 = arith.constant 0 : index
      %c0_16 = arith.constant 0 : index
      %19 = vector.load %arg6[%c0_15, %c0_16] : memref<32x128xbf16, #tpu.memory_space<vmem>>, vector<32x128xbf16>
      tpu.vector_store %arg6[%c0_15, %c0_16], %18 {strides = array<i32>} : memref<32x128xbf16, #tpu.memory_space<vmem>>, vector<32x128xbf16>,
    } else {
    }
    return
  }
  func.func @transform_0(%arg0: i32, %arg1: i32, %arg2: i32) -> (i32, i32) {
    %c0_i32 = arith.constant 0 : i32
    return %arg0, %arg2 : i32, i32
  }
  func.func @transform_1(%arg0: i32, %arg1: i32, %arg2: i32) -> (i32, i32) {
    %c0_i32 = arith.constant 0 : i32
    return %arg2, %arg1 : i32, i32
  }
  func.func @transform_2(%arg0: i32, %arg1: i32, %arg2: i32) -> (i32, i32) {
    %c0_i32 = arith.constant 0 : i32
    %c0_i32_0 = arith.constant 0 : i32
    return %c0_i32, %arg1 : i32, i32
  }
  func.func @transform_3(%arg0: i32, %arg1: i32, %arg2: i32) -> (i32, i32) {
    %c0_i32 = arith.constant 0 : i32
    return %arg0, %arg1 : i32, i32
  }
}

module attributes {stable_mosaic.version = 11 : i64} {
  func.func @_fused_mm_kernel(%arg0: i32, %arg1: i32, %arg2: i32, %arg3: memref<160x128xbf16, #tpu.memory_space<vmem>>, %arg4: memref<128x128xbf16, #tpu.memory_space<vmem>>, %arg5: memref<1x128xf32, #tpu.memory_space<vmem>>, %arg6: memref<160x128xbf16, #tpu.memory_space<vmem>>, %arg7: memref<160x128xf32, #tpu.memory_space<vmem>>) attributes {dimension_semantics = [#tpu.dimension_semantics<parallel>, #tpu.dimension_semantics<parallel>, #tpu.dimension_semantics<arbitrary>], iteration_bounds = array<i64: 1, 1, 1>, scalar_prefetch = 0 : i64, scratch_operands = 1 : i64, tpu.core_type = #tpu.core_type<tc>, window_params = [{transform_indices = @transform_0, window_bounds = array<i64: 160, 128>}, {transform_indices = @transform_1, window_bounds = array<i64: 128, 128>}, {transform_indices = @transform_2, window_bounds = array<i64: 1, 128>}, {transform_indices = @transform_3, window_bounds = array<i64: 160, 128>}]} {
    %c0_i32 = arith.constant 0 : i32
    %0 = arith.cmpi eq, %arg2, %c0_i32 : i32
    %1 = arith.extui %0 : i1 to i32
    %c0_i32_0 = arith.constant 0 : i32
    %2 = arith.cmpi ne, %1, %c0_i32_0 : i32
    scf.if %2 {
      %cst_10 = arith.constant 0.000000e+00 : f32
      %12 = vector.broadcast %cst_10 : f32 to vector<160x128xf32>
      %c0_11 = arith.constant 0 : index
      %c0_12 = arith.constant 0 : index
      %13 = vector.load %arg7[%c0_11, %c0_12] : memref<160x128xf32, #tpu.memory_space<vmem>>, vector<160x128xf32>
      tpu.vector_store %arg7[%c0_11, %c0_12], %12 {strides = array<i32>} : memref<160x128xf32, #tpu.memory_space<vmem>>, vector<160x128xf32>,
    } else {
    }
    %c0 = arith.constant 0 : index
    %c0_1 = arith.constant 0 : index
    %3 = vector.load %arg3[%c0, %c0_1] : memref<160x128xbf16, #tpu.memory_space<vmem>>, vector<160x128xbf16>
    %c0_2 = arith.constant 0 : index
    %c0_3 = arith.constant 0 : index
    %4 = vector.load %arg7[%c0_2, %c0_3] : memref<160x128xf32, #tpu.memory_space<vmem>>, vector<160x128xf32>
    %c0_4 = arith.constant 0 : index
    %c0_5 = arith.constant 0 : index
    %5 = vector.load %arg4[%c0_4, %c0_5] : memref<128x128xbf16, #tpu.memory_space<vmem>>, vector<128x128xbf16>
    %cst = arith.constant dense<0.000000e+00> : vector<160x128xf32>
    %6 = tpu.matmul %3, %5, %cst {dimension_numbers = #tpu.dot_dimension_numbers<[1], [0], [0], [1], [0, 0, 1, 1], [], []>} : vector<160x128xbf16>, vector<128x128xbf16>, vector<160x128xf32> -> vector<160x128xf32>
    %7 = arith.addf %4, %6 : vector<160x128xf32>
    %c0_6 = arith.constant 0 : index
    %c0_7 = arith.constant 0 : index
    %8 = vector.load %arg7[%c0_6, %c0_7] : memref<160x128xf32, #tpu.memory_space<vmem>>, vector<160x128xf32>
    tpu.vector_store %arg7[%c0_6, %c0_7], %7 {strides = array<i32>} : memref<160x128xf32, #tpu.memory_space<vmem>>, vector<160x128xf32>,
    %c0_i32_8 = arith.constant 0 : i32
    %9 = arith.cmpi eq, %arg2, %c0_i32_8 : i32
    %10 = arith.extui %9 : i1 to i32
    %c0_i32_9 = arith.constant 0 : i32
    %11 = arith.cmpi ne, %10, %c0_i32_9 : i32
    scf.if %11 {
      %c0_10 = arith.constant 0 : index
      %c0_11 = arith.constant 0 : index
      %12 = vector.load %arg7[%c0_10, %c0_11] : memref<160x128xf32, #tpu.memory_space<vmem>>, vector<160x128xf32>
      %c0_12 = arith.constant 0 : index
      %c0_13 = arith.constant 0 : index
      %13 = vector.load %arg5[%c0_12, %c0_13] : memref<1x128xf32, #tpu.memory_space<vmem>>, vector<1x128xf32>
      %14 = vector.broadcast %13 : vector<1x128xf32> to vector<160x128xf32>
      %15 = arith.addf %12, %14 : vector<160x128xf32>
      %16 = arith.truncf %15 : vector<160x128xf32> to vector<160x128xbf16>
      %c0_14 = arith.constant 0 : index
      %c0_15 = arith.constant 0 : index
      %17 = vector.load %arg6[%c0_14, %c0_15] : memref<160x128xbf16, #tpu.memory_space<vmem>>, vector<160x128xbf16>
      tpu.vector_store %arg6[%c0_14, %c0_15], %16 {strides = array<i32>} : memref<160x128xbf16, #tpu.memory_space<vmem>>, vector<160x128xbf16>,
    } else {
    }
    return
  }
  func.func @transform_0(%arg0: i32, %arg1: i32, %arg2: i32) -> (i32, i32) {
    %c0_i32 = arith.constant 0 : i32
    return %arg0, %arg2 : i32, i32
  }
  func.func @transform_1(%arg0: i32, %arg1: i32, %arg2: i32) -> (i32, i32) {
    %c0_i32 = arith.constant 0 : i32
    return %arg2, %arg1 : i32, i32
  }
  func.func @transform_2(%arg0: i32, %arg1: i32, %arg2: i32) -> (i32, i32) {
    %c0_i32 = arith.constant 0 : i32
    %c0_i32_0 = arith.constant 0 : i32
    return %c0_i32, %arg1 : i32, i32
  }
  func.func @transform_3(%arg0: i32, %arg1: i32, %arg2: i32) -> (i32, i32) {
    %c0_i32 = arith.constant 0 : i32
    return %arg0, %arg1 : i32, i32
  }
}

module attributes {stable_mosaic.version = 11 : i64} {
  func.func @_fused_mm_kernel(%arg0: i32, %arg1: i32, %arg2: i32, %arg3: memref<160x128xbf16, #tpu.memory_space<vmem>>, %arg4: memref<128x128xbf16, #tpu.memory_space<vmem>>, %arg5: memref<1x128xf32, #tpu.memory_space<vmem>>, %arg6: memref<160x128xbf16, #tpu.memory_space<vmem>>, %arg7: memref<160x128xf32, #tpu.memory_space<vmem>>, %arg8: memref<160x128xbf16, #tpu.memory_space<vmem>>) attributes {dimension_semantics = [#tpu.dimension_semantics<parallel>, #tpu.dimension_semantics<arbitrary>, #tpu.dimension_semantics<arbitrary>], iteration_bounds = array<i64: 1, 1, 1>, scalar_prefetch = 0 : i64, scratch_operands = 2 : i64, tpu.core_type = #tpu.core_type<tc>, window_params = [{transform_indices = @transform_0, window_bounds = array<i64: 160, 128>}, {transform_indices = @transform_1, window_bounds = array<i64: 128, 128>}, {transform_indices = @transform_2, window_bounds = array<i64: 1, 128>}, {transform_indices = @transform_3, window_bounds = array<i64: 160, 128>}]} {
    %c0_i32 = arith.constant 0 : i32
    %0 = arith.cmpi eq, %arg2, %c0_i32 : i32
    %1 = arith.extui %0 : i1 to i32
    %c0_i32_0 = arith.constant 0 : i32
    %2 = arith.cmpi ne, %1, %c0_i32_0 : i32
    scf.if %2 {
      %cst_12 = arith.constant 0.000000e+00 : f32
      %15 = vector.broadcast %cst_12 : f32 to vector<160x128xf32>
      %c0_13 = arith.constant 0 : index
      %c0_14 = arith.constant 0 : index
      %16 = vector.load %arg7[%c0_13, %c0_14] : memref<160x128xf32, #tpu.memory_space<vmem>>, vector<160x128xf32>
      tpu.vector_store %arg7[%c0_13, %c0_14], %15 {strides = array<i32>} : memref<160x128xf32, #tpu.memory_space<vmem>>, vector<160x128xf32>,
    } else {
    }
    %c0_i32_1 = arith.constant 0 : i32
    %3 = arith.cmpi eq, %arg1, %c0_i32_1 : i32
    %4 = arith.extui %3 : i1 to i32
    %c0_i32_2 = arith.constant 0 : i32
    %5 = arith.cmpi ne, %4, %c0_i32_2 : i32
    scf.if %5 {
      %c0_12 = arith.constant 0 : index
      %c0_13 = arith.constant 0 : index
      %15 = vector.load %arg3[%c0_12, %c0_13] : memref<160x128xbf16, #tpu.memory_space<vmem>>, vector<160x128xbf16>
      %16 = arith.extf %15 : vector<160x128xbf16> to vector<160x128xf32>
      %cst_14 = arith.constant dense<0.000000e+00> : vector<160xf32>
      %17 = vector.multi_reduction <add>, %16, %cst_14 [1] : vector<160x128xf32> to vector<160xf32>
      %18 = vector.shape_cast %17 : vector<160xf32> to vector<160x1xf32>
      %19 = arith.mulf %16, %16 : vector<160x128xf32>
      %cst_15 = arith.constant dense<0.000000e+00> : vector<160xf32>
      %20 = vector.multi_reduction <add>, %19, %cst_15 [1] : vector<160x128xf32> to vector<160xf32>
      %21 = vector.shape_cast %20 : vector<160xf32> to vector<160x1xf32>
      %cst_16 = arith.constant 6.250000e-02 : f32
      %22 = vector.broadcast %cst_16 : f32 to vector<160x1xf32>
      %23 = arith.mulf %18, %22 : vector<160x1xf32>
      %cst_17 = arith.constant 6.250000e-02 : f32
      %24 = vector.broadcast %cst_17 : f32 to vector<160x1xf32>
      %25 = arith.mulf %21, %24 : vector<160x1xf32>
      %26 = arith.mulf %23, %23 : vector<160x1xf32>
      %27 = arith.subf %25, %26 : vector<160x1xf32>
      %28 = vector.broadcast %23 : vector<160x1xf32> to vector<160x128xf32>
      %29 = arith.subf %16, %28 : vector<160x128xf32>
      %cst_18 = arith.constant 9.99999997E-7 : f32
      %30 = vector.broadcast %cst_18 : f32 to vector<160x1xf32>
      %31 = arith.addf %27, %30 : vector<160x1xf32>
      %32 = math.rsqrt %31 : vector<160x1xf32>
      %33 = vector.broadcast %32 : vector<160x1xf32> to vector<160x128xf32>
      %34 = arith.mulf %29, %33 : vector<160x128xf32>
      %35 = arith.truncf %34 : vector<160x128xf32> to vector<160x128xbf16>
      %c0_19 = arith.constant 0 : index
      %c0_20 = arith.constant 0 : index
      %36 = vector.load %arg8[%c0_19, %c0_20] : memref<160x128xbf16, #tpu.memory_space<vmem>>, vector<160x128xbf16>
      tpu.vector_store %arg8[%c0_19, %c0_20], %35 {strides = array<i32>} : memref<160x128xbf16, #tpu.memory_space<vmem>>, vector<160x128xbf16>,
    } else {
    }
    %c0 = arith.constant 0 : index
    %c0_3 = arith.constant 0 : index
    %6 = vector.load %arg8[%c0, %c0_3] : memref<160x128xbf16, #tpu.memory_space<vmem>>, vector<160x128xbf16>
    %c0_4 = arith.constant 0 : index
    %c0_5 = arith.constant 0 : index
    %7 = vector.load %arg7[%c0_4, %c0_5] : memref<160x128xf32, #tpu.memory_space<vmem>>, vector<160x128xf32>
    %c0_6 = arith.constant 0 : index
    %c0_7 = arith.constant 0 : index
    %8 = vector.load %arg4[%c0_6, %c0_7] : memref<128x128xbf16, #tpu.memory_space<vmem>>, vector<128x128xbf16>
    %cst = arith.constant dense<0.000000e+00> : vector<160x128xf32>
    %9 = tpu.matmul %6, %8, %cst {dimension_numbers = #tpu.dot_dimension_numbers<[1], [0], [0], [1], [0, 0, 1, 1], [], []>} : vector<160x128xbf16>, vector<128x128xbf16>, vector<160x128xf32> -> vector<160x128xf32>
    %10 = arith.addf %7, %9 : vector<160x128xf32>
    %c0_8 = arith.constant 0 : index
    %c0_9 = arith.constant 0 : index
    %11 = vector.load %arg7[%c0_8, %c0_9] : memref<160x128xf32, #tpu.memory_space<vmem>>, vector<160x128xf32>
    tpu.vector_store %arg7[%c0_8, %c0_9], %10 {strides = array<i32>} : memref<160x128xf32, #tpu.memory_space<vmem>>, vector<160x128xf32>,
    %c0_i32_10 = arith.constant 0 : i32
    %12 = arith.cmpi eq, %arg2, %c0_i32_10 : i32
    %13 = arith.extui %12 : i1 to i32
    %c0_i32_11 = arith.constant 0 : i32
    %14 = arith.cmpi ne, %13, %c0_i32_11 : i32
    scf.if %14 {
      %c0_12 = arith.constant 0 : index
      %c0_13 = arith.constant 0 : index
      %15 = vector.load %arg7[%c0_12, %c0_13] : memref<160x128xf32, #tpu.memory_space<vmem>>, vector<160x128xf32>
      %c0_14 = arith.constant 0 : index
      %c0_15 = arith.constant 0 : index
      %16 = vector.load %arg5[%c0_14, %c0_15] : memref<1x128xf32, #tpu.memory_space<vmem>>, vector<1x128xf32>
      %17 = vector.broadcast %16 : vector<1x128xf32> to vector<160x128xf32>
      %18 = arith.addf %15, %17 : vector<160x128xf32>
      %19 = arith.truncf %18 : vector<160x128xf32> to vector<160x128xbf16>
      %c0_16 = arith.constant 0 : index
      %c0_17 = arith.constant 0 : index
      %20 = vector.load %arg6[%c0_16, %c0_17] : memref<160x128xbf16, #tpu.memory_space<vmem>>, vector<160x128xbf16>
      tpu.vector_store %arg6[%c0_16, %c0_17], %19 {strides = array<i32>} : memref<160x128xbf16, #tpu.memory_space<vmem>>, vector<160x128xbf16>,
    } else {
    }
    return
  }
  func.func @transform_0(%arg0: i32, %arg1: i32, %arg2: i32) -> (i32, i32) {
    %c0_i32 = arith.constant 0 : i32
    return %arg0, %arg2 : i32, i32
  }
  func.func @transform_1(%arg0: i32, %arg1: i32, %arg2: i32) -> (i32, i32) {
    %c0_i32 = arith.constant 0 : i32
    return %arg2, %arg1 : i32, i32
  }
  func.func @transform_2(%arg0: i32, %arg1: i32, %arg2: i32) -> (i32, i32) {
    %c0_i32 = arith.constant 0 : i32
    %c0_i32_0 = arith.constant 0 : i32
    return %c0_i32, %arg1 : i32, i32
  }
  func.func @transform_3(%arg0: i32, %arg1: i32, %arg2: i32) -> (i32, i32) {
    %c0_i32 = arith.constant 0 : i32
    return %arg0, %arg1 : i32, i32
  }
}

module attributes {stable_mosaic.version = 11 : i64} {
  func.func @_attn_kernel(%arg0: i32, %arg1: memref<40x8x8xbf16, #tpu.memory_space<vmem>>, %arg2: memref<40x8x8xbf16, #tpu.memory_space<vmem>>, %arg3: memref<40x8x8xbf16, #tpu.memory_space<vmem>>, %arg4: memref<40x8x8xbf16, #tpu.memory_space<vmem>>) attributes {dimension_semantics = [#tpu.dimension_semantics<parallel>], iteration_bounds = array<i64: 1>, scalar_prefetch = 0 : i64, scratch_operands = 0 : i64, tpu.core_type = #tpu.core_type<tc>, window_params = [{transform_indices = @transform_0, window_bounds = array<i64: 40, 8, 8>}, {transform_indices = @transform_1, window_bounds = array<i64: 40, 8, 8>}, {transform_indices = @transform_2, window_bounds = array<i64: 40, 8, 8>}, {transform_indices = @transform_3, window_bounds = array<i64: 40, 8, 8>}]} {
    %c0 = arith.constant 0 : index
    %c0_0 = arith.constant 0 : index
    %c0_1 = arith.constant 0 : index
    %0 = vector.load %arg1[%c0, %c0_0, %c0_1] : memref<40x8x8xbf16, #tpu.memory_space<vmem>>, vector<40x8x8xbf16>
    %c0_2 = arith.constant 0 : index
    %c0_3 = arith.constant 0 : index
    %c0_4 = arith.constant 0 : index
    %1 = vector.load %arg2[%c0_2, %c0_3, %c0_4] : memref<40x8x8xbf16, #tpu.memory_space<vmem>>, vector<40x8x8xbf16>
    %c0_5 = arith.constant 0 : index
    %c0_6 = arith.constant 0 : index
    %c0_7 = arith.constant 0 : index
    %2 = vector.load %arg3[%c0_5, %c0_6, %c0_7] : memref<40x8x8xbf16, #tpu.memory_space<vmem>>, vector<40x8x8xbf16>
    %cst = arith.constant dense<0.000000e+00> : vector<40x8x8xf32>
    %3 = tpu.matmul %0, %1, %cst {dimension_numbers = #tpu.dot_dimension_numbers<[2], [2], [1], [1], [0, 0, 0, 1, 1, 1], [0], [0]>} : vector<40x8x8xbf16>, vector<40x8x8xbf16>, vector<40x8x8xf32> -> vector<40x8x8xf32>
    %cst_8 = arith.constant dense<0xFF800000> : vector<40x8xf32>
    %4 = vector.multi_reduction <maximumf>, %3, %cst_8 [2] : vector<40x8x8xf32> to vector<40x8xf32>
    %5 = vector.shape_cast %4 : vector<40x8xf32> to vector<40x8x1xf32>
    %6 = vector.broadcast %5 : vector<40x8x1xf32> to vector<40x8x8xf32>
    %7 = arith.subf %3, %6 : vector<40x8x8xf32>
    %8 = math.exp %7 : vector<40x8x8xf32>
    %cst_9 = arith.constant dense<0.000000e+00> : vector<40x8xf32>
    %9 = vector.multi_reduction <add>, %8, %cst_9 [2] : vector<40x8x8xf32> to vector<40x8xf32>
    %10 = vector.shape_cast %9 : vector<40x8xf32> to vector<40x8x1xf32>
    %11 = tpu.reciprocal %10 {approx = true} : vector<40x8x1xf32> -> vector<40x8x1xf32>
    %12 = vector.broadcast %11 : vector<40x8x1xf32> to vector<40x8x8xf32>
    %13 = arith.mulf %8, %12 : vector<40x8x8xf32>
    %14 = arith.truncf %13 : vector<40x8x8xf32> to vector<40x8x8xbf16>
    %cst_10 = arith.constant dense<0.000000e+00> : vector<40x8x8xf32>
    %15 = tpu.matmul %14, %2, %cst_10 {dimension_numbers = #tpu.dot_dimension_numbers<[2], [1], [1], [2], [0, 0, 0, 1, 1, 2], [0], [0]>} : vector<40x8x8xbf16>, vector<40x8x8xbf16>, vector<40x8x8xf32> -> vector<40x8x8xf32>
    %16 = arith.truncf %15 : vector<40x8x8xf32> to vector<40x8x8xbf16>
    %c0_11 = arith.constant 0 : index
    %c0_12 = arith.constant 0 : index
    %c0_13 = arith.constant 0 : index
    %17 = vector.load %arg4[%c0_11, %c0_12, %c0_13] : memref<40x8x8xbf16, #tpu.memory_space<vmem>>, vector<40x8x8xbf16>
    tpu.vector_store %arg4[%c0_11, %c0_12, %c0_13], %16 {strides = array<i32>} : memref<40x8x8xbf16, #tpu.memory_space<vmem>>, vector<40x8x8xbf16>,
    return
  }
  func.func @transform_0(%arg0: i32) -> (i32, i32, i32) {
    %c0_i32 = arith.constant 0 : i32
    %c0_i32_0 = arith.constant 0 : i32
    %c0_i32_1 = arith.constant 0 : i32
    return %arg0, %c0_i32, %c0_i32_0 : i32, i32, i32
  }
  func.func @transform_1(%arg0: i32) -> (i32, i32, i32) {
    %c0_i32 = arith.constant 0 : i32
    %c0_i32_0 = arith.constant 0 : i32
    %c0_i32_1 = arith.constant 0 : i32
    return %arg0, %c0_i32, %c0_i32_0 : i32, i32, i32
  }
  func.func @transform_2(%arg0: i32) -> (i32, i32, i32) {
    %c0_i32 = arith.constant 0 : i32
    %c0_i32_0 = arith.constant 0 : i32
    %c0_i32_1 = arith.constant 0 : i32
    return %arg0, %c0_i32, %c0_i32_0 : i32, i32, i32
  }
  func.func @transform_3(%arg0: i32) -> (i32, i32, i32) {
    %c0_i32 = arith.constant 0 : i32
    %c0_i32_0 = arith.constant 0 : i32
    %c0_i32_1 = arith.constant 0 : i32
    return %arg0, %c0_i32, %c0_i32_0 : i32, i32, i32
  }
}

module attributes {stable_mosaic.version = 11 : i64} {
  func.func @_fused_mm_kernel(%arg0: i32, %arg1: i32, %arg2: i32, %arg3: memref<160x128xbf16, #tpu.memory_space<vmem>>, %arg4: memref<128x128xbf16, #tpu.memory_space<vmem>>, %arg5: memref<1x128xf32, #tpu.memory_space<vmem>>, %arg6: memref<160x128xbf16, #tpu.memory_space<vmem>>, %arg7: memref<160x128xbf16, #tpu.memory_space<vmem>>, %arg8: memref<160x128xf32, #tpu.memory_space<vmem>>) attributes {dimension_semantics = [#tpu.dimension_semantics<parallel>, #tpu.dimension_semantics<parallel>, #tpu.dimension_semantics<arbitrary>], iteration_bounds = array<i64: 1, 1, 1>, scalar_prefetch = 0 : i64, scratch_operands = 1 : i64, tpu.core_type = #tpu.core_type<tc>, window_params = [{transform_indices = @transform_0, window_bounds = array<i64: 160, 128>}, {transform_indices = @transform_1, window_bounds = array<i64: 128, 128>}, {transform_indices = @transform_2, window_bounds = array<i64: 1, 128>}, {transform_indices = @transform_3, window_bounds = array<i64: 160, 128>}, {transform_indices = @transform_4, window_bounds = array<i64: 160, 128>}]} {
    %c0_i32 = arith.constant 0 : i32
    %0 = arith.cmpi eq, %arg2, %c0_i32 : i32
    %1 = arith.extui %0 : i1 to i32
    %c0_i32_0 = arith.constant 0 : i32
    %2 = arith.cmpi ne, %1, %c0_i32_0 : i32
    scf.if %2 {
      %cst_10 = arith.constant 0.000000e+00 : f32
      %12 = vector.broadcast %cst_10 : f32 to vector<160x128xf32>
      %c0_11 = arith.constant 0 : index
      %c0_12 = arith.constant 0 : index
      %13 = vector.load %arg8[%c0_11, %c0_12] : memref<160x128xf32, #tpu.memory_space<vmem>>, vector<160x128xf32>
      tpu.vector_store %arg8[%c0_11, %c0_12], %12 {strides = array<i32>} : memref<160x128xf32, #tpu.memory_space<vmem>>, vector<160x128xf32>,
    } else {
    }
    %c0 = arith.constant 0 : index
    %c0_1 = arith.constant 0 : index
    %3 = vector.load %arg3[%c0, %c0_1] : memref<160x128xbf16, #tpu.memory_space<vmem>>, vector<160x128xbf16>
    %c0_2 = arith.constant 0 : index
    %c0_3 = arith.constant 0 : index
    %4 = vector.load %arg8[%c0_2, %c0_3] : memref<160x128xf32, #tpu.memory_space<vmem>>, vector<160x128xf32>
    %c0_4 = arith.constant 0 : index
    %c0_5 = arith.constant 0 : index
    %5 = vector.load %arg4[%c0_4, %c0_5] : memref<128x128xbf16, #tpu.memory_space<vmem>>, vector<128x128xbf16>
    %cst = arith.constant dense<0.000000e+00> : vector<160x128xf32>
    %6 = tpu.matmul %3, %5, %cst {dimension_numbers = #tpu.dot_dimension_numbers<[1], [0], [0], [1], [0, 0, 1, 1], [], []>} : vector<160x128xbf16>, vector<128x128xbf16>, vector<160x128xf32> -> vector<160x128xf32>
    %7 = arith.addf %4, %6 : vector<160x128xf32>
    %c0_6 = arith.constant 0 : index
    %c0_7 = arith.constant 0 : index
    %8 = vector.load %arg8[%c0_6, %c0_7] : memref<160x128xf32, #tpu.memory_space<vmem>>, vector<160x128xf32>
    tpu.vector_store %arg8[%c0_6, %c0_7], %7 {strides = array<i32>} : memref<160x128xf32, #tpu.memory_space<vmem>>, vector<160x128xf32>,
    %c0_i32_8 = arith.constant 0 : i32
    %9 = arith.cmpi eq, %arg2, %c0_i32_8 : i32
    %10 = arith.extui %9 : i1 to i32
    %c0_i32_9 = arith.constant 0 : i32
    %11 = arith.cmpi ne, %10, %c0_i32_9 : i32
    scf.if %11 {
      %c0_10 = arith.constant 0 : index
      %c0_11 = arith.constant 0 : index
      %12 = vector.load %arg8[%c0_10, %c0_11] : memref<160x128xf32, #tpu.memory_space<vmem>>, vector<160x128xf32>
      %c0_12 = arith.constant 0 : index
      %c0_13 = arith.constant 0 : index
      %13 = vector.load %arg5[%c0_12, %c0_13] : memref<1x128xf32, #tpu.memory_space<vmem>>, vector<1x128xf32>
      %14 = vector.broadcast %13 : vector<1x128xf32> to vector<160x128xf32>
      %15 = arith.addf %12, %14 : vector<160x128xf32>
      %c0_14 = arith.constant 0 : index
      %c0_15 = arith.constant 0 : index
      %16 = vector.load %arg6[%c0_14, %c0_15] : memref<160x128xbf16, #tpu.memory_space<vmem>>, vector<160x128xbf16>
      %17 = arith.extf %16 : vector<160x128xbf16> to vector<160x128xf32>
      %18 = arith.addf %15, %17 : vector<160x128xf32>
      %19 = arith.truncf %18 : vector<160x128xf32> to vector<160x128xbf16>
      %c0_16 = arith.constant 0 : index
      %c0_17 = arith.constant 0 : index
      %20 = vector.load %arg7[%c0_16, %c0_17] : memref<160x128xbf16, #tpu.memory_space<vmem>>, vector<160x128xbf16>
      tpu.vector_store %arg7[%c0_16, %c0_17], %19 {strides = array<i32>} : memref<160x128xbf16, #tpu.memory_space<vmem>>, vector<160x128xbf16>,
    } else {
    }
    return
  }
  func.func @transform_0(%arg0: i32, %arg1: i32, %arg2: i32) -> (i32, i32) {
    %c0_i32 = arith.constant 0 : i32
    return %arg0, %arg2 : i32, i32
  }
  func.func @transform_1(%arg0: i32, %arg1: i32, %arg2: i32) -> (i32, i32) {
    %c0_i32 = arith.constant 0 : i32
    return %arg2, %arg1 : i32, i32
  }
  func.func @transform_2(%arg0: i32, %arg1: i32, %arg2: i32) -> (i32, i32) {
    %c0_i32 = arith.constant 0 : i32
    %c0_i32_0 = arith.constant 0 : i32
    return %c0_i32, %arg1 : i32, i32
  }
  func.func @transform_3(%arg0: i32, %arg1: i32, %arg2: i32) -> (i32, i32) {
    %c0_i32 = arith.constant 0 : i32
    return %arg0, %arg1 : i32, i32
  }
  func.func @transform_4(%arg0: i32, %arg1: i32, %arg2: i32) -> (i32, i32) {
    %c0_i32 = arith.constant 0 : i32
    return %arg0, %arg1 : i32, i32
  }
}

module attributes {stable_mosaic.version = 11 : i64} {
  func.func @_fused_mm_kernel(%arg0: i32, %arg1: i32, %arg2: i32, %arg3: memref<160x128xbf16, #tpu.memory_space<vmem>>, %arg4: memref<128x128xbf16, #tpu.memory_space<vmem>>, %arg5: memref<1x128xf32, #tpu.memory_space<vmem>>, %arg6: memref<160x128xbf16, #tpu.memory_space<vmem>>, %arg7: memref<160x128xf32, #tpu.memory_space<vmem>>, %arg8: memref<160x128xbf16, #tpu.memory_space<vmem>>) attributes {dimension_semantics = [#tpu.dimension_semantics<parallel>, #tpu.dimension_semantics<arbitrary>, #tpu.dimension_semantics<arbitrary>], iteration_bounds = array<i64: 1, 1, 1>, scalar_prefetch = 0 : i64, scratch_operands = 2 : i64, tpu.core_type = #tpu.core_type<tc>, window_params = [{transform_indices = @transform_0, window_bounds = array<i64: 160, 128>}, {transform_indices = @transform_1, window_bounds = array<i64: 128, 128>}, {transform_indices = @transform_2, window_bounds = array<i64: 1, 128>}, {transform_indices = @transform_3, window_bounds = array<i64: 160, 128>}]} {
    %c0_i32 = arith.constant 0 : i32
    %0 = arith.cmpi eq, %arg2, %c0_i32 : i32
    %1 = arith.extui %0 : i1 to i32
    %c0_i32_0 = arith.constant 0 : i32
    %2 = arith.cmpi ne, %1, %c0_i32_0 : i32
    scf.if %2 {
      %cst_12 = arith.constant 0.000000e+00 : f32
      %15 = vector.broadcast %cst_12 : f32 to vector<160x128xf32>
      %c0_13 = arith.constant 0 : index
      %c0_14 = arith.constant 0 : index
      %16 = vector.load %arg7[%c0_13, %c0_14] : memref<160x128xf32, #tpu.memory_space<vmem>>, vector<160x128xf32>
      tpu.vector_store %arg7[%c0_13, %c0_14], %15 {strides = array<i32>} : memref<160x128xf32, #tpu.memory_space<vmem>>, vector<160x128xf32>,
    } else {
    }
    %c0_i32_1 = arith.constant 0 : i32
    %3 = arith.cmpi eq, %arg1, %c0_i32_1 : i32
    %4 = arith.extui %3 : i1 to i32
    %c0_i32_2 = arith.constant 0 : i32
    %5 = arith.cmpi ne, %4, %c0_i32_2 : i32
    scf.if %5 {
      %c0_12 = arith.constant 0 : index
      %c0_13 = arith.constant 0 : index
      %15 = vector.load %arg3[%c0_12, %c0_13] : memref<160x128xbf16, #tpu.memory_space<vmem>>, vector<160x128xbf16>
      %16 = arith.extf %15 : vector<160x128xbf16> to vector<160x128xf32>
      %cst_14 = arith.constant dense<0.000000e+00> : vector<160xf32>
      %17 = vector.multi_reduction <add>, %16, %cst_14 [1] : vector<160x128xf32> to vector<160xf32>
      %18 = vector.shape_cast %17 : vector<160xf32> to vector<160x1xf32>
      %19 = arith.mulf %16, %16 : vector<160x128xf32>
      %cst_15 = arith.constant dense<0.000000e+00> : vector<160xf32>
      %20 = vector.multi_reduction <add>, %19, %cst_15 [1] : vector<160x128xf32> to vector<160xf32>
      %21 = vector.shape_cast %20 : vector<160xf32> to vector<160x1xf32>
      %cst_16 = arith.constant 6.250000e-02 : f32
      %22 = vector.broadcast %cst_16 : f32 to vector<160x1xf32>
      %23 = arith.mulf %18, %22 : vector<160x1xf32>
      %cst_17 = arith.constant 6.250000e-02 : f32
      %24 = vector.broadcast %cst_17 : f32 to vector<160x1xf32>
      %25 = arith.mulf %21, %24 : vector<160x1xf32>
      %26 = arith.mulf %23, %23 : vector<160x1xf32>
      %27 = arith.subf %25, %26 : vector<160x1xf32>
      %28 = vector.broadcast %23 : vector<160x1xf32> to vector<160x128xf32>
      %29 = arith.subf %16, %28 : vector<160x128xf32>
      %cst_18 = arith.constant 9.99999997E-7 : f32
      %30 = vector.broadcast %cst_18 : f32 to vector<160x1xf32>
      %31 = arith.addf %27, %30 : vector<160x1xf32>
      %32 = math.rsqrt %31 : vector<160x1xf32>
      %33 = vector.broadcast %32 : vector<160x1xf32> to vector<160x128xf32>
      %34 = arith.mulf %29, %33 : vector<160x128xf32>
      %35 = arith.truncf %34 : vector<160x128xf32> to vector<160x128xbf16>
      %c0_19 = arith.constant 0 : index
      %c0_20 = arith.constant 0 : index
      %36 = vector.load %arg8[%c0_19, %c0_20] : memref<160x128xbf16, #tpu.memory_space<vmem>>, vector<160x128xbf16>
      tpu.vector_store %arg8[%c0_19, %c0_20], %35 {strides = array<i32>} : memref<160x128xbf16, #tpu.memory_space<vmem>>, vector<160x128xbf16>,
    } else {
    }
    %c0 = arith.constant 0 : index
    %c0_3 = arith.constant 0 : index
    %6 = vector.load %arg8[%c0, %c0_3] : memref<160x128xbf16, #tpu.memory_space<vmem>>, vector<160x128xbf16>
    %c0_4 = arith.constant 0 : index
    %c0_5 = arith.constant 0 : index
    %7 = vector.load %arg7[%c0_4, %c0_5] : memref<160x128xf32, #tpu.memory_space<vmem>>, vector<160x128xf32>
    %c0_6 = arith.constant 0 : index
    %c0_7 = arith.constant 0 : index
    %8 = vector.load %arg4[%c0_6, %c0_7] : memref<128x128xbf16, #tpu.memory_space<vmem>>, vector<128x128xbf16>
    %cst = arith.constant dense<0.000000e+00> : vector<160x128xf32>
    %9 = tpu.matmul %6, %8, %cst {dimension_numbers = #tpu.dot_dimension_numbers<[1], [0], [0], [1], [0, 0, 1, 1], [], []>} : vector<160x128xbf16>, vector<128x128xbf16>, vector<160x128xf32> -> vector<160x128xf32>
    %10 = arith.addf %7, %9 : vector<160x128xf32>
    %c0_8 = arith.constant 0 : index
    %c0_9 = arith.constant 0 : index
    %11 = vector.load %arg7[%c0_8, %c0_9] : memref<160x128xf32, #tpu.memory_space<vmem>>, vector<160x128xf32>
    tpu.vector_store %arg7[%c0_8, %c0_9], %10 {strides = array<i32>} : memref<160x128xf32, #tpu.memory_space<vmem>>, vector<160x128xf32>,
    %c0_i32_10 = arith.constant 0 : i32
    %12 = arith.cmpi eq, %arg2, %c0_i32_10 : i32
    %13 = arith.extui %12 : i1 to i32
    %c0_i32_11 = arith.constant 0 : i32
    %14 = arith.cmpi ne, %13, %c0_i32_11 : i32
    scf.if %14 {
      %c0_12 = arith.constant 0 : index
      %c0_13 = arith.constant 0 : index
      %15 = vector.load %arg7[%c0_12, %c0_13] : memref<160x128xf32, #tpu.memory_space<vmem>>, vector<160x128xf32>
      %c0_14 = arith.constant 0 : index
      %c0_15 = arith.constant 0 : index
      %16 = vector.load %arg5[%c0_14, %c0_15] : memref<1x128xf32, #tpu.memory_space<vmem>>, vector<1x128xf32>
      %17 = vector.broadcast %16 : vector<1x128xf32> to vector<160x128xf32>
      %18 = arith.addf %15, %17 : vector<160x128xf32>
      %19 = arith.mulf %18, %18 : vector<160x128xf32>
      %20 = arith.mulf %18, %19 : vector<160x128xf32>
      %cst_16 = arith.constant 4.471500e-02 : f32
      %21 = vector.broadcast %cst_16 : f32 to vector<160x128xf32>
      %22 = arith.mulf %21, %20 : vector<160x128xf32>
      %23 = arith.addf %18, %22 : vector<160x128xf32>
      %cst_17 = arith.constant 0.797884583 : f32
      %24 = vector.broadcast %cst_17 : f32 to vector<160x128xf32>
      %25 = arith.mulf %24, %23 : vector<160x128xf32>
      %26 = math.tanh %25 : vector<160x128xf32>
      %cst_18 = arith.constant 1.000000e+00 : f32
      %27 = vector.broadcast %cst_18 : f32 to vector<160x128xf32>
      %28 = arith.addf %27, %26 : vector<160x128xf32>
      %cst_19 = arith.constant 5.000000e-01 : f32
      %29 = vector.broadcast %cst_19 : f32 to vector<160x128xf32>
      %30 = arith.mulf %29, %28 : vector<160x128xf32>
      %31 = arith.mulf %18, %30 : vector<160x128xf32>
      %32 = arith.truncf %31 : vector<160x128xf32> to vector<160x128xbf16>
      %c0_20 = arith.constant 0 : index
      %c0_21 = arith.constant 0 : index
      %33 = vector.load %arg6[%c0_20, %c0_21] : memref<160x128xbf16, #tpu.memory_space<vmem>>, vector<160x128xbf16>
      tpu.vector_store %arg6[%c0_20, %c0_21], %32 {strides = array<i32>} : memref<160x128xbf16, #tpu.memory_space<vmem>>, vector<160x128xbf16>,
    } else {
    }
    return
  }
  func.func @transform_0(%arg0: i32, %arg1: i32, %arg2: i32) -> (i32, i32) {
    %c0_i32 = arith.constant 0 : i32
    return %arg0, %arg2 : i32, i32
  }
  func.func @transform_1(%arg0: i32, %arg1: i32, %arg2: i32) -> (i32, i32) {
    %c0_i32 = arith.constant 0 : i32
    return %arg2, %arg1 : i32, i32
  }
  func.func @transform_2(%arg0: i32, %arg1: i32, %arg2: i32) -> (i32, i32) {
    %c0_i32 = arith.constant 0 : i32
    %c0_i32_0 = arith.constant 0 : i32
    return %c0_i32, %arg1 : i32, i32
  }
  func.func @transform_3(%arg0: i32, %arg1: i32, %arg2: i32) -> (i32, i32) {
    %c0_i32 = arith.constant 0 : i32
    return %arg0, %arg1 : i32, i32
  }
}

module attributes {stable_mosaic.version = 11 : i64} {
  func.func @_fused_mm_kernel(%arg0: i32, %arg1: i32, %arg2: i32, %arg3: memref<160x128xbf16, #tpu.memory_space<vmem>>, %arg4: memref<128x128xbf16, #tpu.memory_space<vmem>>, %arg5: memref<1x128xf32, #tpu.memory_space<vmem>>, %arg6: memref<160x128xbf16, #tpu.memory_space<vmem>>, %arg7: memref<160x128xf32, #tpu.memory_space<vmem>>) attributes {dimension_semantics = [#tpu.dimension_semantics<parallel>, #tpu.dimension_semantics<parallel>, #tpu.dimension_semantics<arbitrary>], iteration_bounds = array<i64: 1, 1, 1>, scalar_prefetch = 0 : i64, scratch_operands = 1 : i64, tpu.core_type = #tpu.core_type<tc>, window_params = [{transform_indices = @transform_0, window_bounds = array<i64: 160, 128>}, {transform_indices = @transform_1, window_bounds = array<i64: 128, 128>}, {transform_indices = @transform_2, window_bounds = array<i64: 1, 128>}, {transform_indices = @transform_3, window_bounds = array<i64: 160, 128>}]} {
    %c0_i32 = arith.constant 0 : i32
    %0 = arith.cmpi eq, %arg2, %c0_i32 : i32
    %1 = arith.extui %0 : i1 to i32
    %c0_i32_0 = arith.constant 0 : i32
    %2 = arith.cmpi ne, %1, %c0_i32_0 : i32
    scf.if %2 {
      %cst_10 = arith.constant 0.000000e+00 : f32
      %12 = vector.broadcast %cst_10 : f32 to vector<160x128xf32>
      %c0_11 = arith.constant 0 : index
      %c0_12 = arith.constant 0 : index
      %13 = vector.load %arg7[%c0_11, %c0_12] : memref<160x128xf32, #tpu.memory_space<vmem>>, vector<160x128xf32>
      tpu.vector_store %arg7[%c0_11, %c0_12], %12 {strides = array<i32>} : memref<160x128xf32, #tpu.memory_space<vmem>>, vector<160x128xf32>,
    } else {
    }
    %c0 = arith.constant 0 : index
    %c0_1 = arith.constant 0 : index
    %3 = vector.load %arg3[%c0, %c0_1] : memref<160x128xbf16, #tpu.memory_space<vmem>>, vector<160x128xbf16>
    %c0_2 = arith.constant 0 : index
    %c0_3 = arith.constant 0 : index
    %4 = vector.load %arg7[%c0_2, %c0_3] : memref<160x128xf32, #tpu.memory_space<vmem>>, vector<160x128xf32>
    %c0_4 = arith.constant 0 : index
    %c0_5 = arith.constant 0 : index
    %5 = vector.load %arg4[%c0_4, %c0_5] : memref<128x128xbf16, #tpu.memory_space<vmem>>, vector<128x128xbf16>
    %cst = arith.constant dense<0.000000e+00> : vector<160x128xf32>
    %6 = tpu.matmul %3, %5, %cst {dimension_numbers = #tpu.dot_dimension_numbers<[1], [0], [0], [1], [0, 0, 1, 1], [], []>} : vector<160x128xbf16>, vector<128x128xbf16>, vector<160x128xf32> -> vector<160x128xf32>
    %7 = arith.addf %4, %6 : vector<160x128xf32>
    %c0_6 = arith.constant 0 : index
    %c0_7 = arith.constant 0 : index
    %8 = vector.load %arg7[%c0_6, %c0_7] : memref<160x128xf32, #tpu.memory_space<vmem>>, vector<160x128xf32>
    tpu.vector_store %arg7[%c0_6, %c0_7], %7 {strides = array<i32>} : memref<160x128xf32, #tpu.memory_space<vmem>>, vector<160x128xf32>,
    %c0_i32_8 = arith.constant 0 : i32
    %9 = arith.cmpi eq, %arg2, %c0_i32_8 : i32
    %10 = arith.extui %9 : i1 to i32
    %c0_i32_9 = arith.constant 0 : i32
    %11 = arith.cmpi ne, %10, %c0_i32_9 : i32
    scf.if %11 {
      %c0_10 = arith.constant 0 : index
      %c0_11 = arith.constant 0 : index
      %12 = vector.load %arg7[%c0_10, %c0_11] : memref<160x128xf32, #tpu.memory_space<vmem>>, vector<160x128xf32>
      %c0_12 = arith.constant 0 : index
      %c0_13 = arith.constant 0 : index
      %13 = vector.load %arg5[%c0_12, %c0_13] : memref<1x128xf32, #tpu.memory_space<vmem>>, vector<1x128xf32>
      %14 = vector.broadcast %13 : vector<1x128xf32> to vector<160x128xf32>
      %15 = arith.addf %12, %14 : vector<160x128xf32>
      %cst_14 = arith.constant 0.000000e+00 : f32
      %16 = vector.broadcast %cst_14 : f32 to vector<160x128xf32>
      %17 = arith.maximumf %15, %16 : vector<160x128xf32>
      %18 = arith.truncf %17 : vector<160x128xf32> to vector<160x128xbf16>
      %c0_15 = arith.constant 0 : index
      %c0_16 = arith.constant 0 : index
      %19 = vector.load %arg6[%c0_15, %c0_16] : memref<160x128xbf16, #tpu.memory_space<vmem>>, vector<160x128xbf16>
      tpu.vector_store %arg6[%c0_15, %c0_16], %18 {strides = array<i32>} : memref<160x128xbf16, #tpu.memory_space<vmem>>, vector<160x128xbf16>,
    } else {
    }
    return
  }
  func.func @transform_0(%arg0: i32, %arg1: i32, %arg2: i32) -> (i32, i32) {
    %c0_i32 = arith.constant 0 : i32
    return %arg0, %arg2 : i32, i32
  }
  func.func @transform_1(%arg0: i32, %arg1: i32, %arg2: i32) -> (i32, i32) {
    %c0_i32 = arith.constant 0 : i32
    return %arg2, %arg1 : i32, i32
  }
  func.func @transform_2(%arg0: i32, %arg1: i32, %arg2: i32) -> (i32, i32) {
    %c0_i32 = arith.constant 0 : i32
    %c0_i32_0 = arith.constant 0 : i32
    return %c0_i32, %arg1 : i32, i32
  }
  func.func @transform_3(%arg0: i32, %arg1: i32, %arg2: i32) -> (i32, i32) {
    %c0_i32 = arith.constant 0 : i32
    return %arg0, %arg1 : i32, i32
  }
}

module attributes {stable_mosaic.version = 11 : i64} {
  func.func @_fused_mm_kernel(%arg0: i32, %arg1: i32, %arg2: i32, %arg3: memref<80x128xbf16, #tpu.memory_space<vmem>>, %arg4: memref<128x128xbf16, #tpu.memory_space<vmem>>, %arg5: memref<1x128xf32, #tpu.memory_space<vmem>>, %arg6: memref<80x128xbf16, #tpu.memory_space<vmem>>, %arg7: memref<80x128xf32, #tpu.memory_space<vmem>>) attributes {dimension_semantics = [#tpu.dimension_semantics<parallel>, #tpu.dimension_semantics<parallel>, #tpu.dimension_semantics<arbitrary>], iteration_bounds = array<i64: 1, 1, 1>, scalar_prefetch = 0 : i64, scratch_operands = 1 : i64, tpu.core_type = #tpu.core_type<tc>, window_params = [{transform_indices = @transform_0, window_bounds = array<i64: 80, 128>}, {transform_indices = @transform_1, window_bounds = array<i64: 128, 128>}, {transform_indices = @transform_2, window_bounds = array<i64: 1, 128>}, {transform_indices = @transform_3, window_bounds = array<i64: 80, 128>}]} {
    %c0_i32 = arith.constant 0 : i32
    %0 = arith.cmpi eq, %arg2, %c0_i32 : i32
    %1 = arith.extui %0 : i1 to i32
    %c0_i32_0 = arith.constant 0 : i32
    %2 = arith.cmpi ne, %1, %c0_i32_0 : i32
    scf.if %2 {
      %cst_10 = arith.constant 0.000000e+00 : f32
      %12 = vector.broadcast %cst_10 : f32 to vector<80x128xf32>
      %c0_11 = arith.constant 0 : index
      %c0_12 = arith.constant 0 : index
      %13 = vector.load %arg7[%c0_11, %c0_12] : memref<80x128xf32, #tpu.memory_space<vmem>>, vector<80x128xf32>
      tpu.vector_store %arg7[%c0_11, %c0_12], %12 {strides = array<i32>} : memref<80x128xf32, #tpu.memory_space<vmem>>, vector<80x128xf32>,
    } else {
    }
    %c0 = arith.constant 0 : index
    %c0_1 = arith.constant 0 : index
    %3 = vector.load %arg3[%c0, %c0_1] : memref<80x128xbf16, #tpu.memory_space<vmem>>, vector<80x128xbf16>
    %c0_2 = arith.constant 0 : index
    %c0_3 = arith.constant 0 : index
    %4 = vector.load %arg7[%c0_2, %c0_3] : memref<80x128xf32, #tpu.memory_space<vmem>>, vector<80x128xf32>
    %c0_4 = arith.constant 0 : index
    %c0_5 = arith.constant 0 : index
    %5 = vector.load %arg4[%c0_4, %c0_5] : memref<128x128xbf16, #tpu.memory_space<vmem>>, vector<128x128xbf16>
    %cst = arith.constant dense<0.000000e+00> : vector<80x128xf32>
    %6 = tpu.matmul %3, %5, %cst {dimension_numbers = #tpu.dot_dimension_numbers<[1], [0], [0], [1], [0, 0, 1, 1], [], []>} : vector<80x128xbf16>, vector<128x128xbf16>, vector<80x128xf32> -> vector<80x128xf32>
    %7 = arith.addf %4, %6 : vector<80x128xf32>
    %c0_6 = arith.constant 0 : index
    %c0_7 = arith.constant 0 : index
    %8 = vector.load %arg7[%c0_6, %c0_7] : memref<80x128xf32, #tpu.memory_space<vmem>>, vector<80x128xf32>
    tpu.vector_store %arg7[%c0_6, %c0_7], %7 {strides = array<i32>} : memref<80x128xf32, #tpu.memory_space<vmem>>, vector<80x128xf32>,
    %c0_i32_8 = arith.constant 0 : i32
    %9 = arith.cmpi eq, %arg2, %c0_i32_8 : i32
    %10 = arith.extui %9 : i1 to i32
    %c0_i32_9 = arith.constant 0 : i32
    %11 = arith.cmpi ne, %10, %c0_i32_9 : i32
    scf.if %11 {
      %c0_10 = arith.constant 0 : index
      %c0_11 = arith.constant 0 : index
      %12 = vector.load %arg7[%c0_10, %c0_11] : memref<80x128xf32, #tpu.memory_space<vmem>>, vector<80x128xf32>
      %c0_12 = arith.constant 0 : index
      %c0_13 = arith.constant 0 : index
      %13 = vector.load %arg5[%c0_12, %c0_13] : memref<1x128xf32, #tpu.memory_space<vmem>>, vector<1x128xf32>
      %14 = vector.broadcast %13 : vector<1x128xf32> to vector<80x128xf32>
      %15 = arith.addf %12, %14 : vector<80x128xf32>
      %16 = arith.truncf %15 : vector<80x128xf32> to vector<80x128xbf16>
      %c0_14 = arith.constant 0 : index
      %c0_15 = arith.constant 0 : index
      %17 = vector.load %arg6[%c0_14, %c0_15] : memref<80x128xbf16, #tpu.memory_space<vmem>>, vector<80x128xbf16>
      tpu.vector_store %arg6[%c0_14, %c0_15], %16 {strides = array<i32>} : memref<80x128xbf16, #tpu.memory_space<vmem>>, vector<80x128xbf16>,
    } else {
    }
    return
  }
  func.func @transform_0(%arg0: i32, %arg1: i32, %arg2: i32) -> (i32, i32) {
    %c0_i32 = arith.constant 0 : i32
    return %arg0, %arg2 : i32, i32
  }
  func.func @transform_1(%arg0: i32, %arg1: i32, %arg2: i32) -> (i32, i32) {
    %c0_i32 = arith.constant 0 : i32
    return %arg2, %arg1 : i32, i32
  }
  func.func @transform_2(%arg0: i32, %arg1: i32, %arg2: i32) -> (i32, i32) {
    %c0_i32 = arith.constant 0 : i32
    %c0_i32_0 = arith.constant 0 : i32
    return %c0_i32, %arg1 : i32, i32
  }
  func.func @transform_3(%arg0: i32, %arg1: i32, %arg2: i32) -> (i32, i32) {
    %c0_i32 = arith.constant 0 : i32
    return %arg0, %arg1 : i32, i32
  }
}

module attributes {stable_mosaic.version = 11 : i64} {
  func.func @_fused_mm_kernel(%arg0: i32, %arg1: i32, %arg2: i32, %arg3: memref<80x128xbf16, #tpu.memory_space<vmem>>, %arg4: memref<128x128xbf16, #tpu.memory_space<vmem>>, %arg5: memref<1x128xf32, #tpu.memory_space<vmem>>, %arg6: memref<80x128xbf16, #tpu.memory_space<vmem>>, %arg7: memref<80x128xbf16, #tpu.memory_space<vmem>>, %arg8: memref<80x128xf32, #tpu.memory_space<vmem>>) attributes {dimension_semantics = [#tpu.dimension_semantics<parallel>, #tpu.dimension_semantics<parallel>, #tpu.dimension_semantics<arbitrary>], iteration_bounds = array<i64: 1, 1, 1>, scalar_prefetch = 0 : i64, scratch_operands = 1 : i64, tpu.core_type = #tpu.core_type<tc>, window_params = [{transform_indices = @transform_0, window_bounds = array<i64: 80, 128>}, {transform_indices = @transform_1, window_bounds = array<i64: 128, 128>}, {transform_indices = @transform_2, window_bounds = array<i64: 1, 128>}, {transform_indices = @transform_3, window_bounds = array<i64: 80, 128>}, {transform_indices = @transform_4, window_bounds = array<i64: 80, 128>}]} {
    %c0_i32 = arith.constant 0 : i32
    %0 = arith.cmpi eq, %arg2, %c0_i32 : i32
    %1 = arith.extui %0 : i1 to i32
    %c0_i32_0 = arith.constant 0 : i32
    %2 = arith.cmpi ne, %1, %c0_i32_0 : i32
    scf.if %2 {
      %cst_10 = arith.constant 0.000000e+00 : f32
      %12 = vector.broadcast %cst_10 : f32 to vector<80x128xf32>
      %c0_11 = arith.constant 0 : index
      %c0_12 = arith.constant 0 : index
      %13 = vector.load %arg8[%c0_11, %c0_12] : memref<80x128xf32, #tpu.memory_space<vmem>>, vector<80x128xf32>
      tpu.vector_store %arg8[%c0_11, %c0_12], %12 {strides = array<i32>} : memref<80x128xf32, #tpu.memory_space<vmem>>, vector<80x128xf32>,
    } else {
    }
    %c0 = arith.constant 0 : index
    %c0_1 = arith.constant 0 : index
    %3 = vector.load %arg3[%c0, %c0_1] : memref<80x128xbf16, #tpu.memory_space<vmem>>, vector<80x128xbf16>
    %c0_2 = arith.constant 0 : index
    %c0_3 = arith.constant 0 : index
    %4 = vector.load %arg8[%c0_2, %c0_3] : memref<80x128xf32, #tpu.memory_space<vmem>>, vector<80x128xf32>
    %c0_4 = arith.constant 0 : index
    %c0_5 = arith.constant 0 : index
    %5 = vector.load %arg4[%c0_4, %c0_5] : memref<128x128xbf16, #tpu.memory_space<vmem>>, vector<128x128xbf16>
    %cst = arith.constant dense<0.000000e+00> : vector<80x128xf32>
    %6 = tpu.matmul %3, %5, %cst {dimension_numbers = #tpu.dot_dimension_numbers<[1], [0], [0], [1], [0, 0, 1, 1], [], []>} : vector<80x128xbf16>, vector<128x128xbf16>, vector<80x128xf32> -> vector<80x128xf32>
    %7 = arith.addf %4, %6 : vector<80x128xf32>
    %c0_6 = arith.constant 0 : index
    %c0_7 = arith.constant 0 : index
    %8 = vector.load %arg8[%c0_6, %c0_7] : memref<80x128xf32, #tpu.memory_space<vmem>>, vector<80x128xf32>
    tpu.vector_store %arg8[%c0_6, %c0_7], %7 {strides = array<i32>} : memref<80x128xf32, #tpu.memory_space<vmem>>, vector<80x128xf32>,
    %c0_i32_8 = arith.constant 0 : i32
    %9 = arith.cmpi eq, %arg2, %c0_i32_8 : i32
    %10 = arith.extui %9 : i1 to i32
    %c0_i32_9 = arith.constant 0 : i32
    %11 = arith.cmpi ne, %10, %c0_i32_9 : i32
    scf.if %11 {
      %c0_10 = arith.constant 0 : index
      %c0_11 = arith.constant 0 : index
      %12 = vector.load %arg8[%c0_10, %c0_11] : memref<80x128xf32, #tpu.memory_space<vmem>>, vector<80x128xf32>
      %c0_12 = arith.constant 0 : index
      %c0_13 = arith.constant 0 : index
      %13 = vector.load %arg5[%c0_12, %c0_13] : memref<1x128xf32, #tpu.memory_space<vmem>>, vector<1x128xf32>
      %14 = vector.broadcast %13 : vector<1x128xf32> to vector<80x128xf32>
      %15 = arith.addf %12, %14 : vector<80x128xf32>
      %c0_14 = arith.constant 0 : index
      %c0_15 = arith.constant 0 : index
      %16 = vector.load %arg6[%c0_14, %c0_15] : memref<80x128xbf16, #tpu.memory_space<vmem>>, vector<80x128xbf16>
      %17 = arith.extf %16 : vector<80x128xbf16> to vector<80x128xf32>
      %18 = arith.addf %15, %17 : vector<80x128xf32>
      %cst_16 = arith.constant 0.000000e+00 : f32
      %19 = vector.broadcast %cst_16 : f32 to vector<80x128xf32>
      %20 = arith.maximumf %18, %19 : vector<80x128xf32>
      %21 = arith.truncf %20 : vector<80x128xf32> to vector<80x128xbf16>
      %c0_17 = arith.constant 0 : index
      %c0_18 = arith.constant 0 : index
      %22 = vector.load %arg7[%c0_17, %c0_18] : memref<80x128xbf16, #tpu.memory_space<vmem>>, vector<80x128xbf16>
      tpu.vector_store %arg7[%c0_17, %c0_18], %21 {strides = array<i32>} : memref<80x128xbf16, #tpu.memory_space<vmem>>, vector<80x128xbf16>,
    } else {
    }
    return
  }
  func.func @transform_0(%arg0: i32, %arg1: i32, %arg2: i32) -> (i32, i32) {
    %c0_i32 = arith.constant 0 : i32
    return %arg0, %arg2 : i32, i32
  }
  func.func @transform_1(%arg0: i32, %arg1: i32, %arg2: i32) -> (i32, i32) {
    %c0_i32 = arith.constant 0 : i32
    return %arg2, %arg1 : i32, i32
  }
  func.func @transform_2(%arg0: i32, %arg1: i32, %arg2: i32) -> (i32, i32) {
    %c0_i32 = arith.constant 0 : i32
    %c0_i32_0 = arith.constant 0 : i32
    return %c0_i32, %arg1 : i32, i32
  }
  func.func @transform_3(%arg0: i32, %arg1: i32, %arg2: i32) -> (i32, i32) {
    %c0_i32 = arith.constant 0 : i32
    return %arg0, %arg1 : i32, i32
  }
  func.func @transform_4(%arg0: i32, %arg1: i32, %arg2: i32) -> (i32, i32) {
    %c0_i32 = arith.constant 0 : i32
    return %arg0, %arg1 : i32, i32
  }
}

module attributes {stable_mosaic.version = 11 : i64} {
  func.func @_fused_mm_kernel(%arg0: i32, %arg1: i32, %arg2: i32, %arg3: memref<8x128xbf16, #tpu.memory_space<vmem>>, %arg4: memref<128x128xbf16, #tpu.memory_space<vmem>>, %arg5: memref<1x128xf32, #tpu.memory_space<vmem>>, %arg6: memref<8x128xf32, #tpu.memory_space<vmem>>, %arg7: memref<8x128xf32, #tpu.memory_space<vmem>>) attributes {dimension_semantics = [#tpu.dimension_semantics<parallel>, #tpu.dimension_semantics<parallel>, #tpu.dimension_semantics<arbitrary>], iteration_bounds = array<i64: 1, 1, 1>, scalar_prefetch = 0 : i64, scratch_operands = 1 : i64, tpu.core_type = #tpu.core_type<tc>, window_params = [{transform_indices = @transform_0, window_bounds = array<i64: 8, 128>}, {transform_indices = @transform_1, window_bounds = array<i64: 128, 128>}, {transform_indices = @transform_2, window_bounds = array<i64: 1, 128>}, {transform_indices = @transform_3, window_bounds = array<i64: 8, 128>}]} {
    %c0_i32 = arith.constant 0 : i32
    %0 = arith.cmpi eq, %arg2, %c0_i32 : i32
    %1 = arith.extui %0 : i1 to i32
    %c0_i32_0 = arith.constant 0 : i32
    %2 = arith.cmpi ne, %1, %c0_i32_0 : i32
    scf.if %2 {
      %cst_10 = arith.constant 0.000000e+00 : f32
      %12 = vector.broadcast %cst_10 : f32 to vector<8x128xf32>
      %c0_11 = arith.constant 0 : index
      %c0_12 = arith.constant 0 : index
      %13 = vector.load %arg7[%c0_11, %c0_12] : memref<8x128xf32, #tpu.memory_space<vmem>>, vector<8x128xf32>
      tpu.vector_store %arg7[%c0_11, %c0_12], %12 {strides = array<i32>} : memref<8x128xf32, #tpu.memory_space<vmem>>, vector<8x128xf32>,
    } else {
    }
    %c0 = arith.constant 0 : index
    %c0_1 = arith.constant 0 : index
    %3 = vector.load %arg3[%c0, %c0_1] : memref<8x128xbf16, #tpu.memory_space<vmem>>, vector<8x128xbf16>
    %c0_2 = arith.constant 0 : index
    %c0_3 = arith.constant 0 : index
    %4 = vector.load %arg7[%c0_2, %c0_3] : memref<8x128xf32, #tpu.memory_space<vmem>>, vector<8x128xf32>
    %c0_4 = arith.constant 0 : index
    %c0_5 = arith.constant 0 : index
    %5 = vector.load %arg4[%c0_4, %c0_5] : memref<128x128xbf16, #tpu.memory_space<vmem>>, vector<128x128xbf16>
    %cst = arith.constant dense<0.000000e+00> : vector<8x128xf32>
    %6 = tpu.matmul %3, %5, %cst {dimension_numbers = #tpu.dot_dimension_numbers<[1], [0], [0], [1], [0, 0, 1, 1], [], []>} : vector<8x128xbf16>, vector<128x128xbf16>, vector<8x128xf32> -> vector<8x128xf32>
    %7 = arith.addf %4, %6 : vector<8x128xf32>
    %c0_6 = arith.constant 0 : index
    %c0_7 = arith.constant 0 : index
    %8 = vector.load %arg7[%c0_6, %c0_7] : memref<8x128xf32, #tpu.memory_space<vmem>>, vector<8x128xf32>
    tpu.vector_store %arg7[%c0_6, %c0_7], %7 {strides = array<i32>} : memref<8x128xf32, #tpu.memory_space<vmem>>, vector<8x128xf32>,
    %c0_i32_8 = arith.constant 0 : i32
    %9 = arith.cmpi eq, %arg2, %c0_i32_8 : i32
    %10 = arith.extui %9 : i1 to i32
    %c0_i32_9 = arith.constant 0 : i32
    %11 = arith.cmpi ne, %10, %c0_i32_9 : i32
    scf.if %11 {
      %c0_10 = arith.constant 0 : index
      %c0_11 = arith.constant 0 : index
      %12 = vector.load %arg7[%c0_10, %c0_11] : memref<8x128xf32, #tpu.memory_space<vmem>>, vector<8x128xf32>
      %c0_12 = arith.constant 0 : index
      %c0_13 = arith.constant 0 : index
      %13 = vector.load %arg5[%c0_12, %c0_13] : memref<1x128xf32, #tpu.memory_space<vmem>>, vector<1x128xf32>
      %14 = vector.broadcast %13 : vector<1x128xf32> to vector<8x128xf32>
      %15 = arith.addf %12, %14 : vector<8x128xf32>
      %c0_14 = arith.constant 0 : index
      %c0_15 = arith.constant 0 : index
      %16 = vector.load %arg6[%c0_14, %c0_15] : memref<8x128xf32, #tpu.memory_space<vmem>>, vector<8x128xf32>
      tpu.vector_store %arg6[%c0_14, %c0_15], %15 {strides = array<i32>} : memref<8x128xf32, #tpu.memory_space<vmem>>, vector<8x128xf32>,
    } else {
    }
    return
  }
  func.func @transform_0(%arg0: i32, %arg1: i32, %arg2: i32) -> (i32, i32) {
    %c0_i32 = arith.constant 0 : i32
    return %arg0, %arg2 : i32, i32
  }
  func.func @transform_1(%arg0: i32, %arg1: i32, %arg2: i32) -> (i32, i32) {
    %c0_i32 = arith.constant 0 : i32
    return %arg2, %arg1 : i32, i32
  }
  func.func @transform_2(%arg0: i32, %arg1: i32, %arg2: i32) -> (i32, i32) {
    %c0_i32 = arith.constant 0 : i32
    %c0_i32_0 = arith.constant 0 : i32
    return %c0_i32, %arg1 : i32, i32
  }
  func.func @transform_3(%arg0: i32, %arg1: i32, %arg2: i32) -> (i32, i32) {
    %c0_i32 = arith.constant 0 : i32
    return %arg0, %arg1 : i32, i32
  }
}

</mosaic_0001>

<bundles_post_ra>
// kernel: _lambda_.20
= control target key start
LH: loop header
LB: loop body
LE: loop exit
PB: predicated region body
PF: predicated region fallthrough
CT: control target
= control target key end

     0   :  { %s339_s1 = inlined_call_operand.vmem [shape: bf16[128,128], index: 1, kind: input, shape index: {}]   ;;  %s340_s0 = inlined_call_operand.vmem [shape: bf16[32,128], index: 0, kind: input, shape index: {}]   ;;  %s341_s2 = inlined_call_operand.vmem [shape: f32[1,128], index: 2, kind: input, shape index: {}]   ;;  %s342_s3 = inlined_call_operand.vmem [shape: bf16[32,128], index: 3, kind: output, shape index: {}]  }
   0x1   :  { %v270_v0 = vld [vmem:[%s339_s1 + $0x38] sm:$0xff]   ;;  %v271_v1 = vld [vmem:[%s339_s1 + $0x30] sm:$0xff]   ;;  %v272_v2 = vld [vmem:[%s339_s1 + $0x28] sm:$0xff]  }
   0x2   :  { %250 = vmatprep.subr.bf16.mxu0 %v270_v0  ;;  %v273_v3 = vld [vmem:[%s339_s1 + $0x20] sm:$0xff]   ;;  %v274_v5 = vld [vmem:[%s339_s1 + $0x18] sm:$0xff]   ;;  %v275_v6 = vld [vmem:[%s339_s1 + $0x10] sm:$0xff]  }
   0x3   :  { %251 = vmatpush3.bf16.msra.mxu0 %v270_v0  ;;  %v278_v4 = vld [vmem:[%s340_s0] sm:$0xff]   ;;  %v276_v7 = vld [vmem:[%s339_s1 + $0x8] sm:$0xff]  }
   0x4   :  { %252 = vmatprep.subr.bf16.mxu0 %v271_v1  ;;  %266 = vmatprep.mubr.bf16.mxu0 %v278_v4  ;;  %v277_v8 = vld [vmem:[%s339_s1] sm:$0xff]   ;;  %v279_v9 = vld [vmem:[%s340_s0 + $0x8] sm:$0xff]  }
   0x5   :  { %v220_v11 = vld [vmem:[%s341_s2] ss:$0 sm:$0xff] }
   0x7   :  { %253 = vmatpush3.bf16.msra.mxu0 %v271_v1 }
   0x8   :  { %254 = vmatprep.subr.bf16.mxu0 %v272_v2 }
   0xb   :  { %255 = vmatpush3.bf16.msra.mxu0 %v272_v2 }
   0xc   :  { %256 = vmatprep.subr.bf16.mxu0 %v273_v3 }
   0xf   :  { %257 = vmatpush3.bf16.msra.mxu0 %v273_v3 }
  0x10   :  { %258 = vmatprep.subr.bf16.mxu0 %v274_v5 }
  0x13   :  { %259 = vmatpush3.bf16.msra.mxu0 %v274_v5 }
  0x14   :  { %260 = vmatprep.subr.bf16.mxu0 %v275_v6 }
  0x17   :  { %261 = vmatpush3.bf16.msra.mxu0 %v275_v6 }
  0x18   :  { %262 = vmatprep.subr.bf16.mxu0 %v276_v7 }
  0x1b   :  { %263 = vmatpush3.bf16.msra.mxu0 %v276_v7 }
  0x1c   :  { %264 = vmatprep.subr.bf16.mxu0 %v277_v8 }
  0x1f   :  { %265 = vmatpush3.bf16.msra.mxu0 %v277_v8 }
  0x22   :  { %267 = vmatmul.mubr.bf16.vlgmr.msra.gmra.mxu0 %v279_v9 }
  0xe2   :  { %v268_v10 = vpop.f32.mrf.mxu0 }
  0xe3   :  { %v180_v13 = vadd.f32 %v268_v10, %v220_v11 }
  0xe4   :  { %v141_v12 = vpop.f32.mrf.mxu0 }
  0xe5   :  { %v178_v15 = vadd.f32 %v220_v11, %v141_v12  ;;  %v184_v18 = vmax.f32 %v180_v13, 0.0 }
  0xe6   :  { %v269_v14 = vpop.f32.mrf.mxu0 }
  0xe7   :  { %v181_v16 = vadd.f32 %v269_v14, %v220_v11  ;;  %v182_v21 = vmax.f32 %v178_v15, 0.0 }
  0xe8   :  { %v144_v17 = vpop.f32.mrf.mxu0 }
  0xe9   :  { %v185_v19 = vmax.f32 %v181_v16, 0.0  ;;  %v179_v20 = vadd.f32 %v220_v11, %v144_v17 }
  0xeb   :  { %v237_v22 = vpack.c.bf16 %v185_v19, %v184_v18  ;;  %v183_v23 = vmax.f32 %v179_v20, 0.0 }
  0xed   :  { %239 = vst [vmem:[%s342_s3 + $0x8] sm:$0xff] %v237_v22   ;;  %v232_v24 = vpack.c.bf16 %v183_v23, %v182_v21 }
  0xef   :  { %233 = vst [vmem:[%s342_s3] sm:$0xff] %v232_v24  }

// kernel: _lambda_.21
= control target key start
LH: loop header
LB: loop body
LE: loop exit
PB: predicated region body
PF: predicated region fallthrough
CT: control target
= control target key end

     0   :  { %s823_s1 = inlined_call_operand.vmem [shape: bf16[128,128], index: 1, kind: input, shape index: {}]   ;;  %s824_s0 = inlined_call_operand.vmem [shape: bf16[160,128], index: 0, kind: input, shape index: {}]   ;;  %s825_s2 = inlined_call_operand.vmem [shape: f32[1,128], index: 2, kind: input, shape index: {}]   ;;  %s826_s3 = inlined_call_operand.vmem [shape: bf16[160,128], index: 3, kind: output, shape index: {}]  }
   0x1   :  { %v698_v0 = vld [vmem:[%s823_s1 + $0x38] sm:$0xff]   ;;  %v699_v1 = vld [vmem:[%s823_s1 + $0x30] sm:$0xff]   ;;  %v700_v2 = vld [vmem:[%s823_s1 + $0x28] sm:$0xff]  }
   0x2   :  { %646 = vmatprep.subr.bf16.mxu0 %v698_v0  ;;  %682 = vmatprep.subr.bf16.mxu1 %v698_v0  ;;  %v701_v3 = vld [vmem:[%s823_s1 + $0x20] sm:$0xff]   ;;  %v708_v5 = vld [vmem:[%s824_s0 + $0x30] sm:$0xff]   ;;  %v702_v6 = vld [vmem:[%s823_s1 + $0x18] sm:$0xff]  }
   0x3   :  { %647 = vmatpush3.bf16.msra.mxu0 %v698_v0  ;;  %690 = vmatpush3.bf16.msra.mxu1 %v698_v0  ;;  %v706_v4 = vld [vmem:[%s824_s0] sm:$0xff]   ;;  %v703_v7 = vld [vmem:[%s823_s1 + $0x10] sm:$0xff]   ;;  %v704_v8 = vld [vmem:[%s823_s1 + $0x8] sm:$0xff]  }
   0x4   :  { %648 = vmatprep.subr.bf16.mxu0 %v699_v1  ;;  %683 = vmatprep.subr.bf16.mxu1 %v699_v1  ;;  %v705_v9 = vld [vmem:[%s823_s1] sm:$0xff]   ;;  %v707_v10 = vld [vmem:[%s824_s0 + $0x8] sm:$0xff]   ;;  %v709_v11 = vld [vmem:[%s824_s0 + $0x38] sm:$0xff]  }
   0x5   :  { %662 = vmatprep.mubr.bf16.mxu0 %v706_v4  ;;  %674 = vmatprep.mubr.bf16.mxu1 %v708_v5  ;;  %v710_v12 = vld [vmem:[%s824_s0 + $0x10] sm:$0xff]   ;;  %v712_v13 = vld [vmem:[%s824_s0 + $0x40] sm:$0xff]   ;;  %v711_v14 = vld [vmem:[%s824_s0 + $0x18] sm:$0xff]  }
   0x6   :  { %v713_v15 = vld [vmem:[%s824_s0 + $0x48] sm:$0xff]   ;;  %v714_v16 = vld [vmem:[%s824_s0 + $0x20] sm:$0xff]  }
   0x7   :  { %649 = vmatpush3.bf16.msra.mxu0 %v699_v1  ;;  %691 = vmatpush3.bf16.msra.mxu1 %v699_v1  ;;  %v715_v17 = vld [vmem:[%s824_s0 + $0x28] sm:$0xff]   ;;  %v528_v20 = vld [vmem:[%s825_s2] ss:$0 sm:$0xff] }
   0x8   :  { %650 = vmatprep.subr.bf16.mxu0 %v700_v2  ;;  %684 = vmatprep.subr.bf16.mxu1 %v700_v2 }
   0xb   :  { %651 = vmatpush3.bf16.msra.mxu0 %v700_v2  ;;  %692 = vmatpush3.bf16.msra.mxu1 %v700_v2 }
   0xc   :  { %652 = vmatprep.subr.bf16.mxu0 %v701_v3  ;;  %685 = vmatprep.subr.bf16.mxu1 %v701_v3 }
   0xf   :  { %653 = vmatpush3.bf16.msra.mxu0 %v701_v3  ;;  %693 = vmatpush3.bf16.msra.mxu1 %v701_v3 }
  0x10   :  { %654 = vmatprep.subr.bf16.mxu0 %v702_v6  ;;  %686 = vmatprep.subr.bf16.mxu1 %v702_v6 }
  0x13   :  { %655 = vmatpush3.bf16.msra.mxu0 %v702_v6  ;;  %694 = vmatpush3.bf16.msra.mxu1 %v702_v6 }
  0x14   :  { %656 = vmatprep.subr.bf16.mxu0 %v703_v7  ;;  %687 = vmatprep.subr.bf16.mxu1 %v703_v7 }
  0x17   :  { %657 = vmatpush3.bf16.msra.mxu0 %v703_v7  ;;  %695 = vmatpush3.bf16.msra.mxu1 %v703_v7 }
  0x18   :  { %658 = vmatprep.subr.bf16.mxu0 %v704_v8  ;;  %688 = vmatprep.subr.bf16.mxu1 %v704_v8 }
  0x1b   :  { %659 = vmatpush3.bf16.msra.mxu0 %v704_v8  ;;  %696 = vmatpush3.bf16.msra.mxu1 %v704_v8 }
  0x1c   :  { %660 = vmatprep.subr.bf16.mxu0 %v705_v9  ;;  %689 = vmatprep.subr.bf16.mxu1 %v705_v9 }
  0x1f   :  { %661 = vmatpush3.bf16.msra.mxu0 %v705_v9  ;;  %697 = vmatpush3.bf16.msra.mxu1 %v705_v9 }
  0x22   :  { %663 = vmatmul.mubr.bf16.vlgmr.msra.gmra.mxu0 %v707_v10  ;;  %675 = vmatmul.mubr.bf16.vlgmr.msra.gmra.mxu1 %v709_v11 }
  0x23   :  { %666 = vmatprep.mubr.bf16.mxu0 %v710_v12  ;;  %678 = vmatprep.mubr.bf16.mxu1 %v712_v13 }
  0x2a   :  { %667 = vmatmul.mubr.bf16.gmra.mxu0 %v711_v14  ;;  %679 = vmatmul.mubr.bf16.gmra.mxu1 %v713_v15 }
  0x2b   :  { %670 = vmatprep.mubr.bf16.mxu0 %v714_v16 }
  0x32   :  { %671 = vmatmul.mubr.bf16.gmra.mxu0 %v715_v17 }
  0xe2   :  { %v664_v18 = vpop.f32.mrf.mxu0  ;;  %v676_v19 = vpop.f32.mrf.mxu1 }
  0xe3   :  { %v400_v23 = vadd.f32 %v676_v19, %v528_v20  ;;  %v388_v26 = vadd.f32 %v664_v18, %v528_v20 }
  0xe4   :  { %v237_v21 = vpop.f32.mrf.mxu0  ;;  %v285_v22 = vpop.f32.mrf.mxu1 }
  0xe5   :  { %v398_v28 = vadd.f32 %v528_v20, %v285_v22  ;;  %v386_v30 = vadd.f32 %v528_v20, %v237_v21 }
  0xe6   :  { %v665_v24 = vpop.f32.mrf.mxu0  ;;  %v677_v25 = vpop.f32.mrf.mxu1 }
  0xe7   :  { %v389_v27 = vadd.f32 %v665_v24, %v528_v20  ;;  %v401_v29 = vadd.f32 %v677_v25, %v528_v20 }
  0xe8   :  { %v240_v31 = vpop.f32.mrf.mxu0  ;;  %v288_v32 = vpop.f32.mrf.mxu1 }
  0xe9   :  { %v577_v33 = vpack.c.bf16 %v389_v27, %v388_v26  ;;  %v387_v34 = vadd.f32 %v528_v20, %v240_v31  ;;  %v607_v35 = vpack.c.bf16 %v401_v29, %v400_v23  ;;  %v399_v36 = vadd.f32 %v528_v20, %v288_v32 }
  0xea   :  { %v668_v37 = vpop.f32.mrf.mxu0  ;;  %v680_v38 = vpop.f32.mrf.mxu1 }
  0xeb   :  { %619 = vst [vmem:[%s826_s3 + $0x8] sm:$0xff] %v577_v33   ;;  %v572_v39 = vpack.c.bf16 %v387_v34, %v386_v30  ;;  %625 = vst [vmem:[%s826_s3 + $0x38] sm:$0xff] %v607_v35   ;;  %v602_v40 = vpack.c.bf16 %v399_v36, %v398_v28  ;;  %v404_v43 = vadd.f32 %v680_v38, %v528_v20 }
  0xec   :  { %v253_v41 = vpop.f32.mrf.mxu0  ;;  %v301_v42 = vpop.f32.mrf.mxu1  ;;  %v392_v46 = vadd.f32 %v668_v37, %v528_v20 }
  0xed   :  { %573 = vst [vmem:[%s826_s3] sm:$0xff] %v572_v39   ;;  %624 = vst [vmem:[%s826_s3 + $0x30] sm:$0xff] %v602_v40   ;;  %v402_v48 = vadd.f32 %v528_v20, %v301_v42  ;;  %v390_v50 = vadd.f32 %v528_v20, %v253_v41 }
  0xee   :  { %v669_v44 = vpop.f32.mrf.mxu0  ;;  %v681_v45 = vpop.f32.mrf.mxu1 }
  0xef   :  { %v393_v47 = vadd.f32 %v669_v44, %v528_v20  ;;  %v405_v49 = vadd.f32 %v681_v45, %v528_v20 }
  0xf0   :  { %v256_v51 = vpop.f32.mrf.mxu0  ;;  %v304_v52 = vpop.f32.mrf.mxu1 }
  0xf1   :  { %v587_v53 = vpack.c.bf16 %v393_v47, %v392_v46  ;;  %v391_v54 = vadd.f32 %v528_v20, %v256_v51  ;;  %v617_v55 = vpack.c.bf16 %v405_v49, %v404_v43  ;;  %v403_v56 = vadd.f32 %v528_v20, %v304_v52 }
  0xf2   :  { %v672_v57 = vpop.f32.mrf.mxu0 }
  0xf3   :  { %621 = vst [vmem:[%s826_s3 + $0x18] sm:$0xff] %v587_v53   ;;  %v582_v58 = vpack.c.bf16 %v391_v54, %v390_v50  ;;  %627 = vst [vmem:[%s826_s3 + $0x48] sm:$0xff] %v617_v55   ;;  %v612_v59 = vpack.c.bf16 %v403_v56, %v402_v48  ;;  %v396_v62 = vadd.f32 %v672_v57, %v528_v20 }
  0xf4   :  { %v269_v60 = vpop.f32.mrf.mxu0 }
  0xf5   :  { %620 = vst [vmem:[%s826_s3 + $0x10] sm:$0xff] %v582_v58   ;;  %626 = vst [vmem:[%s826_s3 + $0x40] sm:$0xff] %v612_v59   ;;  %v394_v1 = vadd.f32 %v528_v20, %v269_v60 }
  0xf6   :  { %v673_v61 = vpop.f32.mrf.mxu0 }
  0xf7   :  { %v397_v63 = vadd.f32 %v673_v61, %v528_v20 }
  0xf8   :  { %v272_v0 = vpop.f32.mrf.mxu0 }
  0xf9   :  { %v597_v2 = vpack.c.bf16 %v397_v63, %v396_v62  ;;  %v395_v3 = vadd.f32 %v528_v20, %v272_v0 }
  0xfb   :  { %623 = vst [vmem:[%s826_s3 + $0x28] sm:$0xff] %v597_v2   ;;  %v592_v4 = vpack.c.bf16 %v395_v3, %v394_v1 }
  0xfd   :  { %622 = vst [vmem:[%s826_s3 + $0x20] sm:$0xff] %v592_v4  }

// kernel: _lambda_.22
= control target key start
LH: loop header
LB: loop body
LE: loop exit
PB: predicated region body
PF: predicated region fallthrough
CT: control target
= control target key end

     0   :  { %s1610_s0 = inlined_call_operand.vmem [shape: bf16[160,128], index: 0, kind: input, shape index: {}]   ;;  %s1611_s1 = inlined_call_operand.vmem [shape: bf16[128,128], index: 1, kind: input, shape index: {}]   ;;  %s1612_s2 = inlined_call_operand.vmem [shape: f32[1,128], index: 2, kind: input, shape index: {}]   ;;  %s1613_s3 = inlined_call_operand.vmem [shape: bf16[160,128], index: 3, kind: output, shape index: {}]  }
   0x1   :  { %v1153_v0 = vld [vmem:[%s1610_s0 + $0x8] sm:$0xff]   ;;  %v1014_v1 = vld [vmem:[%s1610_s0] sm:$0xff]   ;;  %v1154_v10 = vld [vmem:[%s1610_s0 + $0x10] sm:$0xff]  }
   0x2   :  { %v1334_v2 = vunpack.c.l.bf16 %v1153_v0  ;;  %v1336_v3 = vunpack.c.l.bf16 %v1014_v1  ;;  %v1340_v4 = vunpack.c.h.bf16 %v1153_v0  ;;  %v1342_v5 = vunpack.c.h.bf16 %v1014_v1  ;;  %v1158_v13 = vld [vmem:[%s1610_s0 + $0x30] sm:$0xff]   ;;  %v1155_v16 = vld [vmem:[%s1610_s0 + $0x18] sm:$0xff]   ;;  %v1252_v26 = vld [vmem:[%s1611_s1 + $0x28] sm:$0xff]  }
   0x3   :  { %v1357_v11 = vunpack.c.h.bf16 %v1154_v10  ;;  %v1359_v12 = vunpack.c.l.bf16 %v1154_v10  ;;  %v1366_v14 = vunpack.c.h.bf16 %v1158_v13  ;;  %v1368_v15 = vunpack.c.l.bf16 %v1158_v13  ;;  %v1159_v19 = vld [vmem:[%s1610_s0 + $0x38] sm:$0xff]   ;;  %v1251_v23 = vld [vmem:[%s1611_s1 + $0x30] sm:$0xff]   ;;  %v1253_v29 = vld [vmem:[%s1611_s1 + $0x20] sm:$0xff]  }
   0x4   :  { %87 = vadd.xlane.f32.xlu1 %v1334_v2  ;;  %83 = vadd.xlane.f32.xlu0 %v1336_v3  ;;  %v124_v6 = vmul.f32 %v1342_v5, %v1342_v5  ;;  %v123_v7 = vmul.f32 %v1336_v3, %v1336_v3  ;;  %v126_v8 = vmul.f32 %v1340_v4, %v1340_v4  ;;  %v1375_v17 = vunpack.c.h.bf16 %v1155_v16  ;;  %v1250_v20 = vld [vmem:[%s1611_s1 + $0x38] sm:$0xff]   ;;  %v1156_v35 = vld [vmem:[%s1610_s0 + $0x20] sm:$0xff]   ;;  %v1255_v36 = vld [vmem:[%s1611_s1 + $0x10] sm:$0xff]  }
   0x5   :  { %v125_v9 = vmul.f32 %v1334_v2, %v1334_v2  ;;  %v1377_v18 = vunpack.c.l.bf16 %v1155_v16  ;;  %v1387_v21 = vunpack.c.h.bf16 %v1159_v19  ;;  %v1389_v22 = vunpack.c.l.bf16 %v1159_v19  ;;  %1198 = vmatprep.subr.bf16.mxu0 %v1250_v20  ;;  %1234 = vmatprep.subr.bf16.mxu1 %v1250_v20  ;;  %v1254_v32 = vld [vmem:[%s1611_s1 + $0x18] sm:$0xff]   ;;  %v1160_v39 = vld [vmem:[%s1610_s0 + $0x40] sm:$0xff]   ;;  %v1256_v40 = vld [vmem:[%s1611_s1 + $0x8] sm:$0xff]  }
   0x6   :  { %1199 = vmatpush3.bf16.msra.mxu0 %v1250_v20  ;;  %1242 = vmatpush3.bf16.msra.mxu1 %v1250_v20  ;;  %v128_v24 = vmul.f32 %v1357_v11, %v1357_v11  ;;  %v127_v25 = vmul.f32 %v1359_v12, %v1359_v12  ;;  %v136_v27 = vmul.f32 %v1366_v14, %v1366_v14  ;;  %v1427_v37 = vunpack.c.h.bf16 %v1156_v35  ;;  %v1157_v43 = vld [vmem:[%s1610_s0 + $0x28] sm:$0xff]   ;;  %v1257_v44 = vld [vmem:[%s1611_s1] sm:$0xff]  }
   0x7   :  { %1200 = vmatprep.subr.bf16.mxu0 %v1251_v23  ;;  %1235 = vmatprep.subr.bf16.mxu1 %v1251_v23  ;;  %v135_v28 = vmul.f32 %v1368_v15, %v1368_v15  ;;  %v130_v30 = vmul.f32 %v1375_v17, %v1375_v17  ;;  %v129_v31 = vmul.f32 %v1377_v18, %v1377_v18  ;;  %v1429_v38 = vunpack.c.l.bf16 %v1156_v35  ;;  %v1161_v47 = vld [vmem:[%s1610_s0 + $0x48] sm:$0xff]  }
   0x8   :  { %89 = vadd.xlane.f32.xlu1 %v1340_v4  ;;  %85 = vadd.xlane.f32.xlu0 %v1342_v5  ;;  %v138_v33 = vmul.f32 %v1387_v21, %v1387_v21  ;;  %v137_v34 = vmul.f32 %v1389_v22, %v1389_v22  ;;  %v1439_v41 = vunpack.c.h.bf16 %v1160_v39  ;;  %v1441_v42 = vunpack.c.l.bf16 %v1160_v39 }
   0x9   :  { %v1451_v45 = vunpack.c.h.bf16 %v1157_v43  ;;  %v1453_v46 = vunpack.c.l.bf16 %v1157_v43  ;;  %v1460_v48 = vunpack.c.h.bf16 %v1161_v47  ;;  %v1462_v49 = vunpack.c.l.bf16 %v1161_v47 }
   0xa   :  { %1201 = vmatpush3.bf16.msra.mxu0 %v1251_v23  ;;  %1243 = vmatpush3.bf16.msra.mxu1 %v1251_v23  ;;  %v132_v50 = vmul.f32 %v1427_v37, %v1427_v37  ;;  %v131_v51 = vmul.f32 %v1429_v38, %v1429_v38  ;;  %v140_v52 = vmul.f32 %v1439_v41, %v1439_v41 }
   0xb   :  { %1202 = vmatprep.subr.bf16.mxu0 %v1252_v26  ;;  %1236 = vmatprep.subr.bf16.mxu1 %v1252_v26  ;;  %v139_v53 = vmul.f32 %v1441_v42, %v1441_v42  ;;  %v134_v54 = vmul.f32 %v1451_v45, %v1451_v45  ;;  %v133_v55 = vmul.f32 %v1453_v46, %v1453_v46 }
   0xc   :  { %145 = vadd.xlane.f32.xlu1 %v124_v6  ;;  %143 = vadd.xlane.f32.xlu0 %v123_v7  ;;  %v142_v56 = vmul.f32 %v1460_v48, %v1460_v48  ;;  %v141_v57 = vmul.f32 %v1462_v49, %v1462_v49 }
   0xe   :  { %1203 = vmatpush3.bf16.msra.mxu0 %v1252_v26  ;;  %1244 = vmatpush3.bf16.msra.mxu1 %v1252_v26 }
   0xf   :  { %1204 = vmatprep.subr.bf16.mxu0 %v1253_v29  ;;  %1237 = vmatprep.subr.bf16.mxu1 %v1253_v29 }
  0x10   :  { %149 = vadd.xlane.f32.xlu1 %v126_v8  ;;  %147 = vadd.xlane.f32.xlu0 %v125_v9 }
  0x12   :  { %1205 = vmatpush3.bf16.msra.mxu0 %v1253_v29  ;;  %1245 = vmatpush3.bf16.msra.mxu1 %v1253_v29 }
  0x13   :  { %1206 = vmatprep.subr.bf16.mxu0 %v1254_v32  ;;  %1238 = vmatprep.subr.bf16.mxu1 %v1254_v32 }
  0x14   :  { %93 = vadd.xlane.f32.xlu1 %v1357_v11  ;;  %91 = vadd.xlane.f32.xlu0 %v1359_v12 }
  0x16   :  { %1207 = vmatpush3.bf16.msra.mxu0 %v1254_v32  ;;  %1246 = vmatpush3.bf16.msra.mxu1 %v1254_v32 }
  0x17   :  { %1208 = vmatprep.subr.bf16.mxu0 %v1255_v36  ;;  %1239 = vmatprep.subr.bf16.mxu1 %v1255_v36 }
  0x18   :  { %109 = vadd.xlane.f32.xlu1 %v1366_v14  ;;  %107 = vadd.xlane.f32.xlu0 %v1368_v15 }
  0x1a   :  { %1209 = vmatpush3.bf16.msra.mxu0 %v1255_v36  ;;  %1247 = vmatpush3.bf16.msra.mxu1 %v1255_v36 }
  0x1b   :  { %1210 = vmatprep.subr.bf16.mxu0 %v1256_v40  ;;  %1240 = vmatprep.subr.bf16.mxu1 %v1256_v40 }
  0x1c   :  { %97 = vadd.xlane.f32.xlu1 %v1375_v17  ;;  %95 = vadd.xlane.f32.xlu0 %v1377_v18 }
  0x1e   :  { %1211 = vmatpush3.bf16.msra.mxu0 %v1256_v40  ;;  %1248 = vmatpush3.bf16.msra.mxu1 %v1256_v40 }
  0x1f   :  { %1212 = vmatprep.subr.bf16.mxu0 %v1257_v44  ;;  %1241 = vmatprep.subr.bf16.mxu1 %v1257_v44 }
  0x20   :  { %113 = vadd.xlane.f32.xlu1 %v1387_v21  ;;  %111 = vadd.xlane.f32.xlu0 %v1389_v22 }
  0x22   :  { %1213 = vmatpush3.bf16.msra.mxu0 %v1257_v44  ;;  %1249 = vmatpush3.bf16.msra.mxu1 %v1257_v44 }
  0x24   :  { %153 = vadd.xlane.f32.xlu1 %v128_v24  ;;  %151 = vadd.xlane.f32.xlu0 %v127_v25 }
  0x28   :  { %169 = vadd.xlane.f32.xlu1 %v136_v27  ;;  %167 = vadd.xlane.f32.xlu0 %v135_v28 }
  0x2c   :  { %157 = vadd.xlane.f32.xlu1 %v130_v30  ;;  %155 = vadd.xlane.f32.xlu0 %v129_v31 }
  0x30   :  { %173 = vadd.xlane.f32.xlu1 %v138_v33  ;;  %171 = vadd.xlane.f32.xlu0 %v137_v34 }
  0x34   :  { %101 = vadd.xlane.f32.xlu1 %v1427_v37  ;;  %99 = vadd.xlane.f32.xlu0 %v1429_v38 }
  0x38   :  { %117 = vadd.xlane.f32.xlu1 %v1439_v41  ;;  %115 = vadd.xlane.f32.xlu0 %v1441_v42 }
  0x3c   :  { %105 = vadd.xlane.f32.xlu1 %v1451_v45  ;;  %103 = vadd.xlane.f32.xlu0 %v1453_v46 }
  0x40   :  { %121 = vadd.xlane.f32.xlu1 %v1460_v48  ;;  %119 = vadd.xlane.f32.xlu0 %v1462_v49 }
  0x44   :  { %161 = vadd.xlane.f32.xlu1 %v132_v50  ;;  %159 = vadd.xlane.f32.xlu0 %v131_v51 }
  0x48   :  { %177 = vadd.xlane.f32.xlu1 %v140_v52  ;;  %175 = vadd.xlane.f32.xlu0 %v139_v53 }
  0x4c   :  { %165 = vadd.xlane.f32.xlu1 %v134_v54  ;;  %163 = vadd.xlane.f32.xlu0 %v133_v55 }
  0x50   :  { %181 = vadd.xlane.f32.xlu1 %v142_v56  ;;  %179 = vadd.xlane.f32.xlu0 %v141_v57 }
  0x8d   :  { %v88_v58 = vpop.xlane.xlu1 %87  ;;  %v84_v59 = vpop.xlane.xlu0 %83 }
  0x8e   :  { %v183_v62 = vmul.f32 0.0625, %v84_v59  ;;  %v185_v0 = vmul.f32 0.0625, %v88_v58 }
  0x90   :  { %v223_v8 = vmul.f32 %v183_v62, %v183_v62  ;;  %v225_v20 = vmul.f32 %v185_v0, %v185_v0  ;;  %v263_v50 = vsub.f32 %v1336_v3, %v183_v62  ;;  %v265_v58 = vsub.f32 %v1334_v2, %v185_v0 }
  0x91   :  { %v90_v60 = vpop.xlane.xlu1 %89  ;;  %v86_v61 = vpop.xlane.xlu0 %85 }
  0x92   :  { %v184_v63 = vmul.f32 0.0625, %v86_v61  ;;  %v186_v1 = vmul.f32 0.0625, %v90_v60 }
  0x94   :  { %v224_v9 = vmul.f32 %v184_v63, %v184_v63  ;;  %v226_v23 = vmul.f32 %v186_v1, %v186_v1  ;;  %v264_v44 = vsub.f32 %v1342_v5, %v184_v63  ;;  %v266_v59 = vsub.f32 %v1340_v4, %v186_v1 }
  0x95   :  { %v146_v6 = vpop.xlane.xlu1 %145  ;;  %v144_v7 = vpop.xlane.xlu0 %143 }
  0x96   :  { %v204_v10 = vmul.f32 0.0625, %v146_v6  ;;  %v203_v13 = vmul.f32 0.0625, %v144_v7 }
  0x98   :  { %v244_v16 = vsub.f32 %v204_v10, %v224_v9  ;;  %v243_v19 = vsub.f32 %v203_v13, %v223_v8 }
  0x99   :  { %v150_v24 = vpop.xlane.xlu1 %149  ;;  %v148_v25 = vpop.xlane.xlu0 %147 }
  0x9a   :  { %v284_v26 = vadd.f32 1e-06, %v244_v16  ;;  %v283_v27 = vadd.f32 1e-06, %v243_v19  ;;  %v206_v28 = vmul.f32 0.0625, %v150_v24  ;;  %v205_v29 = vmul.f32 0.0625, %v148_v25 }
  0x9c   :  { %1268 = vrsqrt.f32 %v284_v26  ;;  %v246_v30 = vsub.f32 %v206_v28, %v226_v23  ;;  %v245_v31 = vsub.f32 %v205_v29, %v225_v20 }
  0x9d   :  { %1270 = vrsqrt.f32 %v283_v27  ;;  %v94_v32 = vpop.xlane.xlu1 %93  ;;  %v92_v33 = vpop.xlane.xlu0 %91 }
  0x9e   :  { %v286_v34 = vadd.f32 1e-06, %v246_v30  ;;  %v285_v35 = vadd.f32 1e-06, %v245_v31  ;;  %v1484_v51 = vmul.f32 0.0625, %v94_v32  ;;  %v1486_v56 = vmul.f32 0.0625, %v92_v33 }
  0xa0   :  { %1272 = vrsqrt.f32 %v286_v34  ;;  %v228_v5 = vmul.f32 %v1484_v51, %v1484_v51  ;;  %v227_v9 = vmul.f32 %v1486_v56, %v1486_v56 }
  0xa1   :  { %1274 = vrsqrt.f32 %v285_v35  ;;  %v110_v36 = vpop.xlane.xlu1 %109  ;;  %v108_v39 = vpop.xlane.xlu0 %107 }
  0xa2   :  { %v1492_v63 = vmul.f32 0.0625, %v110_v36  ;;  %v1494_v3 = vmul.f32 0.0625, %v108_v39 }
  0xa4   :  { %v236_v19 = vmul.f32 %v1492_v63, %v1492_v63  ;;  %v235_v20 = vmul.f32 %v1494_v3, %v1494_v3 }
  0xa5   :  { %v98_v40 = vpop.xlane.xlu1 %97  ;;  %v96_v43 = vpop.xlane.xlu0 %95 }
  0xa6   :  { %v1498_v0 = vmul.f32 0.0625, %v98_v40  ;;  %v1504_v23 = vmul.f32 0.0625, %v96_v43 }
  0xa8   :  { %v230_v30 = vmul.f32 %v1498_v0, %v1498_v0  ;;  %v229_v33 = vmul.f32 %v1504_v23, %v1504_v23 }
  0xa9   :  { %v1269_v47 = vpop.eup %1268  ;;  %v114_v52 = vpop.xlane.xlu1 %113 }
  0xaa   :  { %v112_v53 = vpop.xlane.xlu0 %111  ;;  %v1271_v54 = vpop.eup %1270  ;;  %v324_v55 = vmul.f32 %v1269_v47, %v264_v44  ;;  %v1510_v34 = vmul.f32 0.0625, %v114_v52 }
  0xab   :  { %v323_v57 = vmul.f32 %v1271_v54, %v263_v50  ;;  %v1512_v35 = vmul.f32 0.0625, %v112_v53 }
  0xad   :  { %v1273_v60 = vpop.eup %1272  ;;  %v1056_v61 = vpack.c.bf16 %v324_v55, %v323_v57  ;;  %v154_v62 = vpop.xlane.xlu1 %153  ;;  %v238_v57 = vmul.f32 %v1510_v34, %v1510_v34  ;;  %v237_v52 = vmul.f32 %v1512_v35, %v1512_v35 }
  0xae   :  { %v152_v6 = vpop.xlane.xlu0 %151  ;;  %v1275_v7 = vpop.eup %1274  ;;  %v326_v8 = vmul.f32 %v1273_v60, %v266_v59  ;;  %v208_v10 = vmul.f32 0.0625, %v154_v62 }
  0xaf   :  { %v207_v2 = vmul.f32 0.0625, %v152_v6  ;;  %1057 = vst [vmem:[#allocation3] sm:$0xff] %v1056_v61   ;;  %v325_v4 = vmul.f32 %v1275_v7, %v265_v58 }
  0xb0   :  { %v248_v1 = vsub.f32 %v208_v10, %v228_v5 }
  0xb1   :  { %v247_v13 = vsub.f32 %v207_v2, %v227_v9  ;;  %v1061_v16 = vpack.c.bf16 %v326_v8, %v325_v4  ;;  %v170_v24 = vpop.xlane.xlu1 %169  ;;  %v268_v4 = vsub.f32 %v1357_v11, %v1484_v51 }
  0xb2   :  { %v168_v25 = vpop.xlane.xlu0 %167  ;;  %v288_v26 = vadd.f32 1e-06, %v248_v1  ;;  %v216_v28 = vmul.f32 0.0625, %v170_v24 }
  0xb3   :  { %v287_v27 = vadd.f32 1e-06, %v247_v13  ;;  %v215_v29 = vmul.f32 0.0625, %v168_v25  ;;  %1162 = vst [vmem:[#allocation3 + $0x8] sm:$0xff] %v1061_v16   ;;  %v267_v13 = vsub.f32 %v1359_v12, %v1486_v56  ;;  %v270_v56 = vsub.f32 %v1375_v17, %v1498_v0 }
  0xb4   :  { %1276 = vrsqrt.f32 %v288_v26  ;;  %v256_v31 = vsub.f32 %v216_v28, %v236_v19  ;;  %v276_v26 = vsub.f32 %v1366_v14, %v1492_v63  ;;  %v275_v28 = vsub.f32 %v1368_v15, %v1494_v3 }
  0xb5   :  { %v255_v32 = vsub.f32 %v215_v29, %v235_v20  ;;  %1278 = vrsqrt.f32 %v287_v27  ;;  %v158_v36 = vpop.xlane.xlu1 %157  ;;  %v277_v17 = vsub.f32 %v1389_v22, %v1512_v35 }
  0xb6   :  { %v156_v39 = vpop.xlane.xlu0 %155  ;;  %v296_v40 = vadd.f32 1e-06, %v256_v31  ;;  %v210_v44 = vmul.f32 0.0625, %v158_v36  ;;  %v1258_v50 = vld [vmem:[#allocation3] sm:$0xff]  }
  0xb7   :  { %v295_v43 = vadd.f32 1e-06, %v255_v32  ;;  %v209_v47 = vmul.f32 0.0625, %v156_v39  ;;  %1214 = vmatprep.mubr.bf16.mxu0 %v1258_v50 }
  0xb8   :  { %1280 = vrsqrt.f32 %v296_v40  ;;  %v250_v54 = vsub.f32 %v210_v44, %v230_v30  ;;  %v278_v44 = vsub.f32 %v1387_v21, %v1510_v34 }
  0xb9   :  { %v249_v55 = vsub.f32 %v209_v47, %v229_v33  ;;  %1282 = vrsqrt.f32 %v295_v43  ;;  %v174_v53 = vpop.xlane.xlu1 %173  ;;  %v269_v33 = vsub.f32 %v1377_v18, %v1504_v23 }
  0xba   :  { %v172_v58 = vpop.xlane.xlu0 %171  ;;  %v290_v59 = vadd.f32 1e-06, %v250_v54  ;;  %v218_v61 = vmul.f32 0.0625, %v174_v53  ;;  %v1259_v62 = vld [vmem:[#allocation3 + $0x8] sm:$0xff]  }
  0xbb   :  { %v289_v60 = vadd.f32 1e-06, %v249_v55  ;;  %v217_v5 = vmul.f32 0.0625, %v172_v58  ;;  %1215 = vmatmul.mubr.bf16.vlgmr.msra.gmra.mxu0 %v1259_v62 }
  0xbc   :  { %1284 = vrsqrt.f32 %v290_v59  ;;  %v258_v6 = vsub.f32 %v218_v61, %v238_v57 }
  0xbd   :  { %v257_v7 = vsub.f32 %v217_v5, %v237_v52  ;;  %1286 = vrsqrt.f32 %v289_v60  ;;  %v102_v8 = vpop.xlane.xlu1 %101 }
  0xbe   :  { %v100_v9 = vpop.xlane.xlu0 %99  ;;  %v298_v10 = vadd.f32 1e-06, %v258_v6  ;;  %v1530_v14 = vmul.f32 0.0625, %v102_v8 }
  0xbf   :  { %v297_v2 = vadd.f32 1e-06, %v257_v7  ;;  %v1532_v40 = vmul.f32 0.0625, %v100_v9 }
  0xc0   :  { %1288 = vrsqrt.f32 %v298_v10  ;;  %v232_v18 = vmul.f32 %v1530_v14, %v1530_v14 }
  0xc1   :  { %v1277_v1 = vpop.eup %1276  ;;  %1290 = vrsqrt.f32 %v297_v2  ;;  %v118_v16 = vpop.xlane.xlu1 %117  ;;  %v231_v53 = vmul.f32 %v1532_v40, %v1532_v40 }
  0xc2   :  { %v116_v19 = vpop.xlane.xlu0 %115  ;;  %v1279_v20 = vpop.eup %1278  ;;  %v328_v24 = vmul.f32 %v1277_v1, %v268_v4  ;;  %v1540_v23 = vmul.f32 0.0625, %v118_v16 }
  0xc3   :  { %v327_v25 = vmul.f32 %v1279_v20, %v267_v13  ;;  %v1542_v50 = vmul.f32 0.0625, %v116_v19 }
  0xc4   :  { %v240_v5 = vmul.f32 %v1540_v23, %v1540_v23 }
  0xc5   :  { %v1281_v27 = vpop.eup %1280  ;;  %v1066_v29 = vpack.c.bf16 %v328_v24, %v327_v25  ;;  %v106_v11 = vpop.xlane.xlu1 %105  ;;  %v239_v62 = vmul.f32 %v1542_v50, %v1542_v50 }
  0xc6   :  { %v104_v51 = vpop.xlane.xlu0 %103  ;;  %v1283_v30 = vpop.eup %1282  ;;  %v336_v31 = vmul.f32 %v1281_v27, %v276_v26  ;;  %v1546_v58 = vmul.f32 0.0625, %v106_v11 }
  0xc7   :  { %1163 = vst [vmem:[#allocation3 + $0x10] sm:$0xff] %v1066_v29   ;;  %v335_v12 = vmul.f32 %v1283_v30, %v275_v28  ;;  %v1552_v6 = vmul.f32 0.0625, %v104_v51 }
  0xc8   :  { %v234_v13 = vmul.f32 %v1546_v58, %v1546_v58 }
  0xc9   :  { %v1285_v32 = vpop.eup %1284  ;;  %v1086_v36 = vpack.c.bf16 %v336_v31, %v335_v12  ;;  %v122_v63 = vpop.xlane.xlu1 %121  ;;  %v233_v20 = vmul.f32 %v1552_v6, %v1552_v6 }
  0xca   :  { %v120_v39 = vpop.xlane.xlu0 %119  ;;  %v1287_v15 = vpop.eup %1286  ;;  %v330_v3 = vmul.f32 %v1285_v32, %v270_v56  ;;  %v202_v24 = vmul.f32 0.0625, %v122_v63 }
  0xcb   :  { %1167 = vst [vmem:[#allocation3 + $0x30] sm:$0xff] %v1086_v36   ;;  %v329_v43 = vmul.f32 %v1287_v15, %v269_v33  ;;  %v1558_v25 = vmul.f32 0.0625, %v120_v39 }
  0xcc   :  { %v242_v56 = vmul.f32 %v202_v24, %v202_v24 }
  0xcd   :  { %v1289_v0 = vpop.eup %1288  ;;  %v1071_v47 = vpack.c.bf16 %v330_v3, %v329_v43  ;;  %v162_v54 = vpop.xlane.xlu1 %161  ;;  %v241_v32 = vmul.f32 %v1558_v25, %v1558_v25 }
  0xce   :  { %v160_v55 = vpop.xlane.xlu0 %159  ;;  %v1291_v57 = vpop.eup %1290  ;;  %v338_v52 = vmul.f32 %v1289_v0, %v278_v44  ;;  %v212_v21 = vmul.f32 0.0625, %v162_v54  ;;  %v1260_v35 = vld [vmem:[#allocation3 + $0x10] sm:$0xff]  }
  0xcf   :  { %v211_v34 = vmul.f32 0.0625, %v160_v55  ;;  %1164 = vst [vmem:[#allocation3 + $0x18] sm:$0xff] %v1071_v47   ;;  %v337_v22 = vmul.f32 %v1291_v57, %v277_v17  ;;  %1218 = vmatprep.mubr.bf16.mxu0 %v1260_v35  ;;  %v271_v55 = vsub.f32 %v1429_v38, %v1532_v40  ;;  %v273_v40 = vsub.f32 %v1453_v46, %v1552_v6 }
  0xd0   :  { %v252_v59 = vsub.f32 %v212_v21, %v232_v18  ;;  %v272_v18 = vsub.f32 %v1427_v37, %v1530_v14  ;;  %v280_v21 = vsub.f32 %v1439_v41, %v1540_v23  ;;  %v274_v14 = vsub.f32 %v1451_v45, %v1546_v58 }
  0xd1   :  { %v251_v60 = vsub.f32 %v211_v34, %v231_v53  ;;  %v1091_v61 = vpack.c.bf16 %v338_v52, %v337_v22  ;;  %v178_v7 = vpop.xlane.xlu1 %177  ;;  %v279_v22 = vsub.f32 %v1441_v42, %v1542_v50  ;;  %v282_v23 = vsub.f32 %v1460_v48, %v202_v24 }
  0xd2   :  { %v176_v8 = vpop.xlane.xlu0 %175  ;;  %v292_v9 = vadd.f32 1e-06, %v252_v59  ;;  %v220_v2 = vmul.f32 0.0625, %v178_v7  ;;  %v1261_v1 = vld [vmem:[#allocation3 + $0x30] sm:$0xff]   ;;  %v281_v50 = vsub.f32 %v1462_v49, %v1558_v25  ;;  %v952_v49 = vld [vmem:[%s1612_s2] ss:$0 sm:$0xff] }
  0xd3   :  { %v291_v10 = vadd.f32 1e-06, %v251_v60  ;;  %v219_v4 = vmul.f32 0.0625, %v176_v8  ;;  %1168 = vst [vmem:[#allocation3 + $0x38] sm:$0xff] %v1091_v61   ;;  %1226 = vmatprep.mubr.bf16.mxu1 %v1261_v1 }
  0xd4   :  { %1292 = vrsqrt.f32 %v292_v9  ;;  %v260_v16 = vsub.f32 %v220_v2, %v240_v5 }
  0xd5   :  { %v259_v19 = vsub.f32 %v219_v4, %v239_v62  ;;  %1294 = vrsqrt.f32 %v291_v10  ;;  %v166_v26 = vpop.xlane.xlu1 %165 }
  0xd6   :  { %v164_v27 = vpop.xlane.xlu0 %163  ;;  %v300_v28 = vadd.f32 1e-06, %v260_v16  ;;  %v214_v11 = vmul.f32 0.0625, %v166_v26  ;;  %v1262_v30 = vld [vmem:[#allocation3 + $0x18] sm:$0xff]  }
  0xd7   :  { %v299_v29 = vadd.f32 1e-06, %v259_v19  ;;  %v213_v51 = vmul.f32 0.0625, %v164_v27  ;;  %1219 = vmatmul.mubr.bf16.gmra.mxu0 %v1262_v30 }
  0xd8   :  { %1296 = vrsqrt.f32 %v300_v28  ;;  %v254_v31 = vsub.f32 %v214_v11, %v234_v13 }
  0xd9   :  { %v253_v12 = vsub.f32 %v213_v51, %v233_v20  ;;  %1298 = vrsqrt.f32 %v299_v29  ;;  %v182_v33 = vpop.xlane.xlu1 %181 }
  0xda   :  { %v180_v36 = vpop.xlane.xlu0 %179  ;;  %v294_v63 = vadd.f32 1e-06, %v254_v31  ;;  %v222_v15 = vmul.f32 0.0625, %v182_v33  ;;  %v1263_v43 = vld [vmem:[#allocation3 + $0x38] sm:$0xff]  }
  0xdb   :  { %v293_v39 = vadd.f32 1e-06, %v253_v12  ;;  %v221_v3 = vmul.f32 0.0625, %v180_v36  ;;  %1227 = vmatmul.mubr.bf16.vlgmr.msra.gmra.mxu1 %v1263_v43 }
  0xdc   :  { %1300 = vrsqrt.f32 %v294_v63  ;;  %v262_v44 = vsub.f32 %v222_v15, %v242_v56 }
  0xdd   :  { %v261_v17 = vsub.f32 %v221_v3, %v241_v32  ;;  %1302 = vrsqrt.f32 %v293_v39 }
  0xde   :  { %v302_v0 = vadd.f32 1e-06, %v262_v44 }
  0xdf   :  { %v301_v47 = vadd.f32 1e-06, %v261_v17 }
  0xe0   :  { %1304 = vrsqrt.f32 %v302_v0 }
  0xe1   :  { %v1293_v54 = vpop.eup %1292  ;;  %1306 = vrsqrt.f32 %v301_v47 }
  0xe2   :  { %v1295_v57 = vpop.eup %1294  ;;  %v332_v52 = vmul.f32 %v1293_v54, %v272_v18 }
  0xe3   :  { %v331_v53 = vmul.f32 %v1295_v57, %v271_v55 }
  0xe5   :  { %v1297_v34 = vpop.eup %1296  ;;  %v1076_v35 = vpack.c.bf16 %v332_v52, %v331_v53 }
  0xe6   :  { %v1299_v59 = vpop.eup %1298  ;;  %v340_v60 = vmul.f32 %v1297_v34, %v280_v21 }
  0xe7   :  { %1165 = vst [vmem:[#allocation3 + $0x20] sm:$0xff] %v1076_v35   ;;  %v339_v37 = vmul.f32 %v1299_v59, %v279_v22 }
  0xe9   :  { %v1301_v38 = vpop.eup %1300  ;;  %v1096_v61 = vpack.c.bf16 %v340_v60, %v339_v37 }
  0xea   :  { %v1303_v5 = vpop.eup %1302  ;;  %v334_v62 = vmul.f32 %v1301_v38, %v274_v14 }
  0xeb   :  { %1169 = vst [vmem:[#allocation3 + $0x40] sm:$0xff] %v1096_v61   ;;  %v333_v41 = vmul.f32 %v1303_v5, %v273_v40 }
  0xed   :  { %v1305_v42 = vpop.eup %1304  ;;  %v1081_v7 = vpack.c.bf16 %v334_v62, %v333_v41 }
  0xee   :  { %v1307_v8 = vpop.eup %1306  ;;  %v342_v9 = vmul.f32 %v1305_v42, %v282_v23  ;;  %v1264_v10 = vld [vmem:[#allocation3 + $0x20] sm:$0xff]  }
  0xef   :  { %1166 = vst [vmem:[#allocation3 + $0x28] sm:$0xff] %v1081_v7   ;;  %v341_v45 = vmul.f32 %v1307_v8, %v281_v50  ;;  %1222 = vmatprep.mubr.bf16.mxu0 %v1264_v10 }
  0xf1   :  { %v1101_v58 = vpack.c.bf16 %v342_v9, %v341_v45 }
  0xf2   :  { %v1265_v46 = vld [vmem:[#allocation3 + $0x40] sm:$0xff]  }
  0xf3   :  { %1170 = vst [vmem:[#allocation3 + $0x48] sm:$0xff] %v1101_v58   ;;  %1230 = vmatprep.mubr.bf16.mxu1 %v1265_v46 }
  0xf6   :  { %v1266_v6 = vld [vmem:[#allocation3 + $0x28] sm:$0xff]  }
  0xf7   :  { %1223 = vmatmul.mubr.bf16.gmra.mxu0 %v1266_v6 }
  0xfa   :  { %v1267_v2 = vld [vmem:[#allocation3 + $0x48] sm:$0xff]  }
  0xfb   :  { %1231 = vmatmul.mubr.bf16.gmra.mxu1 %v1267_v2 }
 0x17b   :  { %v1216_v48 = vpop.f32.mrf.mxu0 }
 0x17c   :  { %v792_v13 = vadd.f32 %v1216_v48, %v952_v49 }
 0x17d   :  { %v641_v4 = vpop.f32.mrf.mxu0 }
 0x17e   :  { %v790_v20 = vadd.f32 %v952_v49, %v641_v4 }
 0x17f   :  { %v1217_v1 = vpop.f32.mrf.mxu0 }
 0x180   :  { %v793_v16 = vadd.f32 %v1217_v1, %v952_v49 }
 0x181   :  { %v644_v19 = vpop.f32.mrf.mxu0 }
 0x182   :  { %v1111_v24 = vpack.c.bf16 %v793_v16, %v792_v13  ;;  %v791_v25 = vadd.f32 %v952_v49, %v644_v19 }
 0x184   :  { %1171 = vst [vmem:[%s1613_s3 + $0x8] sm:$0xff] %v1111_v24   ;;  %v1106_v26 = vpack.c.bf16 %v791_v25, %v790_v20 }
 0x186   :  { %1107 = vst [vmem:[%s1613_s3] sm:$0xff] %v1106_v26  }
 0x197   :  { %v1220_v27 = vpop.f32.mrf.mxu0 }
 0x198   :  { %v796_v51 = vadd.f32 %v1220_v27, %v952_v49 }
 0x199   :  { %v657_v28 = vpop.f32.mrf.mxu0 }
 0x19a   :  { %v794_v56 = vadd.f32 %v952_v49, %v657_v28 }
 0x19b   :  { %v1221_v29 = vpop.f32.mrf.mxu0  ;;  %v1228_v11 = vpop.f32.mrf.mxu1 }
 0x19c   :  { %v797_v30 = vadd.f32 %v1221_v29, %v952_v49  ;;  %v804_v63 = vadd.f32 %v1228_v11, %v952_v49 }
 0x19d   :  { %v660_v31 = vpop.f32.mrf.mxu0  ;;  %v689_v12 = vpop.f32.mrf.mxu1 }
 0x19e   :  { %v1121_v32 = vpack.c.bf16 %v797_v30, %v796_v51  ;;  %v795_v33 = vadd.f32 %v952_v49, %v660_v31  ;;  %v802_v43 = vadd.f32 %v952_v49, %v689_v12 }
 0x19f   :  { %v1229_v36 = vpop.f32.mrf.mxu1 }
 0x1a0   :  { %1173 = vst [vmem:[%s1613_s3 + $0x18] sm:$0xff] %v1121_v32   ;;  %v1116_v39 = vpack.c.bf16 %v795_v33, %v794_v56  ;;  %v805_v15 = vadd.f32 %v1229_v36, %v952_v49 }
 0x1a1   :  { %v692_v3 = vpop.f32.mrf.mxu1 }
 0x1a2   :  { %1172 = vst [vmem:[%s1613_s3 + $0x10] sm:$0xff] %v1116_v39   ;;  %v1141_v44 = vpack.c.bf16 %v805_v15, %v804_v63  ;;  %v803_v17 = vadd.f32 %v952_v49, %v692_v3 }
 0x1a4   :  { %1177 = vst [vmem:[%s1613_s3 + $0x38] sm:$0xff] %v1141_v44   ;;  %v1136_v0 = vpack.c.bf16 %v803_v17, %v802_v43 }
 0x1a6   :  { %1176 = vst [vmem:[%s1613_s3 + $0x30] sm:$0xff] %v1136_v0  }
 0x1b7   :  { %v1224_v47 = vpop.f32.mrf.mxu0 }
 0x1b8   :  { %v800_v57 = vadd.f32 %v1224_v47, %v952_v49 }
 0x1b9   :  { %v673_v18 = vpop.f32.mrf.mxu0 }
 0x1ba   :  { %v798_v34 = vadd.f32 %v952_v49, %v673_v18 }
 0x1bb   :  { %v1225_v54 = vpop.f32.mrf.mxu0  ;;  %v1232_v55 = vpop.f32.mrf.mxu1 }
 0x1bc   :  { %v801_v52 = vadd.f32 %v1225_v54, %v952_v49  ;;  %v808_v60 = vadd.f32 %v1232_v55, %v952_v49 }
 0x1bd   :  { %v676_v53 = vpop.f32.mrf.mxu0  ;;  %v705_v21 = vpop.f32.mrf.mxu1 }
 0x1be   :  { %v1131_v22 = vpack.c.bf16 %v801_v52, %v800_v57  ;;  %v799_v35 = vadd.f32 %v952_v49, %v676_v53  ;;  %v806_v40 = vadd.f32 %v952_v49, %v705_v21 }
 0x1bf   :  { %v1233_v59 = vpop.f32.mrf.mxu1 }
 0x1c0   :  { %1175 = vst [vmem:[%s1613_s3 + $0x28] sm:$0xff] %v1131_v22   ;;  %v1126_v37 = vpack.c.bf16 %v799_v35, %v798_v34  ;;  %v809_v14 = vadd.f32 %v1233_v59, %v952_v49 }
 0x1c1   :  { %v708_v38 = vpop.f32.mrf.mxu1 }
 0x1c2   :  { %1174 = vst [vmem:[%s1613_s3 + $0x20] sm:$0xff] %v1126_v37   ;;  %v1151_v61 = vpack.c.bf16 %v809_v14, %v808_v60  ;;  %v807_v5 = vadd.f32 %v952_v49, %v708_v38 }
 0x1c4   :  { %1179 = vst [vmem:[%s1613_s3 + $0x48] sm:$0xff] %v1151_v61   ;;  %v1146_v62 = vpack.c.bf16 %v807_v5, %v806_v40 }
 0x1c6   :  { %1178 = vst [vmem:[%s1613_s3 + $0x40] sm:$0xff] %v1146_v62  }

// kernel: _lambda_.24
= control target key start
LH: loop header
LB: loop body
LE: loop exit
PB: predicated region body
PF: predicated region fallthrough
CT: control target
= control target key end

     0   :  { %s992_s1 = inlined_call_operand.vmem [shape: bf16[128,128], index: 1, kind: input, shape index: {}]   ;;  %s993_s0 = inlined_call_operand.vmem [shape: bf16[160,128], index: 0, kind: input, shape index: {}]   ;;  %s994_s2 = inlined_call_operand.vmem [shape: f32[1,128], index: 2, kind: input, shape index: {}]   ;;  %s995_s3 = inlined_call_operand.vmem [shape: bf16[160,128], index: 3, kind: input, shape index: {}]   ;;  %s996_s4 = inlined_call_operand.vmem [shape: bf16[160,128], index: 4, kind: output, shape index: {}]  }
   0x1   :  { %v810_v0 = vld [vmem:[%s992_s1 + $0x38] sm:$0xff]   ;;  %v811_v1 = vld [vmem:[%s992_s1 + $0x30] sm:$0xff]   ;;  %v812_v2 = vld [vmem:[%s992_s1 + $0x28] sm:$0xff]  }
   0x2   :  { %758 = vmatprep.subr.bf16.mxu0 %v810_v0  ;;  %794 = vmatprep.subr.bf16.mxu1 %v810_v0  ;;  %v813_v3 = vld [vmem:[%s992_s1 + $0x20] sm:$0xff]   ;;  %v820_v5 = vld [vmem:[%s993_s0 + $0x30] sm:$0xff]   ;;  %v814_v6 = vld [vmem:[%s992_s1 + $0x18] sm:$0xff]  }
   0x3   :  { %759 = vmatpush3.bf16.msra.mxu0 %v810_v0  ;;  %802 = vmatpush3.bf16.msra.mxu1 %v810_v0  ;;  %v818_v4 = vld [vmem:[%s993_s0] sm:$0xff]   ;;  %v815_v7 = vld [vmem:[%s992_s1 + $0x10] sm:$0xff]   ;;  %v816_v8 = vld [vmem:[%s992_s1 + $0x8] sm:$0xff]  }
   0x4   :  { %760 = vmatprep.subr.bf16.mxu0 %v811_v1  ;;  %795 = vmatprep.subr.bf16.mxu1 %v811_v1  ;;  %v817_v9 = vld [vmem:[%s992_s1] sm:$0xff]   ;;  %v819_v10 = vld [vmem:[%s993_s0 + $0x8] sm:$0xff]   ;;  %v821_v11 = vld [vmem:[%s993_s0 + $0x38] sm:$0xff]  }
   0x5   :  { %774 = vmatprep.mubr.bf16.mxu0 %v818_v4  ;;  %786 = vmatprep.mubr.bf16.mxu1 %v820_v5  ;;  %v822_v12 = vld [vmem:[%s993_s0 + $0x10] sm:$0xff]   ;;  %v824_v13 = vld [vmem:[%s993_s0 + $0x40] sm:$0xff]   ;;  %v823_v14 = vld [vmem:[%s993_s0 + $0x18] sm:$0xff]  }
   0x6   :  { %v825_v15 = vld [vmem:[%s993_s0 + $0x48] sm:$0xff]   ;;  %v826_v16 = vld [vmem:[%s993_s0 + $0x20] sm:$0xff]   ;;  %v728_v18 = vld [vmem:[%s995_s3 + $0x38] sm:$0xff]  }
   0x7   :  { %761 = vmatpush3.bf16.msra.mxu0 %v811_v1  ;;  %803 = vmatpush3.bf16.msra.mxu1 %v811_v1  ;;  %v827_v17 = vld [vmem:[%s993_s0 + $0x28] sm:$0xff]   ;;  %v913_v19 = vld [vmem:[%s994_s2] ss:$0 sm:$0xff]  ;;  %v662_v25 = vunpack.c.l.bf16 %v728_v18  ;;  %v727_v26 = vld [vmem:[%s995_s3 + $0x30] sm:$0xff]   ;;  %v663_v32 = vunpack.c.h.bf16 %v728_v18 }
   0x8   :  { %762 = vmatprep.subr.bf16.mxu0 %v812_v2  ;;  %796 = vmatprep.subr.bf16.mxu1 %v812_v2  ;;  %v722_v20 = vld [vmem:[%s995_s3 + $0x8] sm:$0xff]   ;;  %v633_v23 = vld [vmem:[%s995_s3] sm:$0xff]   ;;  %v658_v36 = vunpack.c.l.bf16 %v727_v26  ;;  %v659_v47 = vunpack.c.h.bf16 %v727_v26  ;;  %v724_v51 = vld [vmem:[%s995_s3 + $0x18] sm:$0xff]  }
   0x9   :  { %v638_v28 = vunpack.c.l.bf16 %v722_v20  ;;  %v639_v31 = vunpack.c.h.bf16 %v722_v20  ;;  %v634_v33 = vunpack.c.l.bf16 %v633_v23  ;;  %v635_v37 = vunpack.c.h.bf16 %v633_v23  ;;  %v730_v43 = vld [vmem:[%s995_s3 + $0x48] sm:$0xff]   ;;  %v723_v55 = vld [vmem:[%s995_s3 + $0x10] sm:$0xff]   ;;  %v729_v62 = vld [vmem:[%s995_s3 + $0x40] sm:$0xff]  }
   0xa   :  { %v670_v57 = vunpack.c.l.bf16 %v730_v43  ;;  %v646_v0 = vunpack.c.l.bf16 %v724_v51  ;;  %v667_v23 = vunpack.c.h.bf16 %v729_v62 }
   0xb   :  { %763 = vmatpush3.bf16.msra.mxu0 %v812_v2  ;;  %804 = vmatpush3.bf16.msra.mxu1 %v812_v2 }
   0xc   :  { %764 = vmatprep.subr.bf16.mxu0 %v813_v3  ;;  %797 = vmatprep.subr.bf16.mxu1 %v813_v3 }
   0xf   :  { %765 = vmatpush3.bf16.msra.mxu0 %v813_v3  ;;  %805 = vmatpush3.bf16.msra.mxu1 %v813_v3 }
  0x10   :  { %766 = vmatprep.subr.bf16.mxu0 %v814_v6  ;;  %798 = vmatprep.subr.bf16.mxu1 %v814_v6 }
  0x13   :  { %767 = vmatpush3.bf16.msra.mxu0 %v814_v6  ;;  %806 = vmatpush3.bf16.msra.mxu1 %v814_v6  ;;  %v642_v6 = vunpack.c.l.bf16 %v723_v55 }
  0x14   :  { %768 = vmatprep.subr.bf16.mxu0 %v815_v7  ;;  %799 = vmatprep.subr.bf16.mxu1 %v815_v7 }
  0x17   :  { %769 = vmatpush3.bf16.msra.mxu0 %v815_v7  ;;  %807 = vmatpush3.bf16.msra.mxu1 %v815_v7  ;;  %v647_v7 = vunpack.c.h.bf16 %v724_v51 }
  0x18   :  { %770 = vmatprep.subr.bf16.mxu0 %v816_v8  ;;  %800 = vmatprep.subr.bf16.mxu1 %v816_v8 }
  0x1b   :  { %771 = vmatpush3.bf16.msra.mxu0 %v816_v8  ;;  %808 = vmatpush3.bf16.msra.mxu1 %v816_v8  ;;  %v671_v8 = vunpack.c.h.bf16 %v730_v43 }
  0x1c   :  { %772 = vmatprep.subr.bf16.mxu0 %v817_v9  ;;  %801 = vmatprep.subr.bf16.mxu1 %v817_v9 }
  0x1f   :  { %773 = vmatpush3.bf16.msra.mxu0 %v817_v9  ;;  %809 = vmatpush3.bf16.msra.mxu1 %v817_v9 }
  0x22   :  { %775 = vmatmul.mubr.bf16.vlgmr.msra.gmra.mxu0 %v819_v10  ;;  %787 = vmatmul.mubr.bf16.vlgmr.msra.gmra.mxu1 %v821_v11 }
  0x23   :  { %778 = vmatprep.mubr.bf16.mxu0 %v822_v12  ;;  %790 = vmatprep.mubr.bf16.mxu1 %v824_v13  ;;  %v666_v12 = vunpack.c.l.bf16 %v729_v62  ;;  %v643_v13 = vunpack.c.h.bf16 %v723_v55 }
  0x2a   :  { %779 = vmatmul.mubr.bf16.gmra.mxu0 %v823_v14  ;;  %791 = vmatmul.mubr.bf16.gmra.mxu1 %v825_v15 }
  0x2b   :  { %782 = vmatprep.mubr.bf16.mxu0 %v826_v16 }
  0x32   :  { %783 = vmatmul.mubr.bf16.gmra.mxu0 %v827_v17 }
  0xe2   :  { %v776_v21 = vpop.f32.mrf.mxu0  ;;  %v788_v22 = vpop.f32.mrf.mxu1 }
  0xe3   :  { %v403_v24 = vadd.f32 %v788_v22, %v913_v19  ;;  %v391_v27 = vadd.f32 %v776_v21, %v913_v19 }
  0xe4   :  { %v240_v29 = vpop.f32.mrf.mxu0  ;;  %v288_v30 = vpop.f32.mrf.mxu1 }
  0xe5   :  { %v401_v35 = vadd.f32 %v913_v19, %v288_v30  ;;  %v389_v39 = vadd.f32 %v913_v19, %v240_v29  ;;  %v463_v40 = vadd.f32 %v662_v25, %v403_v24  ;;  %v451_v44 = vadd.f32 %v638_v28, %v391_v27  ;;  %v726_v30 = vld [vmem:[%s995_s3 + $0x28] sm:$0xff]  }
  0xe6   :  { %v777_v34 = vpop.f32.mrf.mxu0  ;;  %v789_v38 = vpop.f32.mrf.mxu1 }
  0xe7   :  { %v392_v41 = vadd.f32 %v777_v34, %v913_v19  ;;  %v404_v42 = vadd.f32 %v789_v38, %v913_v19  ;;  %v461_v53 = vadd.f32 %v658_v36, %v401_v35  ;;  %v449_v58 = vadd.f32 %v634_v33, %v389_v39 }
  0xe8   :  { %v243_v45 = vpop.f32.mrf.mxu0  ;;  %v291_v46 = vpop.f32.mrf.mxu1 }
  0xe9   :  { %v452_v48 = vadd.f32 %v639_v31, %v392_v41  ;;  %v390_v49 = vadd.f32 %v913_v19, %v243_v45  ;;  %v464_v50 = vadd.f32 %v663_v32, %v404_v42  ;;  %v402_v52 = vadd.f32 %v913_v19, %v291_v46 }
  0xea   :  { %v780_v54 = vpop.f32.mrf.mxu0  ;;  %v792_v56 = vpop.f32.mrf.mxu1  ;;  %v655_v41 = vunpack.c.h.bf16 %v726_v30 }
  0xeb   :  { %v680_v59 = vpack.c.bf16 %v452_v48, %v451_v44  ;;  %v450_v60 = vadd.f32 %v635_v37, %v390_v49  ;;  %v710_v61 = vpack.c.bf16 %v464_v50, %v463_v40  ;;  %v395_v63 = vadd.f32 %v780_v54, %v913_v19  ;;  %v725_v37 = vld [vmem:[%s995_s3 + $0x20] sm:$0xff]  }
  0xec   :  { %v462_v1 = vadd.f32 %v659_v47, %v402_v52  ;;  %v256_v2 = vpop.f32.mrf.mxu0  ;;  %v407_v3 = vadd.f32 %v792_v56, %v913_v19  ;;  %v304_v4 = vpop.f32.mrf.mxu1  ;;  %v654_v40 = vunpack.c.l.bf16 %v726_v30  ;;  %v650_v45 = vunpack.c.l.bf16 %v725_v37 }
  0xed   :  { %731 = vst [vmem:[%s996_s4 + $0x8] sm:$0xff] %v680_v59   ;;  %v675_v5 = vpack.c.bf16 %v450_v60, %v449_v58  ;;  %737 = vst [vmem:[%s996_s4 + $0x38] sm:$0xff] %v710_v61   ;;  %v405_v11 = vadd.f32 %v913_v19, %v304_v4  ;;  %v393_v15 = vadd.f32 %v913_v19, %v256_v2  ;;  %v651_v47 = vunpack.c.h.bf16 %v725_v37 }
  0xee   :  { %v705_v9 = vpack.c.bf16 %v462_v1, %v461_v53  ;;  %v781_v10 = vpop.f32.mrf.mxu0  ;;  %v793_v14 = vpop.f32.mrf.mxu1  ;;  %v467_v16 = vadd.f32 %v670_v57, %v407_v3  ;;  %v455_v20 = vadd.f32 %v646_v0, %v395_v63 }
  0xef   :  { %676 = vst [vmem:[%s996_s4] sm:$0xff] %v675_v5   ;;  %v396_v17 = vadd.f32 %v781_v10, %v913_v19  ;;  %v408_v18 = vadd.f32 %v793_v14, %v913_v19  ;;  %v465_v28 = vadd.f32 %v666_v12, %v405_v11  ;;  %v453_v31 = vadd.f32 %v642_v6, %v393_v15 }
  0xf0   :  { %736 = vst [vmem:[%s996_s4 + $0x30] sm:$0xff] %v705_v9   ;;  %v259_v21 = vpop.f32.mrf.mxu0  ;;  %v307_v22 = vpop.f32.mrf.mxu1 }
  0xf1   :  { %v456_v24 = vadd.f32 %v647_v7, %v396_v17  ;;  %v394_v25 = vadd.f32 %v913_v19, %v259_v21  ;;  %v468_v26 = vadd.f32 %v671_v8, %v408_v18  ;;  %v406_v27 = vadd.f32 %v913_v19, %v307_v22 }
  0xf2   :  { %v784_v29 = vpop.f32.mrf.mxu0 }
  0xf3   :  { %v690_v32 = vpack.c.bf16 %v456_v24, %v455_v20  ;;  %v454_v33 = vadd.f32 %v643_v13, %v394_v25  ;;  %v720_v34 = vpack.c.bf16 %v468_v26, %v467_v16  ;;  %v466_v35 = vadd.f32 %v667_v23, %v406_v27 }
  0xf4   :  { %v272_v36 = vpop.f32.mrf.mxu0  ;;  %v399_v39 = vadd.f32 %v784_v29, %v913_v19 }
  0xf5   :  { %733 = vst [vmem:[%s996_s4 + $0x18] sm:$0xff] %v690_v32   ;;  %v685_v38 = vpack.c.bf16 %v454_v33, %v453_v31  ;;  %739 = vst [vmem:[%s996_s4 + $0x48] sm:$0xff] %v720_v34   ;;  %v715_v42 = vpack.c.bf16 %v466_v35, %v465_v28  ;;  %v397_v44 = vadd.f32 %v913_v19, %v272_v36 }
  0xf6   :  { %v785_v43 = vpop.f32.mrf.mxu0  ;;  %v459_v49 = vadd.f32 %v654_v40, %v399_v39 }
  0xf7   :  { %732 = vst [vmem:[%s996_s4 + $0x10] sm:$0xff] %v685_v38   ;;  %v400_v46 = vadd.f32 %v785_v43, %v913_v19  ;;  %738 = vst [vmem:[%s996_s4 + $0x40] sm:$0xff] %v715_v42   ;;  %v457_v52 = vadd.f32 %v650_v45, %v397_v44 }
  0xf8   :  { %v275_v48 = vpop.f32.mrf.mxu0 }
  0xf9   :  { %v460_v50 = vadd.f32 %v655_v41, %v400_v46  ;;  %v398_v51 = vadd.f32 %v913_v19, %v275_v48 }
  0xfb   :  { %v700_v53 = vpack.c.bf16 %v460_v50, %v459_v49  ;;  %v458_v54 = vadd.f32 %v651_v47, %v398_v51 }
  0xfd   :  { %735 = vst [vmem:[%s996_s4 + $0x28] sm:$0xff] %v700_v53   ;;  %v695_v55 = vpack.c.bf16 %v458_v54, %v457_v52 }
  0xff   :  { %734 = vst [vmem:[%s996_s4 + $0x20] sm:$0xff] %v695_v55  }

// kernel: _lambda_.25
= control target key start
LH: loop header
LB: loop body
LE: loop exit
PB: predicated region body
PF: predicated region fallthrough
CT: control target
= control target key end

     0   :  { %s1957_s0 = inlined_call_operand.vmem [shape: bf16[160,128], index: 0, kind: input, shape index: {}]   ;;  %s1958_s1 = inlined_call_operand.vmem [shape: bf16[128,128], index: 1, kind: input, shape index: {}]   ;;  %s1959_s2 = inlined_call_operand.vmem [shape: f32[1,128], index: 2, kind: input, shape index: {}]   ;;  %s1960_s3 = inlined_call_operand.vmem [shape: bf16[160,128], index: 3, kind: output, shape index: {}]  }
   0x1   :  { %v1333_v0 = vld [vmem:[%s1957_s0 + $0x8] sm:$0xff]   ;;  %v1194_v1 = vld [vmem:[%s1957_s0] sm:$0xff]   ;;  %v1334_v10 = vld [vmem:[%s1957_s0 + $0x10] sm:$0xff]  }
   0x2   :  { %v1554_v2 = vunpack.c.l.bf16 %v1333_v0  ;;  %v1556_v3 = vunpack.c.l.bf16 %v1194_v1  ;;  %v1560_v4 = vunpack.c.h.bf16 %v1333_v0  ;;  %v1562_v5 = vunpack.c.h.bf16 %v1194_v1  ;;  %v1338_v13 = vld [vmem:[%s1957_s0 + $0x30] sm:$0xff]   ;;  %v1335_v16 = vld [vmem:[%s1957_s0 + $0x18] sm:$0xff]   ;;  %v1432_v26 = vld [vmem:[%s1958_s1 + $0x28] sm:$0xff]  }
   0x3   :  { %v1577_v11 = vunpack.c.h.bf16 %v1334_v10  ;;  %v1579_v12 = vunpack.c.l.bf16 %v1334_v10  ;;  %v1586_v14 = vunpack.c.h.bf16 %v1338_v13  ;;  %v1588_v15 = vunpack.c.l.bf16 %v1338_v13  ;;  %v1339_v19 = vld [vmem:[%s1957_s0 + $0x38] sm:$0xff]   ;;  %v1431_v23 = vld [vmem:[%s1958_s1 + $0x30] sm:$0xff]   ;;  %v1433_v29 = vld [vmem:[%s1958_s1 + $0x20] sm:$0xff]  }
   0x4   :  { %87 = vadd.xlane.f32.xlu1 %v1554_v2  ;;  %83 = vadd.xlane.f32.xlu0 %v1556_v3  ;;  %v124_v6 = vmul.f32 %v1562_v5, %v1562_v5  ;;  %v123_v7 = vmul.f32 %v1556_v3, %v1556_v3  ;;  %v126_v8 = vmul.f32 %v1560_v4, %v1560_v4  ;;  %v1595_v17 = vunpack.c.h.bf16 %v1335_v16  ;;  %v1430_v20 = vld [vmem:[%s1958_s1 + $0x38] sm:$0xff]   ;;  %v1336_v35 = vld [vmem:[%s1957_s0 + $0x20] sm:$0xff]   ;;  %v1435_v36 = vld [vmem:[%s1958_s1 + $0x10] sm:$0xff]  }
   0x5   :  { %v125_v9 = vmul.f32 %v1554_v2, %v1554_v2  ;;  %v1597_v18 = vunpack.c.l.bf16 %v1335_v16  ;;  %v1607_v21 = vunpack.c.h.bf16 %v1339_v19  ;;  %v1609_v22 = vunpack.c.l.bf16 %v1339_v19  ;;  %1378 = vmatprep.subr.bf16.mxu0 %v1430_v20  ;;  %1414 = vmatprep.subr.bf16.mxu1 %v1430_v20  ;;  %v1434_v32 = vld [vmem:[%s1958_s1 + $0x18] sm:$0xff]   ;;  %v1340_v39 = vld [vmem:[%s1957_s0 + $0x40] sm:$0xff]   ;;  %v1436_v40 = vld [vmem:[%s1958_s1 + $0x8] sm:$0xff]  }
   0x6   :  { %1379 = vmatpush3.bf16.msra.mxu0 %v1430_v20  ;;  %1422 = vmatpush3.bf16.msra.mxu1 %v1430_v20  ;;  %v128_v24 = vmul.f32 %v1577_v11, %v1577_v11  ;;  %v127_v25 = vmul.f32 %v1579_v12, %v1579_v12  ;;  %v136_v27 = vmul.f32 %v1586_v14, %v1586_v14  ;;  %v1647_v37 = vunpack.c.h.bf16 %v1336_v35  ;;  %v1337_v43 = vld [vmem:[%s1957_s0 + $0x28] sm:$0xff]   ;;  %v1437_v44 = vld [vmem:[%s1958_s1] sm:$0xff]  }
   0x7   :  { %1380 = vmatprep.subr.bf16.mxu0 %v1431_v23  ;;  %1415 = vmatprep.subr.bf16.mxu1 %v1431_v23  ;;  %v135_v28 = vmul.f32 %v1588_v15, %v1588_v15  ;;  %v130_v30 = vmul.f32 %v1595_v17, %v1595_v17  ;;  %v129_v31 = vmul.f32 %v1597_v18, %v1597_v18  ;;  %v1649_v38 = vunpack.c.l.bf16 %v1336_v35  ;;  %v1341_v47 = vld [vmem:[%s1957_s0 + $0x48] sm:$0xff]  }
   0x8   :  { %89 = vadd.xlane.f32.xlu1 %v1560_v4  ;;  %85 = vadd.xlane.f32.xlu0 %v1562_v5  ;;  %v138_v33 = vmul.f32 %v1607_v21, %v1607_v21  ;;  %v137_v34 = vmul.f32 %v1609_v22, %v1609_v22  ;;  %v1659_v41 = vunpack.c.h.bf16 %v1340_v39  ;;  %v1661_v42 = vunpack.c.l.bf16 %v1340_v39 }
   0x9   :  { %v1671_v45 = vunpack.c.h.bf16 %v1337_v43  ;;  %v1673_v46 = vunpack.c.l.bf16 %v1337_v43  ;;  %v1680_v48 = vunpack.c.h.bf16 %v1341_v47  ;;  %v1682_v49 = vunpack.c.l.bf16 %v1341_v47 }
   0xa   :  { %1381 = vmatpush3.bf16.msra.mxu0 %v1431_v23  ;;  %1423 = vmatpush3.bf16.msra.mxu1 %v1431_v23  ;;  %v132_v50 = vmul.f32 %v1647_v37, %v1647_v37  ;;  %v131_v51 = vmul.f32 %v1649_v38, %v1649_v38  ;;  %v140_v52 = vmul.f32 %v1659_v41, %v1659_v41 }
   0xb   :  { %1382 = vmatprep.subr.bf16.mxu0 %v1432_v26  ;;  %1416 = vmatprep.subr.bf16.mxu1 %v1432_v26  ;;  %v139_v53 = vmul.f32 %v1661_v42, %v1661_v42  ;;  %v134_v54 = vmul.f32 %v1671_v45, %v1671_v45  ;;  %v133_v55 = vmul.f32 %v1673_v46, %v1673_v46 }
   0xc   :  { %145 = vadd.xlane.f32.xlu1 %v124_v6  ;;  %143 = vadd.xlane.f32.xlu0 %v123_v7  ;;  %v142_v56 = vmul.f32 %v1680_v48, %v1680_v48  ;;  %v141_v57 = vmul.f32 %v1682_v49, %v1682_v49 }
   0xe   :  { %1383 = vmatpush3.bf16.msra.mxu0 %v1432_v26  ;;  %1424 = vmatpush3.bf16.msra.mxu1 %v1432_v26 }
   0xf   :  { %1384 = vmatprep.subr.bf16.mxu0 %v1433_v29  ;;  %1417 = vmatprep.subr.bf16.mxu1 %v1433_v29 }
  0x10   :  { %149 = vadd.xlane.f32.xlu1 %v126_v8  ;;  %147 = vadd.xlane.f32.xlu0 %v125_v9 }
  0x12   :  { %1385 = vmatpush3.bf16.msra.mxu0 %v1433_v29  ;;  %1425 = vmatpush3.bf16.msra.mxu1 %v1433_v29 }
  0x13   :  { %1386 = vmatprep.subr.bf16.mxu0 %v1434_v32  ;;  %1418 = vmatprep.subr.bf16.mxu1 %v1434_v32 }
  0x14   :  { %93 = vadd.xlane.f32.xlu1 %v1577_v11  ;;  %91 = vadd.xlane.f32.xlu0 %v1579_v12 }
  0x16   :  { %1387 = vmatpush3.bf16.msra.mxu0 %v1434_v32  ;;  %1426 = vmatpush3.bf16.msra.mxu1 %v1434_v32 }
  0x17   :  { %1388 = vmatprep.subr.bf16.mxu0 %v1435_v36  ;;  %1419 = vmatprep.subr.bf16.mxu1 %v1435_v36 }
  0x18   :  { %109 = vadd.xlane.f32.xlu1 %v1586_v14  ;;  %107 = vadd.xlane.f32.xlu0 %v1588_v15 }
  0x1a   :  { %1389 = vmatpush3.bf16.msra.mxu0 %v1435_v36  ;;  %1427 = vmatpush3.bf16.msra.mxu1 %v1435_v36 }
  0x1b   :  { %1390 = vmatprep.subr.bf16.mxu0 %v1436_v40  ;;  %1420 = vmatprep.subr.bf16.mxu1 %v1436_v40 }
  0x1c   :  { %97 = vadd.xlane.f32.xlu1 %v1595_v17  ;;  %95 = vadd.xlane.f32.xlu0 %v1597_v18 }
  0x1e   :  { %1391 = vmatpush3.bf16.msra.mxu0 %v1436_v40  ;;  %1428 = vmatpush3.bf16.msra.mxu1 %v1436_v40 }
  0x1f   :  { %1392 = vmatprep.subr.bf16.mxu0 %v1437_v44  ;;  %1421 = vmatprep.subr.bf16.mxu1 %v1437_v44 }
  0x20   :  { %113 = vadd.xlane.f32.xlu1 %v1607_v21  ;;  %111 = vadd.xlane.f32.xlu0 %v1609_v22 }
  0x22   :  { %1393 = vmatpush3.bf16.msra.mxu0 %v1437_v44  ;;  %1429 = vmatpush3.bf16.msra.mxu1 %v1437_v44 }
  0x24   :  { %153 = vadd.xlane.f32.xlu1 %v128_v24  ;;  %151 = vadd.xlane.f32.xlu0 %v127_v25 }
  0x28   :  { %169 = vadd.xlane.f32.xlu1 %v136_v27  ;;  %167 = vadd.xlane.f32.xlu0 %v135_v28 }
  0x2c   :  { %157 = vadd.xlane.f32.xlu1 %v130_v30  ;;  %155 = vadd.xlane.f32.xlu0 %v129_v31 }
  0x30   :  { %173 = vadd.xlane.f32.xlu1 %v138_v33  ;;  %171 = vadd.xlane.f32.xlu0 %v137_v34 }
  0x34   :  { %101 = vadd.xlane.f32.xlu1 %v1647_v37  ;;  %99 = vadd.xlane.f32.xlu0 %v1649_v38 }
  0x38   :  { %117 = vadd.xlane.f32.xlu1 %v1659_v41  ;;  %115 = vadd.xlane.f32.xlu0 %v1661_v42 }
  0x3c   :  { %105 = vadd.xlane.f32.xlu1 %v1671_v45  ;;  %103 = vadd.xlane.f32.xlu0 %v1673_v46 }
  0x40   :  { %121 = vadd.xlane.f32.xlu1 %v1680_v48  ;;  %119 = vadd.xlane.f32.xlu0 %v1682_v49 }
  0x44   :  { %161 = vadd.xlane.f32.xlu1 %v132_v50  ;;  %159 = vadd.xlane.f32.xlu0 %v131_v51 }
  0x48   :  { %177 = vadd.xlane.f32.xlu1 %v140_v52  ;;  %175 = vadd.xlane.f32.xlu0 %v139_v53 }
  0x4c   :  { %165 = vadd.xlane.f32.xlu1 %v134_v54  ;;  %163 = vadd.xlane.f32.xlu0 %v133_v55 }
  0x50   :  { %181 = vadd.xlane.f32.xlu1 %v142_v56  ;;  %179 = vadd.xlane.f32.xlu0 %v141_v57 }
  0x8d   :  { %v88_v58 = vpop.xlane.xlu1 %87  ;;  %v84_v59 = vpop.xlane.xlu0 %83 }
  0x8e   :  { %v183_v62 = vmul.f32 0.0625, %v84_v59  ;;  %v185_v0 = vmul.f32 0.0625, %v88_v58 }
  0x90   :  { %v223_v8 = vmul.f32 %v183_v62, %v183_v62  ;;  %v225_v20 = vmul.f32 %v185_v0, %v185_v0  ;;  %v263_v50 = vsub.f32 %v1556_v3, %v183_v62  ;;  %v265_v58 = vsub.f32 %v1554_v2, %v185_v0 }
  0x91   :  { %v90_v60 = vpop.xlane.xlu1 %89  ;;  %v86_v61 = vpop.xlane.xlu0 %85 }
  0x92   :  { %v184_v63 = vmul.f32 0.0625, %v86_v61  ;;  %v186_v1 = vmul.f32 0.0625, %v90_v60 }
  0x94   :  { %v224_v9 = vmul.f32 %v184_v63, %v184_v63  ;;  %v226_v23 = vmul.f32 %v186_v1, %v186_v1  ;;  %v264_v44 = vsub.f32 %v1562_v5, %v184_v63  ;;  %v266_v59 = vsub.f32 %v1560_v4, %v186_v1 }
  0x95   :  { %v146_v6 = vpop.xlane.xlu1 %145  ;;  %v144_v7 = vpop.xlane.xlu0 %143 }
  0x96   :  { %v204_v10 = vmul.f32 0.0625, %v146_v6  ;;  %v203_v13 = vmul.f32 0.0625, %v144_v7 }
  0x98   :  { %v244_v16 = vsub.f32 %v204_v10, %v224_v9  ;;  %v243_v19 = vsub.f32 %v203_v13, %v223_v8 }
  0x99   :  { %v150_v24 = vpop.xlane.xlu1 %149  ;;  %v148_v25 = vpop.xlane.xlu0 %147 }
  0x9a   :  { %v284_v26 = vadd.f32 1e-06, %v244_v16  ;;  %v283_v27 = vadd.f32 1e-06, %v243_v19  ;;  %v206_v28 = vmul.f32 0.0625, %v150_v24  ;;  %v205_v29 = vmul.f32 0.0625, %v148_v25 }
  0x9c   :  { %1448 = vrsqrt.f32 %v284_v26  ;;  %v246_v30 = vsub.f32 %v206_v28, %v226_v23  ;;  %v245_v31 = vsub.f32 %v205_v29, %v225_v20 }
  0x9d   :  { %1450 = vrsqrt.f32 %v283_v27  ;;  %v94_v32 = vpop.xlane.xlu1 %93  ;;  %v92_v33 = vpop.xlane.xlu0 %91 }
  0x9e   :  { %v286_v34 = vadd.f32 1e-06, %v246_v30  ;;  %v285_v35 = vadd.f32 1e-06, %v245_v31  ;;  %v1704_v51 = vmul.f32 0.0625, %v94_v32  ;;  %v1706_v56 = vmul.f32 0.0625, %v92_v33 }
  0xa0   :  { %1452 = vrsqrt.f32 %v286_v34  ;;  %v228_v5 = vmul.f32 %v1704_v51, %v1704_v51  ;;  %v227_v9 = vmul.f32 %v1706_v56, %v1706_v56 }
  0xa1   :  { %1454 = vrsqrt.f32 %v285_v35  ;;  %v110_v36 = vpop.xlane.xlu1 %109  ;;  %v108_v39 = vpop.xlane.xlu0 %107 }
  0xa2   :  { %v1712_v63 = vmul.f32 0.0625, %v110_v36  ;;  %v1714_v3 = vmul.f32 0.0625, %v108_v39 }
  0xa4   :  { %v236_v19 = vmul.f32 %v1712_v63, %v1712_v63  ;;  %v235_v20 = vmul.f32 %v1714_v3, %v1714_v3 }
  0xa5   :  { %v98_v40 = vpop.xlane.xlu1 %97  ;;  %v96_v43 = vpop.xlane.xlu0 %95 }
  0xa6   :  { %v1718_v0 = vmul.f32 0.0625, %v98_v40  ;;  %v1724_v23 = vmul.f32 0.0625, %v96_v43 }
  0xa8   :  { %v230_v30 = vmul.f32 %v1718_v0, %v1718_v0  ;;  %v229_v33 = vmul.f32 %v1724_v23, %v1724_v23 }
  0xa9   :  { %v1449_v47 = vpop.eup %1448  ;;  %v114_v52 = vpop.xlane.xlu1 %113 }
  0xaa   :  { %v112_v53 = vpop.xlane.xlu0 %111  ;;  %v1451_v54 = vpop.eup %1450  ;;  %v324_v55 = vmul.f32 %v1449_v47, %v264_v44  ;;  %v1730_v34 = vmul.f32 0.0625, %v114_v52 }
  0xab   :  { %v323_v57 = vmul.f32 %v1451_v54, %v263_v50  ;;  %v1732_v35 = vmul.f32 0.0625, %v112_v53 }
  0xad   :  { %v1453_v60 = vpop.eup %1452  ;;  %v1236_v61 = vpack.c.bf16 %v324_v55, %v323_v57  ;;  %v154_v62 = vpop.xlane.xlu1 %153  ;;  %v238_v57 = vmul.f32 %v1730_v34, %v1730_v34  ;;  %v237_v52 = vmul.f32 %v1732_v35, %v1732_v35 }
  0xae   :  { %v152_v6 = vpop.xlane.xlu0 %151  ;;  %v1455_v7 = vpop.eup %1454  ;;  %v326_v8 = vmul.f32 %v1453_v60, %v266_v59  ;;  %v208_v10 = vmul.f32 0.0625, %v154_v62 }
  0xaf   :  { %v207_v2 = vmul.f32 0.0625, %v152_v6  ;;  %1237 = vst [vmem:[#allocation3] sm:$0xff] %v1236_v61   ;;  %v325_v4 = vmul.f32 %v1455_v7, %v265_v58 }
  0xb0   :  { %v248_v1 = vsub.f32 %v208_v10, %v228_v5 }
  0xb1   :  { %v247_v13 = vsub.f32 %v207_v2, %v227_v9  ;;  %v1241_v16 = vpack.c.bf16 %v326_v8, %v325_v4  ;;  %v170_v24 = vpop.xlane.xlu1 %169  ;;  %v268_v4 = vsub.f32 %v1577_v11, %v1704_v51 }
  0xb2   :  { %v168_v25 = vpop.xlane.xlu0 %167  ;;  %v288_v26 = vadd.f32 1e-06, %v248_v1  ;;  %v216_v28 = vmul.f32 0.0625, %v170_v24 }
  0xb3   :  { %v287_v27 = vadd.f32 1e-06, %v247_v13  ;;  %v215_v29 = vmul.f32 0.0625, %v168_v25  ;;  %1342 = vst [vmem:[#allocation3 + $0x8] sm:$0xff] %v1241_v16   ;;  %v267_v13 = vsub.f32 %v1579_v12, %v1706_v56  ;;  %v270_v56 = vsub.f32 %v1595_v17, %v1718_v0 }
  0xb4   :  { %1456 = vrsqrt.f32 %v288_v26  ;;  %v256_v31 = vsub.f32 %v216_v28, %v236_v19  ;;  %v276_v26 = vsub.f32 %v1586_v14, %v1712_v63  ;;  %v275_v28 = vsub.f32 %v1588_v15, %v1714_v3 }
  0xb5   :  { %v255_v32 = vsub.f32 %v215_v29, %v235_v20  ;;  %1458 = vrsqrt.f32 %v287_v27  ;;  %v158_v36 = vpop.xlane.xlu1 %157  ;;  %v277_v17 = vsub.f32 %v1609_v22, %v1732_v35 }
  0xb6   :  { %v156_v39 = vpop.xlane.xlu0 %155  ;;  %v296_v40 = vadd.f32 1e-06, %v256_v31  ;;  %v210_v44 = vmul.f32 0.0625, %v158_v36  ;;  %v1438_v50 = vld [vmem:[#allocation3] sm:$0xff]  }
  0xb7   :  { %v295_v43 = vadd.f32 1e-06, %v255_v32  ;;  %v209_v47 = vmul.f32 0.0625, %v156_v39  ;;  %1394 = vmatprep.mubr.bf16.mxu0 %v1438_v50 }
  0xb8   :  { %1460 = vrsqrt.f32 %v296_v40  ;;  %v250_v54 = vsub.f32 %v210_v44, %v230_v30  ;;  %v278_v44 = vsub.f32 %v1607_v21, %v1730_v34 }
  0xb9   :  { %v249_v55 = vsub.f32 %v209_v47, %v229_v33  ;;  %1462 = vrsqrt.f32 %v295_v43  ;;  %v174_v53 = vpop.xlane.xlu1 %173  ;;  %v269_v33 = vsub.f32 %v1597_v18, %v1724_v23 }
  0xba   :  { %v172_v58 = vpop.xlane.xlu0 %171  ;;  %v290_v59 = vadd.f32 1e-06, %v250_v54  ;;  %v218_v61 = vmul.f32 0.0625, %v174_v53  ;;  %v1439_v62 = vld [vmem:[#allocation3 + $0x8] sm:$0xff]  }
  0xbb   :  { %v289_v60 = vadd.f32 1e-06, %v249_v55  ;;  %v217_v5 = vmul.f32 0.0625, %v172_v58  ;;  %1395 = vmatmul.mubr.bf16.vlgmr.msra.gmra.mxu0 %v1439_v62 }
  0xbc   :  { %1464 = vrsqrt.f32 %v290_v59  ;;  %v258_v6 = vsub.f32 %v218_v61, %v238_v57 }
  0xbd   :  { %v257_v7 = vsub.f32 %v217_v5, %v237_v52  ;;  %1466 = vrsqrt.f32 %v289_v60  ;;  %v102_v8 = vpop.xlane.xlu1 %101 }
  0xbe   :  { %v100_v9 = vpop.xlane.xlu0 %99  ;;  %v298_v10 = vadd.f32 1e-06, %v258_v6  ;;  %v1750_v14 = vmul.f32 0.0625, %v102_v8 }
  0xbf   :  { %v297_v2 = vadd.f32 1e-06, %v257_v7  ;;  %v1752_v40 = vmul.f32 0.0625, %v100_v9 }
  0xc0   :  { %1468 = vrsqrt.f32 %v298_v10  ;;  %v232_v18 = vmul.f32 %v1750_v14, %v1750_v14 }
  0xc1   :  { %v1457_v1 = vpop.eup %1456  ;;  %1470 = vrsqrt.f32 %v297_v2  ;;  %v118_v16 = vpop.xlane.xlu1 %117  ;;  %v231_v53 = vmul.f32 %v1752_v40, %v1752_v40 }
  0xc2   :  { %v116_v19 = vpop.xlane.xlu0 %115  ;;  %v1459_v20 = vpop.eup %1458  ;;  %v328_v24 = vmul.f32 %v1457_v1, %v268_v4  ;;  %v1760_v23 = vmul.f32 0.0625, %v118_v16 }
  0xc3   :  { %v327_v25 = vmul.f32 %v1459_v20, %v267_v13  ;;  %v1762_v50 = vmul.f32 0.0625, %v116_v19 }
  0xc4   :  { %v240_v5 = vmul.f32 %v1760_v23, %v1760_v23 }
  0xc5   :  { %v1461_v27 = vpop.eup %1460  ;;  %v1246_v29 = vpack.c.bf16 %v328_v24, %v327_v25  ;;  %v106_v11 = vpop.xlane.xlu1 %105  ;;  %v239_v62 = vmul.f32 %v1762_v50, %v1762_v50 }
  0xc6   :  { %v104_v51 = vpop.xlane.xlu0 %103  ;;  %v1463_v30 = vpop.eup %1462  ;;  %v336_v31 = vmul.f32 %v1461_v27, %v276_v26  ;;  %v1766_v58 = vmul.f32 0.0625, %v106_v11 }
  0xc7   :  { %1343 = vst [vmem:[#allocation3 + $0x10] sm:$0xff] %v1246_v29   ;;  %v335_v12 = vmul.f32 %v1463_v30, %v275_v28  ;;  %v1772_v6 = vmul.f32 0.0625, %v104_v51 }
  0xc8   :  { %v234_v13 = vmul.f32 %v1766_v58, %v1766_v58 }
  0xc9   :  { %v1465_v32 = vpop.eup %1464  ;;  %v1266_v36 = vpack.c.bf16 %v336_v31, %v335_v12  ;;  %v122_v63 = vpop.xlane.xlu1 %121  ;;  %v233_v20 = vmul.f32 %v1772_v6, %v1772_v6 }
  0xca   :  { %v120_v39 = vpop.xlane.xlu0 %119  ;;  %v1467_v15 = vpop.eup %1466  ;;  %v330_v3 = vmul.f32 %v1465_v32, %v270_v56  ;;  %v202_v24 = vmul.f32 0.0625, %v122_v63 }
  0xcb   :  { %1347 = vst [vmem:[#allocation3 + $0x30] sm:$0xff] %v1266_v36   ;;  %v329_v43 = vmul.f32 %v1467_v15, %v269_v33  ;;  %v1778_v25 = vmul.f32 0.0625, %v120_v39 }
  0xcc   :  { %v242_v56 = vmul.f32 %v202_v24, %v202_v24 }
  0xcd   :  { %v1469_v0 = vpop.eup %1468  ;;  %v1251_v47 = vpack.c.bf16 %v330_v3, %v329_v43  ;;  %v162_v54 = vpop.xlane.xlu1 %161  ;;  %v241_v32 = vmul.f32 %v1778_v25, %v1778_v25 }
  0xce   :  { %v160_v55 = vpop.xlane.xlu0 %159  ;;  %v1471_v57 = vpop.eup %1470  ;;  %v338_v52 = vmul.f32 %v1469_v0, %v278_v44  ;;  %v212_v21 = vmul.f32 0.0625, %v162_v54  ;;  %v1440_v35 = vld [vmem:[#allocation3 + $0x10] sm:$0xff]  }
  0xcf   :  { %v211_v34 = vmul.f32 0.0625, %v160_v55  ;;  %1344 = vst [vmem:[#allocation3 + $0x18] sm:$0xff] %v1251_v47   ;;  %v337_v22 = vmul.f32 %v1471_v57, %v277_v17  ;;  %1398 = vmatprep.mubr.bf16.mxu0 %v1440_v35  ;;  %v271_v55 = vsub.f32 %v1649_v38, %v1752_v40  ;;  %v273_v40 = vsub.f32 %v1673_v46, %v1772_v6 }
  0xd0   :  { %v252_v59 = vsub.f32 %v212_v21, %v232_v18  ;;  %v272_v18 = vsub.f32 %v1647_v37, %v1750_v14  ;;  %v280_v21 = vsub.f32 %v1659_v41, %v1760_v23  ;;  %v274_v14 = vsub.f32 %v1671_v45, %v1766_v58 }
  0xd1   :  { %v251_v60 = vsub.f32 %v211_v34, %v231_v53  ;;  %v1271_v61 = vpack.c.bf16 %v338_v52, %v337_v22  ;;  %v178_v7 = vpop.xlane.xlu1 %177  ;;  %v279_v22 = vsub.f32 %v1661_v42, %v1762_v50  ;;  %v282_v23 = vsub.f32 %v1680_v48, %v202_v24  ;;  %v1800_v48 = vld [vmem:[%s1959_s2] ss:$0 sm:$0xff] }
  0xd2   :  { %v176_v8 = vpop.xlane.xlu0 %175  ;;  %v292_v9 = vadd.f32 1e-06, %v252_v59  ;;  %v220_v2 = vmul.f32 0.0625, %v178_v7  ;;  %v1441_v1 = vld [vmem:[#allocation3 + $0x30] sm:$0xff]   ;;  %v281_v50 = vsub.f32 %v1682_v49, %v1778_v25 }
  0xd3   :  { %v291_v10 = vadd.f32 1e-06, %v251_v60  ;;  %v219_v4 = vmul.f32 0.0625, %v176_v8  ;;  %1348 = vst [vmem:[#allocation3 + $0x38] sm:$0xff] %v1271_v61   ;;  %1406 = vmatprep.mubr.bf16.mxu1 %v1441_v1 }
  0xd4   :  { %1472 = vrsqrt.f32 %v292_v9  ;;  %v260_v16 = vsub.f32 %v220_v2, %v240_v5 }
  0xd5   :  { %v259_v19 = vsub.f32 %v219_v4, %v239_v62  ;;  %1474 = vrsqrt.f32 %v291_v10  ;;  %v166_v26 = vpop.xlane.xlu1 %165 }
  0xd6   :  { %v164_v27 = vpop.xlane.xlu0 %163  ;;  %v300_v28 = vadd.f32 1e-06, %v260_v16  ;;  %v214_v11 = vmul.f32 0.0625, %v166_v26  ;;  %v1442_v30 = vld [vmem:[#allocation3 + $0x18] sm:$0xff]  }
  0xd7   :  { %v299_v29 = vadd.f32 1e-06, %v259_v19  ;;  %v213_v51 = vmul.f32 0.0625, %v164_v27  ;;  %1399 = vmatmul.mubr.bf16.gmra.mxu0 %v1442_v30 }
  0xd8   :  { %1476 = vrsqrt.f32 %v300_v28  ;;  %v254_v31 = vsub.f32 %v214_v11, %v234_v13 }
  0xd9   :  { %v253_v12 = vsub.f32 %v213_v51, %v233_v20  ;;  %1478 = vrsqrt.f32 %v299_v29  ;;  %v182_v33 = vpop.xlane.xlu1 %181 }
  0xda   :  { %v180_v36 = vpop.xlane.xlu0 %179  ;;  %v294_v63 = vadd.f32 1e-06, %v254_v31  ;;  %v222_v15 = vmul.f32 0.0625, %v182_v33  ;;  %v1443_v43 = vld [vmem:[#allocation3 + $0x38] sm:$0xff]  }
  0xdb   :  { %v293_v39 = vadd.f32 1e-06, %v253_v12  ;;  %v221_v3 = vmul.f32 0.0625, %v180_v36  ;;  %1407 = vmatmul.mubr.bf16.vlgmr.msra.gmra.mxu1 %v1443_v43 }
  0xdc   :  { %1480 = vrsqrt.f32 %v294_v63  ;;  %v262_v44 = vsub.f32 %v222_v15, %v242_v56 }
  0xdd   :  { %v261_v17 = vsub.f32 %v221_v3, %v241_v32  ;;  %1482 = vrsqrt.f32 %v293_v39 }
  0xde   :  { %v302_v0 = vadd.f32 1e-06, %v262_v44 }
  0xdf   :  { %v301_v47 = vadd.f32 1e-06, %v261_v17 }
  0xe0   :  { %1484 = vrsqrt.f32 %v302_v0 }
  0xe1   :  { %v1473_v54 = vpop.eup %1472  ;;  %1486 = vrsqrt.f32 %v301_v47 }
  0xe2   :  { %v1475_v57 = vpop.eup %1474  ;;  %v332_v52 = vmul.f32 %v1473_v54, %v272_v18 }
  0xe3   :  { %v331_v53 = vmul.f32 %v1475_v57, %v271_v55 }
  0xe5   :  { %v1477_v34 = vpop.eup %1476  ;;  %v1256_v35 = vpack.c.bf16 %v332_v52, %v331_v53 }
  0xe6   :  { %v1479_v59 = vpop.eup %1478  ;;  %v340_v60 = vmul.f32 %v1477_v34, %v280_v21 }
  0xe7   :  { %1345 = vst [vmem:[#allocation3 + $0x20] sm:$0xff] %v1256_v35   ;;  %v339_v37 = vmul.f32 %v1479_v59, %v279_v22 }
  0xe9   :  { %v1481_v38 = vpop.eup %1480  ;;  %v1276_v61 = vpack.c.bf16 %v340_v60, %v339_v37 }
  0xea   :  { %v1483_v5 = vpop.eup %1482  ;;  %v334_v62 = vmul.f32 %v1481_v38, %v274_v14 }
  0xeb   :  { %1349 = vst [vmem:[#allocation3 + $0x40] sm:$0xff] %v1276_v61   ;;  %v333_v41 = vmul.f32 %v1483_v5, %v273_v40 }
  0xed   :  { %v1485_v42 = vpop.eup %1484  ;;  %v1261_v7 = vpack.c.bf16 %v334_v62, %v333_v41 }
  0xee   :  { %v1487_v8 = vpop.eup %1486  ;;  %v342_v9 = vmul.f32 %v1485_v42, %v282_v23  ;;  %v1444_v10 = vld [vmem:[#allocation3 + $0x20] sm:$0xff]  }
  0xef   :  { %1346 = vst [vmem:[#allocation3 + $0x28] sm:$0xff] %v1261_v7   ;;  %v341_v45 = vmul.f32 %v1487_v8, %v281_v50  ;;  %1402 = vmatprep.mubr.bf16.mxu0 %v1444_v10 }
  0xf1   :  { %v1281_v58 = vpack.c.bf16 %v342_v9, %v341_v45 }
  0xf2   :  { %v1445_v46 = vld [vmem:[#allocation3 + $0x40] sm:$0xff]  }
  0xf3   :  { %1350 = vst [vmem:[#allocation3 + $0x48] sm:$0xff] %v1281_v58   ;;  %1410 = vmatprep.mubr.bf16.mxu1 %v1445_v46 }
  0xf6   :  { %v1446_v6 = vld [vmem:[#allocation3 + $0x28] sm:$0xff]  }
  0xf7   :  { %1403 = vmatmul.mubr.bf16.gmra.mxu0 %v1446_v6 }
  0xfa   :  { %v1447_v2 = vld [vmem:[#allocation3 + $0x48] sm:$0xff]  }
  0xfb   :  { %1411 = vmatmul.mubr.bf16.gmra.mxu1 %v1447_v2 }
 0x17b   :  { %v1396_v49 = vpop.f32.mrf.mxu0 }
 0x17c   :  { %v792_v4 = vadd.f32 %v1396_v49, %v1800_v48 }
 0x17d   :  { %v641_v1 = vpop.f32.mrf.mxu0 }
 0x17e   :  { %v812_v13 = vmul.f32 %v792_v4, %v792_v4  ;;  %v790_v16 = vadd.f32 %v1800_v48, %v641_v1 }
 0x17f   :  { %v1397_v19 = vpop.f32.mrf.mxu0 }
 0x180   :  { %v832_v20 = vmul.f32 %v812_v13, %v792_v4  ;;  %v810_v24 = vmul.f32 %v790_v16, %v790_v16  ;;  %v793_v25 = vadd.f32 %v1397_v19, %v1800_v48 }
 0x181   :  { %v644_v26 = vpop.f32.mrf.mxu0 }
 0x182   :  { %v852_v27 = vmul.f32 0.044715, %v832_v20  ;;  %v830_v28 = vmul.f32 %v810_v24, %v790_v16  ;;  %v813_v29 = vmul.f32 %v793_v25, %v793_v25  ;;  %v791_v11 = vadd.f32 %v1800_v48, %v644_v26 }
 0x184   :  { %v872_v51 = vadd.f32 %v852_v27, %v792_v4  ;;  %v850_v30 = vmul.f32 0.044715, %v830_v28  ;;  %v833_v31 = vmul.f32 %v813_v29, %v793_v25  ;;  %v811_v12 = vmul.f32 %v791_v11, %v791_v11 }
 0x186   :  { %v892_v56 = vmul.f32 0.7978846, %v872_v51  ;;  %v870_v32 = vadd.f32 %v850_v30, %v790_v16  ;;  %v853_v33 = vmul.f32 0.044715, %v833_v31  ;;  %v831_v36 = vmul.f32 %v811_v12, %v791_v11 }
 0x188   :  { %1488 = vtanh.f32 %v892_v56  ;;  %v890_v63 = vmul.f32 0.7978846, %v870_v32  ;;  %v873_v39 = vadd.f32 %v853_v33, %v793_v25  ;;  %v851_v15 = vmul.f32 0.044715, %v831_v36 }
 0x18a   :  { %1490 = vtanh.f32 %v890_v63  ;;  %v893_v3 = vmul.f32 0.7978846, %v873_v39  ;;  %v871_v43 = vadd.f32 %v851_v15, %v791_v11 }
 0x18c   :  { %1492 = vtanh.f32 %v893_v3  ;;  %v891_v44 = vmul.f32 0.7978846, %v871_v43 }
 0x18e   :  { %1494 = vtanh.f32 %v891_v44 }
 0x195   :  { %v1489_v17 = vpop.eup %1488 }
 0x196   :  { %v932_v0 = vadd.f32 1.0, %v1489_v17 }
 0x197   :  { %v1491_v47 = vpop.eup %1490  ;;  %v1400_v18 = vpop.f32.mrf.mxu0 }
 0x198   :  { %v952_v54 = vmul.f32 0.5, %v932_v0  ;;  %v930_v55 = vadd.f32 1.0, %v1491_v47  ;;  %v1807_v57 = vadd.f32 %v1400_v18, %v1800_v48 }
 0x199   :  { %v1493_v52 = vpop.eup %1492  ;;  %v657_v53 = vpop.f32.mrf.mxu0 }
 0x19a   :  { %v950_v21 = vmul.f32 0.5, %v930_v55  ;;  %v933_v34 = vadd.f32 1.0, %v1493_v52  ;;  %v816_v22 = vmul.f32 %v1807_v57, %v1807_v57  ;;  %v1812_v59 = vadd.f32 %v1800_v48, %v657_v53 }
 0x19b   :  { %v1495_v35 = vpop.eup %1494  ;;  %v1401_v60 = vpop.f32.mrf.mxu0  ;;  %v972_v14 = vmul.f32 %v952_v54, %v792_v4 }
 0x19c   :  { %v1408_v37 = vpop.f32.mrf.mxu1  ;;  %v953_v38 = vmul.f32 0.5, %v933_v34  ;;  %v931_v40 = vadd.f32 1.0, %v1495_v35  ;;  %v836_v61 = vmul.f32 %v816_v22, %v1807_v57  ;;  %v970_v5 = vmul.f32 %v950_v21, %v790_v16 }
 0x19d   :  { %v814_v62 = vmul.f32 %v1812_v59, %v1812_v59  ;;  %v1818_v41 = vadd.f32 %v1401_v60, %v1800_v48  ;;  %v1821_v23 = vadd.f32 %v1408_v37, %v1800_v48  ;;  %v660_v42 = vpop.f32.mrf.mxu0 }
 0x19e   :  { %v689_v50 = vpop.f32.mrf.mxu1  ;;  %v973_v7 = vmul.f32 %v953_v38, %v793_v25  ;;  %v951_v8 = vmul.f32 0.5, %v931_v40  ;;  %v856_v9 = vmul.f32 0.044715, %v836_v61  ;;  %v1824_v10 = vadd.f32 %v1800_v48, %v660_v42 }
 0x19f   :  { %v834_v45 = vmul.f32 %v814_v62, %v1812_v59  ;;  %v817_v58 = vmul.f32 %v1818_v41, %v1818_v41  ;;  %v824_v46 = vmul.f32 %v1821_v23, %v1821_v23  ;;  %v1832_v6 = vadd.f32 %v1800_v48, %v689_v50 }
 0x1a0   :  { %v1409_v2 = vpop.f32.mrf.mxu1  ;;  %v1291_v49 = vpack.c.bf16 %v973_v7, %v972_v14  ;;  %v971_v4 = vmul.f32 %v951_v8, %v791_v11  ;;  %v876_v1 = vadd.f32 %v856_v9, %v1807_v57  ;;  %v815_v13 = vmul.f32 %v1824_v10, %v1824_v10 }
 0x1a1   :  { %v854_v16 = vmul.f32 0.044715, %v834_v45  ;;  %v837_v19 = vmul.f32 %v817_v58, %v1818_v41  ;;  %v844_v20 = vmul.f32 %v824_v46, %v1821_v23  ;;  %v822_v24 = vmul.f32 %v1832_v6, %v1832_v6 }
 0x1a2   :  { %v692_v25 = vpop.f32.mrf.mxu1  ;;  %1351 = vst [vmem:[%s1960_s3 + $0x8] sm:$0xff] %v1291_v49   ;;  %v1286_v26 = vpack.c.bf16 %v971_v4, %v970_v5  ;;  %v896_v27 = vmul.f32 0.7978846, %v876_v1  ;;  %v835_v28 = vmul.f32 %v815_v13, %v1824_v10  ;;  %v1846_v29 = vadd.f32 %v1409_v2, %v1800_v48 }
 0x1a3   :  { %v874_v11 = vadd.f32 %v854_v16, %v1812_v59  ;;  %v857_v51 = vmul.f32 0.044715, %v837_v19  ;;  %v864_v30 = vmul.f32 0.044715, %v844_v20  ;;  %v842_v31 = vmul.f32 %v822_v24, %v1832_v6 }
 0x1a4   :  { %1287 = vst [vmem:[%s1960_s3] sm:$0xff] %v1286_v26   ;;  %1496 = vtanh.f32 %v896_v27  ;;  %v855_v12 = vmul.f32 0.044715, %v835_v28  ;;  %v825_v56 = vmul.f32 %v1846_v29, %v1846_v29  ;;  %v1856_v32 = vadd.f32 %v1800_v48, %v692_v25 }
 0x1a5   :  { %v894_v33 = vmul.f32 0.7978846, %v874_v11  ;;  %v877_v36 = vadd.f32 %v857_v51, %v1818_v41  ;;  %v884_v63 = vadd.f32 %v864_v30, %v1821_v23  ;;  %v862_v39 = vmul.f32 0.044715, %v842_v31 }
 0x1a6   :  { %v875_v15 = vadd.f32 %v855_v12, %v1824_v10  ;;  %v845_v3 = vmul.f32 %v825_v56, %v1846_v29  ;;  %v823_v43 = vmul.f32 %v1856_v32, %v1856_v32 }
 0x1a7   :  { %1498 = vtanh.f32 %v894_v33  ;;  %v897_v44 = vmul.f32 0.7978846, %v877_v36  ;;  %v904_v17 = vmul.f32 0.7978846, %v884_v63  ;;  %v882_v0 = vadd.f32 %v862_v39, %v1832_v6 }
 0x1a8   :  { %v895_v47 = vmul.f32 0.7978846, %v875_v15  ;;  %v865_v18 = vmul.f32 0.044715, %v845_v3  ;;  %v843_v54 = vmul.f32 %v823_v43, %v1856_v32 }
 0x1a9   :  { %1500 = vtanh.f32 %v897_v44  ;;  %v902_v55 = vmul.f32 0.7978846, %v882_v0 }
 0x1aa   :  { %1502 = vtanh.f32 %v904_v17  ;;  %v885_v52 = vadd.f32 %v865_v18, %v1846_v29  ;;  %v863_v53 = vmul.f32 0.044715, %v843_v54 }
 0x1ab   :  { %1504 = vtanh.f32 %v895_v47 }
 0x1ac   :  { %1506 = vtanh.f32 %v902_v55  ;;  %v905_v21 = vmul.f32 0.7978846, %v885_v52  ;;  %v883_v34 = vadd.f32 %v863_v53, %v1856_v32 }
 0x1ae   :  { %1508 = vtanh.f32 %v905_v21  ;;  %v903_v22 = vmul.f32 0.7978846, %v883_v34 }
 0x1b0   :  { %1510 = vtanh.f32 %v903_v22 }
 0x1b1   :  { %v1497_v35 = vpop.eup %1496 }
 0x1b2   :  { %v936_v60 = vadd.f32 1.0, %v1497_v35 }
 0x1b4   :  { %v1499_v37 = vpop.eup %1498  ;;  %v956_v14 = vmul.f32 0.5, %v936_v60 }
 0x1b5   :  { %v934_v38 = vadd.f32 1.0, %v1499_v37 }
 0x1b6   :  { %v1501_v40 = vpop.eup %1500  ;;  %v976_v58 = vmul.f32 %v956_v14, %v1807_v57 }
 0x1b7   :  { %v1404_v61 = vpop.f32.mrf.mxu0  ;;  %v1503_v5 = vpop.eup %1502  ;;  %v954_v62 = vmul.f32 0.5, %v934_v38  ;;  %v937_v42 = vadd.f32 1.0, %v1501_v40 }
 0x1b8   :  { %v1869_v50 = vadd.f32 %v1404_v61, %v1800_v48  ;;  %v1505_v7 = vpop.eup %1504  ;;  %v944_v8 = vadd.f32 1.0, %v1503_v5 }
 0x1b9   :  { %v673_v9 = vpop.f32.mrf.mxu0  ;;  %v1507_v45 = vpop.eup %1506  ;;  %v957_v46 = vmul.f32 0.5, %v937_v42  ;;  %v935_v2 = vadd.f32 1.0, %v1505_v7  ;;  %v974_v4 = vmul.f32 %v954_v62, %v1812_v59 }
 0x1ba   :  { %v820_v49 = vmul.f32 %v1869_v50, %v1869_v50  ;;  %v964_v1 = vmul.f32 0.5, %v944_v8  ;;  %v942_v13 = vadd.f32 1.0, %v1507_v45  ;;  %v1876_v16 = vadd.f32 %v1800_v48, %v673_v9 }
 0x1bb   :  { %v1405_v19 = vpop.f32.mrf.mxu0  ;;  %v1412_v20 = vpop.f32.mrf.mxu1  ;;  %v977_v25 = vmul.f32 %v957_v46, %v1818_v41  ;;  %v955_v26 = vmul.f32 0.5, %v935_v2 }
 0x1bc   :  { %v1509_v24 = vpop.eup %1508  ;;  %v840_v57 = vmul.f32 %v820_v49, %v1869_v50  ;;  %v1881_v27 = vadd.f32 %v1405_v19, %v1800_v48  ;;  %v984_v28 = vmul.f32 %v964_v1, %v1821_v23  ;;  %v962_v11 = vmul.f32 0.5, %v942_v13 }
 0x1bd   :  { %v945_v59 = vadd.f32 1.0, %v1509_v24  ;;  %v818_v51 = vmul.f32 %v1876_v16, %v1876_v16  ;;  %v705_v30 = vpop.f32.mrf.mxu1  ;;  %v1511_v31 = vpop.eup %1510  ;;  %v1301_v12 = vpack.c.bf16 %v977_v25, %v976_v58  ;;  %v975_v56 = vmul.f32 %v955_v26, %v1824_v10 }
 0x1be   :  { %v860_v33 = vmul.f32 0.044715, %v840_v57  ;;  %v821_v41 = vmul.f32 %v1881_v27, %v1881_v27  ;;  %v676_v36 = vpop.f32.mrf.mxu0  ;;  %v982_v63 = vmul.f32 %v962_v11, %v1832_v6  ;;  %v943_v15 = vadd.f32 1.0, %v1511_v31 }
 0x1bf   :  { %v965_v39 = vmul.f32 0.5, %v945_v59  ;;  %v838_v23 = vmul.f32 %v818_v51, %v1876_v16  ;;  %v1413_v3 = vpop.f32.mrf.mxu1  ;;  %1353 = vst [vmem:[%s1960_s3 + $0x18] sm:$0xff] %v1301_v12   ;;  %v1296_v43 = vpack.c.bf16 %v975_v56, %v974_v4  ;;  %v1897_v17 = vadd.f32 %v1412_v20, %v1800_v48 }
 0x1c0   :  { %v880_v44 = vadd.f32 %v860_v33, %v1869_v50  ;;  %v841_v10 = vmul.f32 %v821_v41, %v1881_v27  ;;  %v963_v6 = vmul.f32 0.5, %v943_v15  ;;  %v1901_v18 = vadd.f32 %v1800_v48, %v676_v36 }
 0x1c1   :  { %v985_v0 = vmul.f32 %v965_v39, %v1846_v29  ;;  %v858_v47 = vmul.f32 0.044715, %v838_v23  ;;  %1352 = vst [vmem:[%s1960_s3 + $0x10] sm:$0xff] %v1296_v43   ;;  %v828_v52 = vmul.f32 %v1897_v17, %v1897_v17  ;;  %v1909_v53 = vadd.f32 %v1800_v48, %v705_v30  ;;  %v708_v35 = vpop.f32.mrf.mxu1 }
 0x1c2   :  { %v900_v54 = vmul.f32 0.7978846, %v880_v44  ;;  %v861_v55 = vmul.f32 0.044715, %v841_v10  ;;  %v983_v29 = vmul.f32 %v963_v6, %v1856_v32  ;;  %v819_v22 = vmul.f32 %v1901_v18, %v1901_v18 }
 0x1c3   :  { %v1321_v21 = vpack.c.bf16 %v985_v0, %v984_v28  ;;  %v878_v34 = vadd.f32 %v858_v47, %v1876_v16  ;;  %v848_v37 = vmul.f32 %v828_v52, %v1897_v17  ;;  %v826_v14 = vmul.f32 %v1909_v53, %v1909_v53 }
 0x1c4   :  { %1512 = vtanh.f32 %v900_v54  ;;  %v881_v60 = vadd.f32 %v861_v55, %v1881_v27  ;;  %v1316_v38 = vpack.c.bf16 %v983_v29, %v982_v63  ;;  %v839_v40 = vmul.f32 %v819_v22, %v1901_v18 }
 0x1c5   :  { %1357 = vst [vmem:[%s1960_s3 + $0x38] sm:$0xff] %v1321_v21   ;;  %v898_v32 = vmul.f32 0.7978846, %v878_v34  ;;  %v1924_v61 = vadd.f32 %v1413_v3, %v1800_v48  ;;  %v868_v62 = vmul.f32 0.044715, %v848_v37  ;;  %v846_v42 = vmul.f32 %v826_v14, %v1909_v53 }
 0x1c6   :  { %v901_v5 = vmul.f32 0.7978846, %v881_v60  ;;  %v807_v7 = vadd.f32 %v1800_v48, %v708_v35  ;;  %1356 = vst [vmem:[%s1960_s3 + $0x30] sm:$0xff] %v1316_v38   ;;  %v859_v8 = vmul.f32 0.044715, %v839_v40 }
 0x1c7   :  { %1514 = vtanh.f32 %v898_v32  ;;  %v829_v9 = vmul.f32 %v1924_v61, %v1924_v61  ;;  %v888_v45 = vadd.f32 %v868_v62, %v1897_v17  ;;  %v866_v58 = vmul.f32 0.044715, %v846_v42 }
 0x1c8   :  { %1516 = vtanh.f32 %v901_v5  ;;  %v827_v46 = vmul.f32 %v807_v7, %v807_v7  ;;  %v879_v2 = vadd.f32 %v859_v8, %v1901_v18 }
 0x1c9   :  { %v849_v49 = vmul.f32 %v829_v9, %v1924_v61  ;;  %v908_v4 = vmul.f32 0.7978846, %v888_v45  ;;  %v886_v48 = vadd.f32 %v866_v58, %v1909_v53 }
 0x1ca   :  { %v847_v1 = vmul.f32 %v827_v46, %v807_v7  ;;  %v899_v13 = vmul.f32 0.7978846, %v879_v2 }
 0x1cb   :  { %v869_v19 = vmul.f32 0.044715, %v849_v49  ;;  %1518 = vtanh.f32 %v908_v4  ;;  %v906_v20 = vmul.f32 0.7978846, %v886_v48 }
 0x1cc   :  { %v867_v24 = vmul.f32 0.044715, %v847_v1  ;;  %1520 = vtanh.f32 %v899_v13 }
 0x1cd   :  { %v889_v25 = vadd.f32 %v869_v19, %v1924_v61  ;;  %1522 = vtanh.f32 %v906_v20 }
 0x1ce   :  { %v887_v26 = vadd.f32 %v867_v24, %v807_v7 }
 0x1cf   :  { %v909_v57 = vmul.f32 0.7978846, %v889_v25 }
 0x1d0   :  { %v907_v28 = vmul.f32 0.7978846, %v887_v26 }
 0x1d1   :  { %v1513_v11 = vpop.eup %1512  ;;  %1524 = vtanh.f32 %v909_v57 }
 0x1d2   :  { %v940_v59 = vadd.f32 1.0, %v1513_v11  ;;  %1526 = vtanh.f32 %v907_v28 }
 0x1d4   :  { %v1515_v51 = vpop.eup %1514  ;;  %v960_v31 = vmul.f32 0.5, %v940_v59 }
 0x1d5   :  { %v1517_v30 = vpop.eup %1516  ;;  %v938_v56 = vadd.f32 1.0, %v1515_v51 }
 0x1d6   :  { %v941_v12 = vadd.f32 1.0, %v1517_v30  ;;  %v980_v63 = vmul.f32 %v960_v31, %v1869_v50 }
 0x1d7   :  { %v958_v23 = vmul.f32 0.5, %v938_v56 }
 0x1d8   :  { %v961_v33 = vmul.f32 0.5, %v941_v12  ;;  %v1519_v41 = vpop.eup %1518 }
 0x1d9   :  { %v1521_v36 = vpop.eup %1520  ;;  %v948_v3 = vadd.f32 1.0, %v1519_v41  ;;  %v978_v54 = vmul.f32 %v958_v23, %v1876_v16 }
 0x1da   :  { %v981_v39 = vmul.f32 %v961_v33, %v1881_v27  ;;  %v1523_v15 = vpop.eup %1522  ;;  %v939_v43 = vadd.f32 1.0, %v1521_v36 }
 0x1db   :  { %v946_v10 = vadd.f32 1.0, %v1523_v15  ;;  %v968_v55 = vmul.f32 0.5, %v948_v3 }
 0x1dc   :  { %v1311_v44 = vpack.c.bf16 %v981_v39, %v980_v63  ;;  %v959_v0 = vmul.f32 0.5, %v939_v43 }
 0x1dd   :  { %v966_v27 = vmul.f32 0.5, %v946_v10  ;;  %v988_v35 = vmul.f32 %v968_v55, %v1897_v17 }
 0x1de   :  { %v1525_v6 = vpop.eup %1524  ;;  %1355 = vst [vmem:[%s1960_s3 + $0x28] sm:$0xff] %v1311_v44   ;;  %v979_v50 = vmul.f32 %v959_v0, %v1901_v18 }
 0x1df   :  { %v1527_v47 = vpop.eup %1526  ;;  %v949_v52 = vadd.f32 1.0, %v1525_v6  ;;  %v986_v37 = vmul.f32 %v966_v27, %v1909_v53 }
 0x1e0   :  { %v947_v21 = vadd.f32 1.0, %v1527_v47  ;;  %v1306_v29 = vpack.c.bf16 %v979_v50, %v978_v54 }
 0x1e1   :  { %v969_v34 = vmul.f32 0.5, %v949_v52 }
 0x1e2   :  { %v967_v22 = vmul.f32 0.5, %v947_v21  ;;  %1354 = vst [vmem:[%s1960_s3 + $0x20] sm:$0xff] %v1306_v29  }
 0x1e3   :  { %v989_v60 = vmul.f32 %v969_v34, %v1924_v61 }
 0x1e4   :  { %v987_v16 = vmul.f32 %v967_v22, %v807_v7 }
 0x1e5   :  { %v1331_v14 = vpack.c.bf16 %v989_v60, %v988_v35 }
 0x1e6   :  { %v1326_v38 = vpack.c.bf16 %v987_v16, %v986_v37 }
 0x1e7   :  { %1359 = vst [vmem:[%s1960_s3 + $0x48] sm:$0xff] %v1331_v14  }
 0x1e8   :  { %1358 = vst [vmem:[%s1960_s3 + $0x40] sm:$0xff] %v1326_v38  }

// kernel: _lambda_.28
= control target key start
LH: loop header
LB: loop body
LE: loop exit
PB: predicated region body
PF: predicated region fallthrough
CT: control target
= control target key end

     0   :  { %s865_s1 = inlined_call_operand.vmem [shape: bf16[128,128], index: 1, kind: input, shape index: {}]   ;;  %s866_s0 = inlined_call_operand.vmem [shape: bf16[160,128], index: 0, kind: input, shape index: {}]   ;;  %s867_s2 = inlined_call_operand.vmem [shape: f32[1,128], index: 2, kind: input, shape index: {}]   ;;  %s868_s3 = inlined_call_operand.vmem [shape: bf16[160,128], index: 3, kind: output, shape index: {}]  }
   0x1   :  { %v718_v0 = vld [vmem:[%s865_s1 + $0x38] sm:$0xff]   ;;  %v719_v1 = vld [vmem:[%s865_s1 + $0x30] sm:$0xff]   ;;  %v720_v2 = vld [vmem:[%s865_s1 + $0x28] sm:$0xff]  }
   0x2   :  { %666 = vmatprep.subr.bf16.mxu0 %v718_v0  ;;  %702 = vmatprep.subr.bf16.mxu1 %v718_v0  ;;  %v721_v3 = vld [vmem:[%s865_s1 + $0x20] sm:$0xff]   ;;  %v728_v5 = vld [vmem:[%s866_s0 + $0x30] sm:$0xff]   ;;  %v722_v6 = vld [vmem:[%s865_s1 + $0x18] sm:$0xff]  }
   0x3   :  { %667 = vmatpush3.bf16.msra.mxu0 %v718_v0  ;;  %710 = vmatpush3.bf16.msra.mxu1 %v718_v0  ;;  %v726_v4 = vld [vmem:[%s866_s0] sm:$0xff]   ;;  %v723_v7 = vld [vmem:[%s865_s1 + $0x10] sm:$0xff]   ;;  %v724_v8 = vld [vmem:[%s865_s1 + $0x8] sm:$0xff]  }
   0x4   :  { %668 = vmatprep.subr.bf16.mxu0 %v719_v1  ;;  %703 = vmatprep.subr.bf16.mxu1 %v719_v1  ;;  %v725_v9 = vld [vmem:[%s865_s1] sm:$0xff]   ;;  %v727_v10 = vld [vmem:[%s866_s0 + $0x8] sm:$0xff]   ;;  %v729_v11 = vld [vmem:[%s866_s0 + $0x38] sm:$0xff]  }
   0x5   :  { %682 = vmatprep.mubr.bf16.mxu0 %v726_v4  ;;  %694 = vmatprep.mubr.bf16.mxu1 %v728_v5  ;;  %v730_v12 = vld [vmem:[%s866_s0 + $0x10] sm:$0xff]   ;;  %v732_v13 = vld [vmem:[%s866_s0 + $0x40] sm:$0xff]   ;;  %v731_v14 = vld [vmem:[%s866_s0 + $0x18] sm:$0xff]  }
   0x6   :  { %v733_v15 = vld [vmem:[%s866_s0 + $0x48] sm:$0xff]   ;;  %v734_v16 = vld [vmem:[%s866_s0 + $0x20] sm:$0xff]  }
   0x7   :  { %669 = vmatpush3.bf16.msra.mxu0 %v719_v1  ;;  %711 = vmatpush3.bf16.msra.mxu1 %v719_v1  ;;  %v735_v17 = vld [vmem:[%s866_s0 + $0x28] sm:$0xff]   ;;  %v813_v18 = vld [vmem:[%s867_s2] ss:$0 sm:$0xff] }
   0x8   :  { %670 = vmatprep.subr.bf16.mxu0 %v720_v2  ;;  %704 = vmatprep.subr.bf16.mxu1 %v720_v2 }
   0xb   :  { %671 = vmatpush3.bf16.msra.mxu0 %v720_v2  ;;  %712 = vmatpush3.bf16.msra.mxu1 %v720_v2 }
   0xc   :  { %672 = vmatprep.subr.bf16.mxu0 %v721_v3  ;;  %705 = vmatprep.subr.bf16.mxu1 %v721_v3 }
   0xf   :  { %673 = vmatpush3.bf16.msra.mxu0 %v721_v3  ;;  %713 = vmatpush3.bf16.msra.mxu1 %v721_v3 }
  0x10   :  { %674 = vmatprep.subr.bf16.mxu0 %v722_v6  ;;  %706 = vmatprep.subr.bf16.mxu1 %v722_v6 }
  0x13   :  { %675 = vmatpush3.bf16.msra.mxu0 %v722_v6  ;;  %714 = vmatpush3.bf16.msra.mxu1 %v722_v6 }
  0x14   :  { %676 = vmatprep.subr.bf16.mxu0 %v723_v7  ;;  %707 = vmatprep.subr.bf16.mxu1 %v723_v7 }
  0x17   :  { %677 = vmatpush3.bf16.msra.mxu0 %v723_v7  ;;  %715 = vmatpush3.bf16.msra.mxu1 %v723_v7 }
  0x18   :  { %678 = vmatprep.subr.bf16.mxu0 %v724_v8  ;;  %708 = vmatprep.subr.bf16.mxu1 %v724_v8 }
  0x1b   :  { %679 = vmatpush3.bf16.msra.mxu0 %v724_v8  ;;  %716 = vmatpush3.bf16.msra.mxu1 %v724_v8 }
  0x1c   :  { %680 = vmatprep.subr.bf16.mxu0 %v725_v9  ;;  %709 = vmatprep.subr.bf16.mxu1 %v725_v9 }
  0x1f   :  { %681 = vmatpush3.bf16.msra.mxu0 %v725_v9  ;;  %717 = vmatpush3.bf16.msra.mxu1 %v725_v9 }
  0x22   :  { %683 = vmatmul.mubr.bf16.vlgmr.msra.gmra.mxu0 %v727_v10  ;;  %695 = vmatmul.mubr.bf16.vlgmr.msra.gmra.mxu1 %v729_v11 }
  0x23   :  { %686 = vmatprep.mubr.bf16.mxu0 %v730_v12  ;;  %698 = vmatprep.mubr.bf16.mxu1 %v732_v13 }
  0x2a   :  { %687 = vmatmul.mubr.bf16.gmra.mxu0 %v731_v14  ;;  %699 = vmatmul.mubr.bf16.gmra.mxu1 %v733_v15 }
  0x2b   :  { %690 = vmatprep.mubr.bf16.mxu0 %v734_v16 }
  0x32   :  { %691 = vmatmul.mubr.bf16.gmra.mxu0 %v735_v17 }
  0xe2   :  { %v684_v19 = vpop.f32.mrf.mxu0  ;;  %v696_v20 = vpop.f32.mrf.mxu1 }
  0xe3   :  { %v400_v21 = vadd.f32 %v696_v20, %v813_v18  ;;  %v388_v22 = vadd.f32 %v684_v19, %v813_v18 }
  0xe4   :  { %v237_v23 = vpop.f32.mrf.mxu0  ;;  %v285_v24 = vpop.f32.mrf.mxu1 }
  0xe5   :  { %v398_v26 = vadd.f32 %v813_v18, %v285_v24  ;;  %v386_v28 = vadd.f32 %v813_v18, %v237_v23  ;;  %v420_v29 = vmax.f32 %v400_v21, 0.0  ;;  %v408_v32 = vmax.f32 %v388_v22, 0.0 }
  0xe6   :  { %v685_v25 = vpop.f32.mrf.mxu0  ;;  %v697_v27 = vpop.f32.mrf.mxu1 }
  0xe7   :  { %v389_v30 = vadd.f32 %v685_v25, %v813_v18  ;;  %v401_v31 = vadd.f32 %v697_v27, %v813_v18  ;;  %v418_v39 = vmax.f32 %v398_v26, 0.0  ;;  %v406_v42 = vmax.f32 %v386_v28, 0.0 }
  0xe8   :  { %v240_v33 = vpop.f32.mrf.mxu0  ;;  %v288_v34 = vpop.f32.mrf.mxu1 }
  0xe9   :  { %v409_v35 = vmax.f32 %v389_v30, 0.0  ;;  %v387_v36 = vadd.f32 %v813_v18, %v240_v33  ;;  %v421_v37 = vmax.f32 %v401_v31, 0.0  ;;  %v399_v38 = vadd.f32 %v813_v18, %v288_v34 }
  0xea   :  { %v688_v40 = vpop.f32.mrf.mxu0  ;;  %v700_v41 = vpop.f32.mrf.mxu1 }
  0xeb   :  { %v597_v43 = vpack.c.bf16 %v409_v35, %v408_v32  ;;  %v407_v44 = vmax.f32 %v387_v36, 0.0  ;;  %v627_v45 = vpack.c.bf16 %v421_v37, %v420_v29  ;;  %v392_v46 = vadd.f32 %v688_v40, %v813_v18 }
  0xec   :  { %v419_v47 = vmax.f32 %v399_v38, 0.0  ;;  %v253_v48 = vpop.f32.mrf.mxu0  ;;  %v404_v49 = vadd.f32 %v700_v41, %v813_v18  ;;  %v301_v50 = vpop.f32.mrf.mxu1 }
  0xed   :  { %639 = vst [vmem:[%s868_s3 + $0x8] sm:$0xff] %v597_v43   ;;  %v592_v51 = vpack.c.bf16 %v407_v44, %v406_v42  ;;  %645 = vst [vmem:[%s868_s3 + $0x38] sm:$0xff] %v627_v45   ;;  %v402_v54 = vadd.f32 %v813_v18, %v301_v50  ;;  %v390_v56 = vadd.f32 %v813_v18, %v253_v48  ;;  %v412_v60 = vmax.f32 %v392_v46, 0.0 }
  0xee   :  { %v622_v52 = vpack.c.bf16 %v419_v47, %v418_v39  ;;  %v689_v53 = vpop.f32.mrf.mxu0  ;;  %v701_v55 = vpop.f32.mrf.mxu1  ;;  %v424_v57 = vmax.f32 %v404_v49, 0.0 }
  0xef   :  { %593 = vst [vmem:[%s868_s3] sm:$0xff] %v592_v51   ;;  %v393_v58 = vadd.f32 %v689_v53, %v813_v18  ;;  %v405_v59 = vadd.f32 %v701_v55, %v813_v18  ;;  %v422_v3 = vmax.f32 %v402_v54, 0.0  ;;  %v410_v5 = vmax.f32 %v390_v56, 0.0 }
  0xf0   :  { %644 = vst [vmem:[%s868_s3 + $0x30] sm:$0xff] %v622_v52   ;;  %v256_v61 = vpop.f32.mrf.mxu0  ;;  %v304_v62 = vpop.f32.mrf.mxu1 }
  0xf1   :  { %v413_v63 = vmax.f32 %v393_v58, 0.0  ;;  %v391_v0 = vadd.f32 %v813_v18, %v256_v61  ;;  %v425_v1 = vmax.f32 %v405_v59, 0.0  ;;  %v403_v2 = vadd.f32 %v813_v18, %v304_v62 }
  0xf2   :  { %v692_v4 = vpop.f32.mrf.mxu0 }
  0xf3   :  { %v607_v6 = vpack.c.bf16 %v413_v63, %v412_v60  ;;  %v411_v7 = vmax.f32 %v391_v0, 0.0  ;;  %v637_v8 = vpack.c.bf16 %v425_v1, %v424_v57  ;;  %v423_v9 = vmax.f32 %v403_v2, 0.0 }
  0xf4   :  { %v269_v10 = vpop.f32.mrf.mxu0  ;;  %v396_v12 = vadd.f32 %v692_v4, %v813_v18 }
  0xf5   :  { %641 = vst [vmem:[%s868_s3 + $0x18] sm:$0xff] %v607_v6   ;;  %v602_v11 = vpack.c.bf16 %v411_v7, %v410_v5  ;;  %647 = vst [vmem:[%s868_s3 + $0x48] sm:$0xff] %v637_v8   ;;  %v632_v13 = vpack.c.bf16 %v423_v9, %v422_v3  ;;  %v394_v15 = vadd.f32 %v813_v18, %v269_v10 }
  0xf6   :  { %v693_v14 = vpop.f32.mrf.mxu0  ;;  %v416_v19 = vmax.f32 %v396_v12, 0.0 }
  0xf7   :  { %640 = vst [vmem:[%s868_s3 + $0x10] sm:$0xff] %v602_v11   ;;  %v397_v16 = vadd.f32 %v693_v14, %v813_v18  ;;  %646 = vst [vmem:[%s868_s3 + $0x40] sm:$0xff] %v632_v13   ;;  %v414_v22 = vmax.f32 %v394_v15, 0.0 }
  0xf8   :  { %v272_v17 = vpop.f32.mrf.mxu0 }
  0xf9   :  { %v417_v20 = vmax.f32 %v397_v16, 0.0  ;;  %v395_v21 = vadd.f32 %v813_v18, %v272_v17 }
  0xfb   :  { %v617_v23 = vpack.c.bf16 %v417_v20, %v416_v19  ;;  %v415_v24 = vmax.f32 %v395_v21, 0.0 }
  0xfd   :  { %643 = vst [vmem:[%s868_s3 + $0x28] sm:$0xff] %v617_v23   ;;  %v612_v25 = vpack.c.bf16 %v415_v24, %v414_v22 }
  0xff   :  { %642 = vst [vmem:[%s868_s3 + $0x20] sm:$0xff] %v612_v25  }

// kernel: _lambda_.23
= control target key start
LH: loop header
LB: loop body
LE: loop exit
PB: predicated region body
PF: predicated region fallthrough
CT: control target
= control target key end

     0   :  { %vm135_vm0 = vcmask 64512   ;;  %v5264_v0 = vmov 0.0   ;;  %vm5265_vm1 = vmmov 0   ;;  %vm2459_vm2 = vcmask 1043456   ;;  %s6606_s1 = inlined_call_operand.vmem [shape: bf16[40,8,8], index: 1, kind: input, shape index: {}]   ;;  %s6607_s0 = inlined_call_operand.vmem [shape: bf16[40,8,8], index: 0, kind: input, shape index: {}]   ;;  %s6608_s2 = inlined_call_operand.vmem [shape: bf16[40,8,8], index: 2, kind: input, shape index: {}]   ;;  %s6609_s3 = inlined_call_operand.vmem [shape: bf16[40,8,8], index: 3, kind: output, shape index: {}]  }
   0x1   :  { %4622 = vmatprep.subr.bf16.mxu0 %v5264_v0  ;;  %4628 = vmatprep.subr.bf16.mxu1 %v5264_v0  ;;  %v55_v1 = vld [vmem:[%s6606_s1] sm:$0xf]  ;;  %v56_v2 = vld [vmem:[%s6606_s1 + $0x4] sm:$0xf]  ;;  %v57_v5 = vld [vmem:[%s6606_s1 + $0x8] sm:$0xf] }
   0x2   :  { %v140_v3 = vsel %vm135_vm0, %v55_v1, 0  ;;  %v186_v4 = vsel %vm135_vm0, %v56_v2, 0  ;;  %4624 = vmatprep.mubr.msk.bf16.mxu0 %vm5265_vm1, %v5264_v0  ;;  %4630 = vmatprep.mubr.msk.bf16.mxu1 %vm5265_vm1, %v5264_v0  ;;  %v58_v6 = vld [vmem:[%s6606_s1 + $0xc] sm:$0xf]  ;;  %v15_v7 = vld [vmem:[%s6607_s0] sm:$0xf] }
   0x3   :  { %4623 = vmatpush3.bf16.xpose.msra.mxu0 %v140_v3  ;;  %4629 = vmatpush3.bf16.xpose.msra.mxu1 %v186_v4  ;;  %v16_v8 = vld [vmem:[%s6607_s0 + $0x4] sm:$0xf]  ;;  %v232_v9 = vsel %vm135_vm0, %v57_v5, 0  ;;  %v278_v10 = vsel %vm135_vm0, %v58_v6, 0  ;;  %v59_v11 = vld [vmem:[%s6606_s1 + $0x10] sm:$0xf] }
   0x4   :  { %4634 = vmatprep.subr.bf16.mxu0 %v5264_v0  ;;  %4640 = vmatprep.subr.bf16.mxu1 %v5264_v0  ;;  %v60_v12 = vld [vmem:[%s6606_s1 + $0x14] sm:$0xf]  ;;  %v17_v13 = vld [vmem:[%s6607_s0 + $0x8] sm:$0xf]  ;;  %v18_v14 = vld [vmem:[%s6607_s0 + $0xc] sm:$0xf] }
   0x5   :  { %v324_v15 = vsel %vm135_vm0, %v59_v11, 0  ;;  %v370_v16 = vsel %vm135_vm0, %v60_v12, 0  ;;  %v61_v17 = vld [vmem:[%s6606_s1 + $0x18] sm:$0xf]  ;;  %v62_v18 = vld [vmem:[%s6606_s1 + $0x1c] sm:$0xf] }
   0x6   :  { %v19_v19 = vld [vmem:[%s6607_s0 + $0x10] sm:$0xf]  ;;  %v20_v20 = vld [vmem:[%s6607_s0 + $0x14] sm:$0xf]  ;;  %v416_v21 = vsel %vm135_vm0, %v61_v17, 0  ;;  %v462_v22 = vsel %vm135_vm0, %v62_v18, 0 }
   0x7   :  { %v63_v23 = vld [vmem:[%s6606_s1 + $0x20] sm:$0xf]  ;;  %v64_v24 = vld [vmem:[%s6606_s1 + $0x24] sm:$0xf]  ;;  %v21_v25 = vld [vmem:[%s6607_s0 + $0x18] sm:$0xf] }
   0x8   :  { %v22_v26 = vld [vmem:[%s6607_s0 + $0x1c] sm:$0xf]  ;;  %v508_v27 = vsel %vm135_vm0, %v63_v23, 0  ;;  %v554_v28 = vsel %vm135_vm0, %v64_v24, 0  ;;  %v65_v29 = vld [vmem:[%s6606_s1 + $0x28] sm:$0xf] }
   0x9   :  { %v66_v30 = vld [vmem:[%s6606_s1 + $0x2c] sm:$0xf]  ;;  %v23_v31 = vld [vmem:[%s6607_s0 + $0x20] sm:$0xf]  ;;  %v24_v32 = vld [vmem:[%s6607_s0 + $0x24] sm:$0xf] }
   0xa   :  { %4625 = vmatmul.mubr.msk.bf16.vlgmr.msra.gmra.mxu0 %vm135_vm0, %v15_v7  ;;  %4631 = vmatmul.mubr.msk.bf16.vlgmr.msra.gmra.mxu1 %vm135_vm0, %v16_v8  ;;  %v600_v33 = vsel %vm135_vm0, %v65_v29, 0  ;;  %v646_v34 = vsel %vm135_vm0, %v66_v30, 0  ;;  %v67_v35 = vld [vmem:[%s6606_s1 + $0x30] sm:$0xf]  ;;  %v68_v36 = vld [vmem:[%s6606_s1 + $0x34] sm:$0xf] }
   0xb   :  { %4635 = vmatpush3.bf16.xpose.msra.mxu0 %v232_v9  ;;  %4641 = vmatpush3.bf16.xpose.msra.mxu1 %v278_v10  ;;  %v25_v37 = vld [vmem:[%s6607_s0 + $0x28] sm:$0xf]  ;;  %v26_v38 = vld [vmem:[%s6607_s0 + $0x2c] sm:$0xf]  ;;  %v692_v39 = vsel %vm135_vm0, %v67_v35, 0  ;;  %v738_v40 = vsel %vm135_vm0, %v68_v36, 0 }
   0xc   :  { %4636 = vmatprep.mubr.msk.bf16.mxu0 %vm5265_vm1, %v5264_v0  ;;  %4642 = vmatprep.mubr.msk.bf16.mxu1 %vm5265_vm1, %v5264_v0  ;;  %v69_v41 = vld [vmem:[%s6606_s1 + $0x38] sm:$0xf]  ;;  %v70_v42 = vld [vmem:[%s6606_s1 + $0x3c] sm:$0xf]  ;;  %v27_v43 = vld [vmem:[%s6607_s0 + $0x30] sm:$0xf] }
   0xd   :  { %4646 = vmatprep.subr.bf16.mxu0 %v5264_v0  ;;  %4652 = vmatprep.subr.bf16.mxu1 %v5264_v0  ;;  %v28_v44 = vld [vmem:[%s6607_s0 + $0x34] sm:$0xf]  ;;  %v784_v45 = vsel %vm135_vm0, %v69_v41, 0  ;;  %v830_v46 = vsel %vm135_vm0, %v70_v42, 0  ;;  %v71_v47 = vld [vmem:[%s6606_s1 + $0x40] sm:$0xf] }
   0xe   :  { %v72_v48 = vld [vmem:[%s6606_s1 + $0x44] sm:$0xf]  ;;  %v29_v49 = vld [vmem:[%s6607_s0 + $0x38] sm:$0xf]  ;;  %v30_v50 = vld [vmem:[%s6607_s0 + $0x3c] sm:$0xf] }
   0xf   :  { %v876_v51 = vsel %vm135_vm0, %v71_v47, 0  ;;  %v922_v52 = vsel %vm135_vm0, %v72_v48, 0  ;;  %v73_v53 = vld [vmem:[%s6606_s1 + $0x48] sm:$0xf]  ;;  %v74_v54 = vld [vmem:[%s6606_s1 + $0x4c] sm:$0xf] }
  0x10   :  { %v31_v55 = vld [vmem:[%s6607_s0 + $0x40] sm:$0xf]  ;;  %v32_v56 = vld [vmem:[%s6607_s0 + $0x44] sm:$0xf]  ;;  %v968_v57 = vsel %vm135_vm0, %v73_v53, 0  ;;  %v1014_v58 = vsel %vm135_vm0, %v74_v54, 0 }
  0x11   :  { %v75_v59 = vld [vmem:[%s6606_s1 + $0x50] sm:$0xf]  ;;  %v76_v60 = vld [vmem:[%s6606_s1 + $0x54] sm:$0xf]  ;;  %v33_v61 = vld [vmem:[%s6607_s0 + $0x48] sm:$0xf] }
  0x12   :  { %4637 = vmatmul.mubr.msk.bf16.vlgmr.msra.gmra.mxu0 %vm135_vm0, %v17_v13  ;;  %4643 = vmatmul.mubr.msk.bf16.vlgmr.msra.gmra.mxu1 %vm135_vm0, %v18_v14  ;;  %v34_v62 = vld [vmem:[%s6607_s0 + $0x4c] sm:$0xf]  ;;  %v1060_v63 = vsel %vm135_vm0, %v75_v59, 0  ;;  %v1106_v1 = vsel %vm135_vm0, %v76_v60, 0  ;;  %v77_v2 = vld [vmem:[%s6606_s1 + $0x58] sm:$0xf] }
  0x13   :  { %4647 = vmatpush3.bf16.xpose.msra.mxu0 %v324_v15  ;;  %4653 = vmatpush3.bf16.xpose.msra.mxu1 %v370_v16  ;;  %v78_v3 = vld [vmem:[%s6606_s1 + $0x5c] sm:$0xf]  ;;  %v35_v4 = vld [vmem:[%s6607_s0 + $0x50] sm:$0xf]  ;;  %v36_v5 = vld [vmem:[%s6607_s0 + $0x54] sm:$0xf] }
  0x14   :  { %4648 = vmatprep.mubr.msk.bf16.mxu0 %vm5265_vm1, %v5264_v0  ;;  %4654 = vmatprep.mubr.msk.bf16.mxu1 %vm5265_vm1, %v5264_v0  ;;  %v1152_v6 = vsel %vm135_vm0, %v77_v2, 0  ;;  %v1198_v7 = vsel %vm135_vm0, %v78_v3, 0  ;;  %v79_v8 = vld [vmem:[%s6606_s1 + $0x60] sm:$0xf]  ;;  %v80_v9 = vld [vmem:[%s6606_s1 + $0x64] sm:$0xf] }
  0x15   :  { %4658 = vmatprep.subr.bf16.mxu0 %v5264_v0  ;;  %4664 = vmatprep.subr.bf16.mxu1 %v5264_v0  ;;  %v37_v10 = vld [vmem:[%s6607_s0 + $0x58] sm:$0xf]  ;;  %v38_v11 = vld [vmem:[%s6607_s0 + $0x5c] sm:$0xf]  ;;  %v1244_v12 = vsel %vm135_vm0, %v79_v8, 0  ;;  %v1290_v13 = vsel %vm135_vm0, %v80_v9, 0 }
  0x16   :  { %v81_v14 = vld [vmem:[%s6606_s1 + $0x68] sm:$0xf]  ;;  %v82_v15 = vld [vmem:[%s6606_s1 + $0x6c] sm:$0xf]  ;;  %v39_v16 = vld [vmem:[%s6607_s0 + $0x60] sm:$0xf] }
  0x17   :  { %v40_v17 = vld [vmem:[%s6607_s0 + $0x64] sm:$0xf]  ;;  %v1336_v18 = vsel %vm135_vm0, %v81_v14, 0  ;;  %v42_v23 = vld [vmem:[%s6607_s0 + $0x6c] sm:$0xf]  ;;  %vm4337_vm3 = vcmask 60416  }
  0x18   :  { %v44_v29 = vld [vmem:[%s6607_s0 + $0x74] sm:$0xf]  ;;  %v46_v35 = vld [vmem:[%s6607_s0 + $0x7c] sm:$0xf]  ;;  %v48_v41 = vld [vmem:[%s6607_s0 + $0x84] sm:$0xf] }
  0x19   :  { %v50_v47 = vld [vmem:[%s6607_s0 + $0x8c] sm:$0xf]  ;;  %v52_v53 = vld [vmem:[%s6607_s0 + $0x94] sm:$0xf] }
  0x1a   :  { %4649 = vmatmul.mubr.msk.bf16.vlgmr.msra.gmra.mxu0 %vm135_vm0, %v19_v19  ;;  %4655 = vmatmul.mubr.msk.bf16.vlgmr.msra.gmra.mxu1 %vm135_vm0, %v20_v20  ;;  %v1382_v19 = vsel %vm135_vm0, %v82_v15, 0  ;;  %v83_v20 = vld [vmem:[%s6606_s1 + $0x70] sm:$0xf] }
  0x1b   :  { %4659 = vmatpush3.bf16.xpose.msra.mxu0 %v416_v21  ;;  %4665 = vmatpush3.bf16.xpose.msra.mxu1 %v462_v22  ;;  %v84_v21 = vld [vmem:[%s6606_s1 + $0x74] sm:$0xf]  ;;  %v41_v22 = vld [vmem:[%s6607_s0 + $0x68] sm:$0xf]  ;;  %v1428_v24 = vsel %vm135_vm0, %v83_v20, 0 }
  0x1c   :  { %4660 = vmatprep.mubr.msk.bf16.mxu0 %vm5265_vm1, %v5264_v0  ;;  %4666 = vmatprep.mubr.msk.bf16.mxu1 %vm5265_vm1, %v5264_v0 }
  0x1d   :  { %4670 = vmatprep.subr.bf16.mxu0 %v5264_v0  ;;  %4676 = vmatprep.subr.bf16.mxu1 %v5264_v0 }
  0x22   :  { %4661 = vmatmul.mubr.msk.bf16.vlgmr.msra.gmra.mxu0 %vm135_vm0, %v21_v25  ;;  %4667 = vmatmul.mubr.msk.bf16.vlgmr.msra.gmra.mxu1 %vm135_vm0, %v22_v26  ;;  %v1474_v25 = vsel %vm135_vm0, %v84_v21, 0  ;;  %v85_v26 = vld [vmem:[%s6606_s1 + $0x78] sm:$0xf] }
  0x23   :  { %4671 = vmatpush3.bf16.xpose.msra.mxu0 %v508_v27  ;;  %4677 = vmatpush3.bf16.xpose.msra.mxu1 %v554_v28  ;;  %v86_v27 = vld [vmem:[%s6606_s1 + $0x7c] sm:$0xf]  ;;  %v43_v28 = vld [vmem:[%s6607_s0 + $0x70] sm:$0xf]  ;;  %v1520_v30 = vsel %vm135_vm0, %v85_v26, 0 }
  0x24   :  { %4672 = vmatprep.mubr.msk.bf16.mxu0 %vm5265_vm1, %v5264_v0  ;;  %4678 = vmatprep.mubr.msk.bf16.mxu1 %vm5265_vm1, %v5264_v0 }
  0x25   :  { %4682 = vmatprep.subr.bf16.mxu0 %v5264_v0  ;;  %4688 = vmatprep.subr.bf16.mxu1 %v5264_v0 }
  0x2a   :  { %4673 = vmatmul.mubr.msk.bf16.vlgmr.msra.gmra.mxu0 %vm135_vm0, %v23_v31  ;;  %4679 = vmatmul.mubr.msk.bf16.vlgmr.msra.gmra.mxu1 %vm135_vm0, %v24_v32  ;;  %v1566_v31 = vsel %vm135_vm0, %v86_v27, 0  ;;  %v87_v32 = vld [vmem:[%s6606_s1 + $0x80] sm:$0xf] }
  0x2b   :  { %4683 = vmatpush3.bf16.xpose.msra.mxu0 %v600_v33  ;;  %4689 = vmatpush3.bf16.xpose.msra.mxu1 %v646_v34  ;;  %v88_v33 = vld [vmem:[%s6606_s1 + $0x84] sm:$0xf]  ;;  %v45_v34 = vld [vmem:[%s6607_s0 + $0x78] sm:$0xf]  ;;  %v1612_v36 = vsel %vm135_vm0, %v87_v32, 0 }
  0x2c   :  { %4684 = vmatprep.mubr.msk.bf16.mxu0 %vm5265_vm1, %v5264_v0  ;;  %4690 = vmatprep.mubr.msk.bf16.mxu1 %vm5265_vm1, %v5264_v0 }
  0x2d   :  { %4694 = vmatprep.subr.bf16.mxu0 %v5264_v0  ;;  %4700 = vmatprep.subr.bf16.mxu1 %v5264_v0 }
  0x32   :  { %4685 = vmatmul.mubr.msk.bf16.vlgmr.msra.gmra.mxu0 %vm135_vm0, %v25_v37  ;;  %4691 = vmatmul.mubr.msk.bf16.vlgmr.msra.gmra.mxu1 %vm135_vm0, %v26_v38  ;;  %v1658_v37 = vsel %vm135_vm0, %v88_v33, 0  ;;  %v89_v38 = vld [vmem:[%s6606_s1 + $0x88] sm:$0xf] }
  0x33   :  { %4695 = vmatpush3.bf16.xpose.msra.mxu0 %v692_v39  ;;  %4701 = vmatpush3.bf16.xpose.msra.mxu1 %v738_v40  ;;  %v90_v39 = vld [vmem:[%s6606_s1 + $0x8c] sm:$0xf]  ;;  %v47_v40 = vld [vmem:[%s6607_s0 + $0x80] sm:$0xf]  ;;  %v1704_v42 = vsel %vm135_vm0, %v89_v38, 0 }
  0x34   :  { %4696 = vmatprep.mubr.msk.bf16.mxu0 %vm5265_vm1, %v5264_v0  ;;  %4702 = vmatprep.mubr.msk.bf16.mxu1 %vm5265_vm1, %v5264_v0 }
  0x35   :  { %4706 = vmatprep.subr.bf16.mxu0 %v5264_v0  ;;  %4712 = vmatprep.subr.bf16.mxu1 %v5264_v0 }
  0x3a   :  { %4697 = vmatmul.mubr.msk.bf16.vlgmr.msra.gmra.mxu0 %vm135_vm0, %v27_v43  ;;  %4703 = vmatmul.mubr.msk.bf16.vlgmr.msra.gmra.mxu1 %vm135_vm0, %v28_v44  ;;  %v1750_v43 = vsel %vm135_vm0, %v90_v39, 0  ;;  %v91_v44 = vld [vmem:[%s6606_s1 + $0x90] sm:$0xf] }
  0x3b   :  { %4707 = vmatpush3.bf16.xpose.msra.mxu0 %v784_v45  ;;  %4713 = vmatpush3.bf16.xpose.msra.mxu1 %v830_v46  ;;  %v92_v45 = vld [vmem:[%s6606_s1 + $0x94] sm:$0xf]  ;;  %v49_v46 = vld [vmem:[%s6607_s0 + $0x88] sm:$0xf]  ;;  %v1796_v48 = vsel %vm135_vm0, %v91_v44, 0 }
  0x3c   :  { %4708 = vmatprep.mubr.msk.bf16.mxu0 %vm5265_vm1, %v5264_v0  ;;  %4714 = vmatprep.mubr.msk.bf16.mxu1 %vm5265_vm1, %v5264_v0 }
  0x3d   :  { %4718 = vmatprep.subr.bf16.mxu0 %v5264_v0  ;;  %4724 = vmatprep.subr.bf16.mxu1 %v5264_v0 }
  0x42   :  { %4709 = vmatmul.mubr.msk.bf16.vlgmr.msra.gmra.mxu0 %vm135_vm0, %v29_v49  ;;  %4715 = vmatmul.mubr.msk.bf16.vlgmr.msra.gmra.mxu1 %vm135_vm0, %v30_v50  ;;  %v1842_v49 = vsel %vm135_vm0, %v92_v45, 0  ;;  %v93_v50 = vld [vmem:[%s6606_s1 + $0x98] sm:$0xf] }
  0x43   :  { %4719 = vmatpush3.bf16.xpose.msra.mxu0 %v876_v51  ;;  %4725 = vmatpush3.bf16.xpose.msra.mxu1 %v922_v52  ;;  %v94_v51 = vld [vmem:[%s6606_s1 + $0x9c] sm:$0xf]  ;;  %v51_v52 = vld [vmem:[%s6607_s0 + $0x90] sm:$0xf]  ;;  %v1888_v54 = vsel %vm135_vm0, %v93_v50, 0 }
  0x44   :  { %4720 = vmatprep.mubr.msk.bf16.mxu0 %vm5265_vm1, %v5264_v0  ;;  %4726 = vmatprep.mubr.msk.bf16.mxu1 %vm5265_vm1, %v5264_v0 }
  0x45   :  { %4730 = vmatprep.subr.bf16.mxu0 %v5264_v0  ;;  %4736 = vmatprep.subr.bf16.mxu1 %v5264_v0 }
  0x4a   :  { %4721 = vmatmul.mubr.msk.bf16.vlgmr.msra.gmra.mxu0 %vm135_vm0, %v31_v55  ;;  %4727 = vmatmul.mubr.msk.bf16.vlgmr.msra.gmra.mxu1 %vm135_vm0, %v32_v56  ;;  %v1934_v55 = vsel %vm135_vm0, %v94_v51, 0  ;;  %v53_v56 = vld [vmem:[%s6607_s0 + $0x98] sm:$0xf] }
  0x4b   :  { %4731 = vmatpush3.bf16.xpose.msra.mxu0 %v968_v57  ;;  %4737 = vmatpush3.bf16.xpose.msra.mxu1 %v1014_v58  ;;  %v54_v57 = vld [vmem:[%s6607_s0 + $0x9c] sm:$0xf] }
  0x4c   :  { %4732 = vmatprep.mubr.msk.bf16.mxu0 %vm5265_vm1, %v5264_v0  ;;  %4738 = vmatprep.mubr.msk.bf16.mxu1 %vm5265_vm1, %v5264_v0 }
  0x4d   :  { %4742 = vmatprep.subr.bf16.mxu0 %v5264_v0  ;;  %4748 = vmatprep.subr.bf16.mxu1 %v5264_v0 }
  0x52   :  { %4733 = vmatmul.mubr.msk.bf16.vlgmr.msra.gmra.mxu0 %vm135_vm0, %v33_v61  ;;  %4739 = vmatmul.mubr.msk.bf16.vlgmr.msra.gmra.mxu1 %vm135_vm0, %v34_v62 }
  0x53   :  { %4743 = vmatpush3.bf16.xpose.msra.mxu0 %v1060_v63  ;;  %4749 = vmatpush3.bf16.xpose.msra.mxu1 %v1106_v1 }
  0x54   :  { %4744 = vmatprep.mubr.msk.bf16.mxu0 %vm5265_vm1, %v5264_v0  ;;  %4750 = vmatprep.mubr.msk.bf16.mxu1 %vm5265_vm1, %v5264_v0 }
  0x55   :  { %4754 = vmatprep.subr.bf16.mxu0 %v5264_v0  ;;  %4760 = vmatprep.subr.bf16.mxu1 %v5264_v0 }
  0x5a   :  { %4745 = vmatmul.mubr.msk.bf16.vlgmr.msra.gmra.mxu0 %vm135_vm0, %v35_v4  ;;  %4751 = vmatmul.mubr.msk.bf16.vlgmr.msra.gmra.mxu1 %vm135_vm0, %v36_v5 }
  0x5b   :  { %4755 = vmatpush3.bf16.xpose.msra.mxu0 %v1152_v6  ;;  %4761 = vmatpush3.bf16.xpose.msra.mxu1 %v1198_v7 }
  0x5c   :  { %4756 = vmatprep.mubr.msk.bf16.mxu0 %vm5265_vm1, %v5264_v0  ;;  %4762 = vmatprep.mubr.msk.bf16.mxu1 %vm5265_vm1, %v5264_v0 }
  0x5d   :  { %4766 = vmatprep.subr.bf16.mxu0 %v5264_v0  ;;  %4772 = vmatprep.subr.bf16.mxu1 %v5264_v0 }
  0x62   :  { %4757 = vmatmul.mubr.msk.bf16.vlgmr.msra.gmra.mxu0 %vm135_vm0, %v37_v10  ;;  %4763 = vmatmul.mubr.msk.bf16.vlgmr.msra.gmra.mxu1 %vm135_vm0, %v38_v11 }
  0x63   :  { %4767 = vmatpush3.bf16.xpose.msra.mxu0 %v1244_v12  ;;  %4773 = vmatpush3.bf16.xpose.msra.mxu1 %v1290_v13 }
  0x64   :  { %4768 = vmatprep.mubr.msk.bf16.mxu0 %vm5265_vm1, %v5264_v0  ;;  %4774 = vmatprep.mubr.msk.bf16.mxu1 %vm5265_vm1, %v5264_v0 }
  0x65   :  { %4778 = vmatprep.subr.bf16.mxu0 %v5264_v0  ;;  %4784 = vmatprep.subr.bf16.mxu1 %v5264_v0 }
  0x6a   :  { %4769 = vmatmul.mubr.msk.bf16.vlgmr.msra.gmra.mxu0 %vm135_vm0, %v39_v16  ;;  %4775 = vmatmul.mubr.msk.bf16.vlgmr.msra.gmra.mxu1 %vm135_vm0, %v40_v17 }
  0x6b   :  { %4779 = vmatpush3.bf16.xpose.msra.mxu0 %v1336_v18  ;;  %4785 = vmatpush3.bf16.xpose.msra.mxu1 %v1382_v19 }
  0x6c   :  { %4780 = vmatprep.mubr.msk.bf16.mxu0 %vm5265_vm1, %v5264_v0  ;;  %4786 = vmatprep.mubr.msk.bf16.mxu1 %vm5265_vm1, %v5264_v0 }
  0x6d   :  { %4790 = vmatprep.subr.bf16.mxu0 %v5264_v0  ;;  %4796 = vmatprep.subr.bf16.mxu1 %v5264_v0 }
  0x72   :  { %4781 = vmatmul.mubr.msk.bf16.vlgmr.msra.gmra.mxu0 %vm135_vm0, %v41_v22  ;;  %4787 = vmatmul.mubr.msk.bf16.vlgmr.msra.gmra.mxu1 %vm135_vm0, %v42_v23 }
  0x73   :  { %4791 = vmatpush3.bf16.xpose.msra.mxu0 %v1428_v24  ;;  %4797 = vmatpush3.bf16.xpose.msra.mxu1 %v1474_v25 }
  0x74   :  { %4792 = vmatprep.mubr.msk.bf16.mxu0 %vm5265_vm1, %v5264_v0  ;;  %4798 = vmatprep.mubr.msk.bf16.mxu1 %vm5265_vm1, %v5264_v0 }
  0x75   :  { %4802 = vmatprep.subr.bf16.mxu0 %v5264_v0  ;;  %4808 = vmatprep.subr.bf16.mxu1 %v5264_v0 }
  0x7a   :  { %4793 = vmatmul.mubr.msk.bf16.vlgmr.msra.gmra.mxu0 %vm135_vm0, %v43_v28  ;;  %4799 = vmatmul.mubr.msk.bf16.vlgmr.msra.gmra.mxu1 %vm135_vm0, %v44_v29 }
  0x7b   :  { %4803 = vmatpush3.bf16.xpose.msra.mxu0 %v1520_v30  ;;  %4809 = vmatpush3.bf16.xpose.msra.mxu1 %v1566_v31 }
  0x7c   :  { %4804 = vmatprep.mubr.msk.bf16.mxu0 %vm5265_vm1, %v5264_v0  ;;  %4810 = vmatprep.mubr.msk.bf16.mxu1 %vm5265_vm1, %v5264_v0 }
  0x7d   :  { %4814 = vmatprep.subr.bf16.mxu0 %v5264_v0  ;;  %4820 = vmatprep.subr.bf16.mxu1 %v5264_v0 }
  0x82   :  { %4805 = vmatmul.mubr.msk.bf16.vlgmr.msra.gmra.mxu0 %vm135_vm0, %v45_v34  ;;  %4811 = vmatmul.mubr.msk.bf16.vlgmr.msra.gmra.mxu1 %vm135_vm0, %v46_v35 }
  0x83   :  { %4815 = vmatpush3.bf16.xpose.msra.mxu0 %v1612_v36  ;;  %4821 = vmatpush3.bf16.xpose.msra.mxu1 %v1658_v37 }
  0x84   :  { %4816 = vmatprep.mubr.msk.bf16.mxu0 %vm5265_vm1, %v5264_v0  ;;  %4822 = vmatprep.mubr.msk.bf16.mxu1 %vm5265_vm1, %v5264_v0 }
  0x85   :  { %4826 = vmatprep.subr.bf16.mxu0 %v5264_v0  ;;  %4832 = vmatprep.subr.bf16.mxu1 %v5264_v0 }
  0x8a   :  { %4817 = vmatmul.mubr.msk.bf16.vlgmr.msra.gmra.mxu0 %vm135_vm0, %v47_v40  ;;  %4823 = vmatmul.mubr.msk.bf16.vlgmr.msra.gmra.mxu1 %vm135_vm0, %v48_v41 }
  0x8b   :  { %4827 = vmatpush3.bf16.xpose.msra.mxu0 %v1704_v42  ;;  %4833 = vmatpush3.bf16.xpose.msra.mxu1 %v1750_v43 }
  0x8c   :  { %4828 = vmatprep.mubr.msk.bf16.mxu0 %vm5265_vm1, %v5264_v0  ;;  %4834 = vmatprep.mubr.msk.bf16.mxu1 %vm5265_vm1, %v5264_v0 }
  0x8d   :  { %4838 = vmatprep.subr.bf16.mxu0 %v5264_v0  ;;  %4844 = vmatprep.subr.bf16.mxu1 %v5264_v0 }
  0x92   :  { %4829 = vmatmul.mubr.msk.bf16.vlgmr.msra.gmra.mxu0 %vm135_vm0, %v49_v46  ;;  %4835 = vmatmul.mubr.msk.bf16.vlgmr.msra.gmra.mxu1 %vm135_vm0, %v50_v47 }
  0x93   :  { %4839 = vmatpush3.bf16.xpose.msra.mxu0 %v1796_v48  ;;  %4845 = vmatpush3.bf16.xpose.msra.mxu1 %v1842_v49 }
  0x94   :  { %4840 = vmatprep.mubr.msk.bf16.mxu0 %vm5265_vm1, %v5264_v0  ;;  %4846 = vmatprep.mubr.msk.bf16.mxu1 %vm5265_vm1, %v5264_v0 }
  0x95   :  { %4850 = vmatprep.subr.bf16.mxu0 %v5264_v0  ;;  %4856 = vmatprep.subr.bf16.mxu1 %v5264_v0 }
  0x9a   :  { %4841 = vmatmul.mubr.msk.bf16.vlgmr.msra.gmra.mxu0 %vm135_vm0, %v51_v52  ;;  %4847 = vmatmul.mubr.msk.bf16.vlgmr.msra.gmra.mxu1 %vm135_vm0, %v52_v53 }
  0x9b   :  { %4851 = vmatpush3.bf16.xpose.msra.mxu0 %v1888_v54  ;;  %4857 = vmatpush3.bf16.xpose.msra.mxu1 %v1934_v55 }
  0x9c   :  { %4852 = vmatprep.mubr.msk.bf16.mxu0 %vm5265_vm1, %v5264_v0  ;;  %4858 = vmatprep.mubr.msk.bf16.mxu1 %vm5265_vm1, %v5264_v0 }
  0x9d   :  { %4862 = vmatprep.subr.bf16.mxu0 %v5264_v0  ;;  %4868 = vmatprep.subr.bf16.mxu1 %v5264_v0 }
  0xa2   :  { %4853 = vmatmul.mubr.msk.bf16.vlgmr.msra.gmra.mxu0 %vm135_vm0, %v53_v56  ;;  %4859 = vmatmul.mubr.msk.bf16.vlgmr.msra.gmra.mxu1 %vm135_vm0, %v54_v57 }
  0xa3   :  { %4864 = vmatprep.mubr.msk.bf16.mxu0 %vm5265_vm1, %v5264_v0  ;;  %4870 = vmatprep.mubr.msk.bf16.mxu1 %vm5265_vm1, %v5264_v0 }
  0xca   :  { %v5732_v58 = vpop.f32.mrf.mxu0  ;;  %v5734_v59 = vpop.f32.mrf.mxu1 }
  0xcb   :  { %v1976_v60 = vsel %vm135_vm0, %v5732_v58, -inf  ;;  %v1979_v63 = vsel %vm135_vm0, %v5734_v59, -inf }
  0xcc   :  { %v4632_v61 = vpop.f32.mrf.mxu1  ;;  %1977 = vmax.xlane.f32.xlu0 %v1976_v60  ;;  %v4626_v62 = vpop.f32.mrf.mxu0 }
  0xce   :  { %v179_v1 = vpop.f32.mrf.mxu0  ;;  %v225_v2 = vpop.f32.mrf.mxu1 }
  0xd0   :  { %v4633_v3 = vpop.f32.mrf.mxu1  ;;  %1980 = vmax.xlane.f32.xlu0 %v1979_v63  ;;  %v4627_v4 = vpop.f32.mrf.mxu0 }
  0xd2   :  { %v5740_v5 = vpop.f32.mrf.mxu0  ;;  %v5742_v6 = vpop.f32.mrf.mxu1 }
  0xd3   :  { %v1982_v7 = vsel %vm135_vm0, %v5740_v5, -inf  ;;  %v1985_v10 = vsel %vm135_vm0, %v5742_v6, -inf }
  0xd4   :  { %v4644_v8 = vpop.f32.mrf.mxu1  ;;  %1983 = vmax.xlane.f32.xlu1 %v1982_v7  ;;  %v4638_v9 = vpop.f32.mrf.mxu0 }
  0xd6   :  { %v271_v11 = vpop.f32.mrf.mxu0  ;;  %v317_v12 = vpop.f32.mrf.mxu1 }
  0xd8   :  { %v4645_v13 = vpop.f32.mrf.mxu1  ;;  %1986 = vmax.xlane.f32.xlu1 %v1985_v10  ;;  %v4639_v14 = vpop.f32.mrf.mxu0 }
  0xda   :  { %v5748_v15 = vpop.f32.mrf.mxu0  ;;  %v5750_v16 = vpop.f32.mrf.mxu1 }
  0xdb   :  { %v1991_v17 = vsel %vm135_vm0, %v5750_v16, -inf  ;;  %v1988_v18 = vsel %vm135_vm0, %v5748_v15, -inf }
  0xdc   :  { %v4656_v19 = vpop.f32.mrf.mxu1  ;;  %1992 = vmax.xlane.f32.xlu1 %v1991_v17  ;;  %1989 = vmax.xlane.f32.xlu0 %v1988_v18  ;;  %v4650_v20 = vpop.f32.mrf.mxu0 }
  0xde   :  { %v363_v21 = vpop.f32.mrf.mxu0  ;;  %v409_v22 = vpop.f32.mrf.mxu1 }
  0xe0   :  { %v4651_v23 = vpop.f32.mrf.mxu0  ;;  %v4657_v24 = vpop.f32.mrf.mxu1 }
  0xe2   :  { %v5756_v25 = vpop.f32.mrf.mxu0  ;;  %v5758_v26 = vpop.f32.mrf.mxu1 }
  0xe3   :  { %v1997_v27 = vsel %vm135_vm0, %v5758_v26, -inf  ;;  %v1994_v28 = vsel %vm135_vm0, %v5756_v25, -inf }
  0xe4   :  { %v4668_v29 = vpop.f32.mrf.mxu1  ;;  %1998 = vmax.xlane.f32.xlu1 %v1997_v27  ;;  %1995 = vmax.xlane.f32.xlu0 %v1994_v28  ;;  %v4662_v30 = vpop.f32.mrf.mxu0 }
  0xe6   :  { %v455_v31 = vpop.f32.mrf.mxu0  ;;  %v501_v32 = vpop.f32.mrf.mxu1 }
  0xe8   :  { %v4663_v33 = vpop.f32.mrf.mxu0  ;;  %v4669_v34 = vpop.f32.mrf.mxu1 }
  0xea   :  { %v5764_v35 = vpop.f32.mrf.mxu0  ;;  %v5766_v36 = vpop.f32.mrf.mxu1 }
  0xeb   :  { %v2003_v37 = vsel %vm135_vm0, %v5766_v36, -inf  ;;  %v2000_v38 = vsel %vm135_vm0, %v5764_v35, -inf }
  0xec   :  { %v4680_v39 = vpop.f32.mrf.mxu1  ;;  %2004 = vmax.xlane.f32.xlu1 %v2003_v37  ;;  %2001 = vmax.xlane.f32.xlu0 %v2000_v38  ;;  %v4674_v40 = vpop.f32.mrf.mxu0 }
  0xee   :  { %v547_v41 = vpop.f32.mrf.mxu0  ;;  %v593_v42 = vpop.f32.mrf.mxu1 }
  0xf0   :  { %v4675_v43 = vpop.f32.mrf.mxu0  ;;  %v4681_v44 = vpop.f32.mrf.mxu1 }
  0xf2   :  { %v5772_v45 = vpop.f32.mrf.mxu0  ;;  %v5774_v46 = vpop.f32.mrf.mxu1 }
  0xf3   :  { %v2009_v47 = vsel %vm135_vm0, %v5774_v46, -inf  ;;  %v2006_v48 = vsel %vm135_vm0, %v5772_v45, -inf }
  0xf4   :  { %v4692_v49 = vpop.f32.mrf.mxu1  ;;  %2010 = vmax.xlane.f32.xlu1 %v2009_v47  ;;  %2007 = vmax.xlane.f32.xlu0 %v2006_v48  ;;  %v4686_v50 = vpop.f32.mrf.mxu0 }
  0xf6   :  { %v639_v51 = vpop.f32.mrf.mxu0  ;;  %v685_v52 = vpop.f32.mrf.mxu1 }
  0xf8   :  { %v4687_v53 = vpop.f32.mrf.mxu0  ;;  %v4693_v54 = vpop.f32.mrf.mxu1 }
  0xfa   :  { %v5780_v55 = vpop.f32.mrf.mxu0  ;;  %v5782_v56 = vpop.f32.mrf.mxu1 }
  0xfb   :  { %v2015_v57 = vsel %vm135_vm0, %v5782_v56, -inf  ;;  %v2012_v60 = vsel %vm135_vm0, %v5780_v55, -inf }
  0xfc   :  { %v4704_v61 = vpop.f32.mrf.mxu1  ;;  %2016 = vmax.xlane.f32.xlu1 %v2015_v57  ;;  %2013 = vmax.xlane.f32.xlu0 %v2012_v60  ;;  %v4698_v62 = vpop.f32.mrf.mxu0 }
  0xfe   :  { %v731_v63 = vpop.f32.mrf.mxu0  ;;  %v777_v1 = vpop.f32.mrf.mxu1 }
 0x100   :  { %v4699_v2 = vpop.f32.mrf.mxu0  ;;  %v4705_v3 = vpop.f32.mrf.mxu1 }
 0x102   :  { %v5788_v4 = vpop.f32.mrf.mxu0  ;;  %v5790_v7 = vpop.f32.mrf.mxu1 }
 0x103   :  { %v2021_v8 = vsel %vm135_vm0, %v5790_v7, -inf  ;;  %v2018_v9 = vsel %vm135_vm0, %v5788_v4, -inf }
 0x104   :  { %v4716_v10 = vpop.f32.mrf.mxu1  ;;  %2022 = vmax.xlane.f32.xlu1 %v2021_v8  ;;  %2019 = vmax.xlane.f32.xlu0 %v2018_v9  ;;  %v4710_v11 = vpop.f32.mrf.mxu0 }
 0x106   :  { %v823_v12 = vpop.f32.mrf.mxu0  ;;  %v869_v13 = vpop.f32.mrf.mxu1 }
 0x108   :  { %v4711_v14 = vpop.f32.mrf.mxu0  ;;  %v4717_v17 = vpop.f32.mrf.mxu1 }
 0x10a   :  { %v5796_v18 = vpop.f32.mrf.mxu0  ;;  %v5798_v19 = vpop.f32.mrf.mxu1 }
 0x10b   :  { %v2027_v20 = vsel %vm135_vm0, %v5798_v19, -inf  ;;  %v2024_v21 = vsel %vm135_vm0, %v5796_v18, -inf }
 0x10c   :  { %v4728_v22 = vpop.f32.mrf.mxu1  ;;  %2028 = vmax.xlane.f32.xlu1 %v2027_v20  ;;  %2025 = vmax.xlane.f32.xlu0 %v2024_v21  ;;  %v4722_v23 = vpop.f32.mrf.mxu0 }
 0x10e   :  { %v915_v24 = vpop.f32.mrf.mxu0  ;;  %v961_v27 = vpop.f32.mrf.mxu1 }
 0x110   :  { %v4723_v28 = vpop.f32.mrf.mxu0  ;;  %v4729_v29 = vpop.f32.mrf.mxu1 }
 0x112   :  { %v5804_v30 = vpop.f32.mrf.mxu0  ;;  %v5806_v31 = vpop.f32.mrf.mxu1 }
 0x113   :  { %v2033_v32 = vsel %vm135_vm0, %v5806_v31, -inf  ;;  %v2030_v33 = vsel %vm135_vm0, %v5804_v30, -inf }
 0x114   :  { %v4740_v34 = vpop.f32.mrf.mxu1  ;;  %2034 = vmax.xlane.f32.xlu1 %v2033_v32  ;;  %2031 = vmax.xlane.f32.xlu0 %v2030_v33  ;;  %v4734_v37 = vpop.f32.mrf.mxu0 }
 0x116   :  { %v1007_v38 = vpop.f32.mrf.mxu0  ;;  %v1053_v39 = vpop.f32.mrf.mxu1 }
 0x118   :  { %v4735_v40 = vpop.f32.mrf.mxu0  ;;  %v4741_v41 = vpop.f32.mrf.mxu1 }
 0x11a   :  { %v5812_v42 = vpop.f32.mrf.mxu0  ;;  %v5814_v43 = vpop.f32.mrf.mxu1 }
 0x11b   :  { %v2039_v44 = vsel %vm135_vm0, %v5814_v43, -inf  ;;  %v2036_v47 = vsel %vm135_vm0, %v5812_v42, -inf }
 0x11c   :  { %v4752_v48 = vpop.f32.mrf.mxu1  ;;  %2040 = vmax.xlane.f32.xlu1 %v2039_v44  ;;  %2037 = vmax.xlane.f32.xlu0 %v2036_v47  ;;  %v4746_v49 = vpop.f32.mrf.mxu0 }
 0x11e   :  { %v1099_v50 = vpop.f32.mrf.mxu0  ;;  %v1145_v51 = vpop.f32.mrf.mxu1 }
 0x120   :  { %v4747_v52 = vpop.f32.mrf.mxu0  ;;  %v4753_v53 = vpop.f32.mrf.mxu1 }
 0x122   :  { %v5820_v54 = vpop.f32.mrf.mxu0  ;;  %v5822_v57 = vpop.f32.mrf.mxu1 }
 0x123   :  { %v2045_v60 = vsel %vm135_vm0, %v5822_v57, -inf  ;;  %v2042_v61 = vsel %vm135_vm0, %v5820_v54, -inf }
 0x124   :  { %2046 = vmax.xlane.f32.xlu1 %v2045_v60  ;;  %2043 = vmax.xlane.f32.xlu0 %v2042_v61  ;;  %v4758_v62 = vpop.f32.mrf.mxu0  ;;  %v4764_v63 = vpop.f32.mrf.mxu1 }
 0x126   :  { %v1191_v1 = vpop.f32.mrf.mxu0  ;;  %v1237_v2 = vpop.f32.mrf.mxu1 }
 0x128   :  { %v4759_v3 = vpop.f32.mrf.mxu0  ;;  %v4765_v8 = vpop.f32.mrf.mxu1 }
 0x12a   :  { %v5828_v9 = vpop.f32.mrf.mxu0  ;;  %v5830_v10 = vpop.f32.mrf.mxu1 }
 0x12c   :  { %v4770_v11 = vpop.f32.mrf.mxu0  ;;  %v4776_v12 = vpop.f32.mrf.mxu1 }
 0x12e   :  { %v1283_v13 = vpop.f32.mrf.mxu0  ;;  %v1329_v14 = vpop.f32.mrf.mxu1 }
 0x130   :  { %v4771_v17 = vpop.f32.mrf.mxu0  ;;  %v4777_v20 = vpop.f32.mrf.mxu1 }
 0x132   :  { %v5832_v21 = vpop.f32.mrf.mxu0  ;;  %v5834_v22 = vpop.f32.mrf.mxu1 }
 0x134   :  { %v4782_v23 = vpop.f32.mrf.mxu0  ;;  %v4788_v24 = vpop.f32.mrf.mxu1 }
 0x136   :  { %v1375_v27 = vpop.f32.mrf.mxu0  ;;  %v1421_v28 = vpop.f32.mrf.mxu1 }
 0x138   :  { %v4783_v29 = vpop.f32.mrf.mxu0  ;;  %v4789_v32 = vpop.f32.mrf.mxu1 }
 0x13a   :  { %v5836_v33 = vpop.f32.mrf.mxu0  ;;  %v5838_v34 = vpop.f32.mrf.mxu1 }
 0x13c   :  { %v4794_v37 = vpop.f32.mrf.mxu0  ;;  %v4800_v38 = vpop.f32.mrf.mxu1 }
 0x13e   :  { %v1467_v39 = vpop.f32.mrf.mxu0  ;;  %v1513_v40 = vpop.f32.mrf.mxu1 }
 0x140   :  { %v4795_v41 = vpop.f32.mrf.mxu0  ;;  %v4801_v44 = vpop.f32.mrf.mxu1 }
 0x142   :  { %v5840_v47 = vpop.f32.mrf.mxu0  ;;  %v5842_v48 = vpop.f32.mrf.mxu1 }
 0x144   :  { %v4806_v49 = vpop.f32.mrf.mxu0  ;;  %v4812_v50 = vpop.f32.mrf.mxu1 }
 0x146   :  { %v1559_v51 = vpop.f32.mrf.mxu0  ;;  %v1605_v52 = vpop.f32.mrf.mxu1 }
 0x148   :  { %v4807_v53 = vpop.f32.mrf.mxu0  ;;  %v4813_v60 = vpop.f32.mrf.mxu1 }
 0x14a   :  { %v5844_v61 = vpop.f32.mrf.mxu0  ;;  %v5846_v62 = vpop.f32.mrf.mxu1 }
 0x14c   :  { %v4818_v63 = vpop.f32.mrf.mxu0  ;;  %v4824_v1 = vpop.f32.mrf.mxu1 }
 0x14e   :  { %v1651_v2 = vpop.f32.mrf.mxu0  ;;  %v1697_v3 = vpop.f32.mrf.mxu1 }
 0x150   :  { %v4819_v8 = vpop.f32.mrf.mxu0  ;;  %v4825_v11 = vpop.f32.mrf.mxu1 }
 0x152   :  { %v5848_v12 = vpop.f32.mrf.mxu0  ;;  %v5850_v13 = vpop.f32.mrf.mxu1 }
 0x154   :  { %v4830_v14 = vpop.f32.mrf.mxu0  ;;  %v4836_v17 = vpop.f32.mrf.mxu1 }
 0x155   :  { %v1978_v20 = vpop.xlane.xlu0 %1977 }
 0x156   :  { %v2096_v23 = vsub.f32 %v5732_v58, %v1978_v20  ;;  %v1743_v24 = vpop.f32.mrf.mxu0  ;;  %v1789_v27 = vpop.f32.mrf.mxu1 }
 0x158   :  { %v2136_v28 = vmul.f32 1.442695, %v2096_v23  ;;  %v4831_v29 = vpop.f32.mrf.mxu0  ;;  %v4837_v32 = vpop.f32.mrf.mxu1 }
 0x159   :  { %v1981_v37 = vpop.xlane.xlu0 %1980 }
 0x15a   :  { %5104 = vpow2.f32 %v2136_v28  ;;  %v2097_v38 = vsub.f32 %v5734_v59, %v1981_v37  ;;  %v5854_v39 = vpop.f32.mrf.mxu0  ;;  %v5856_v40 = vpop.f32.mrf.mxu1 }
 0x15c   :  { %v2138_v41 = vmul.f32 1.442695, %v2097_v38  ;;  %v4842_v44 = vpop.f32.mrf.mxu0  ;;  %v4848_v49 = vpop.f32.mrf.mxu1 }
 0x15d   :  { %v1984_v50 = vpop.xlane.xlu1 %1983 }
 0x15e   :  { %5106 = vpow2.f32 %v2138_v41  ;;  %v2098_v58 = vsub.f32 %v5740_v5, %v1984_v50  ;;  %v1835_v51 = vpop.f32.mrf.mxu0  ;;  %v1881_v52 = vpop.f32.mrf.mxu1  ;;  %v2048_v41 = vsel %vm135_vm0, %v5828_v9, -inf }
 0x15f   :  { %v2051_v51 = vsel %vm135_vm0, %v5830_v10, -inf }
 0x160   :  { %v2140_v53 = vmul.f32 1.442695, %v2098_v58  ;;  %v4843_v60 = vpop.f32.mrf.mxu0  ;;  %v4849_v63 = vpop.f32.mrf.mxu1 }
 0x161   :  { %v1987_v1 = vpop.xlane.xlu1 %1986 }
 0x162   :  { %5108 = vpow2.f32 %v2140_v53  ;;  %v2099_v59 = vsub.f32 %v5742_v6, %v1987_v1  ;;  %v5860_v2 = vpop.f32.mrf.mxu0  ;;  %v5862_v3 = vpop.f32.mrf.mxu1  ;;  %v2054_v1 = vsel %vm135_vm0, %v5832_v21, -inf }
 0x164   :  { %v2142_v8 = vmul.f32 1.442695, %v2099_v59  ;;  %v4854_v11 = vpop.f32.mrf.mxu0  ;;  %v4860_v14 = vpop.f32.mrf.mxu1 }
 0x165   :  { %v1993_v17 = vpop.xlane.xlu1 %1992  ;;  %v1990_v20 = vpop.xlane.xlu0 %1989 }
 0x166   :  { %5110 = vpow2.f32 %v2142_v8  ;;  %v2101_v5 = vsub.f32 %v5750_v16, %v1993_v17  ;;  %v2100_v23 = vsub.f32 %v5748_v15, %v1990_v20  ;;  %v1927_v24 = vpop.f32.mrf.mxu0  ;;  %v1973_v27 = vpop.f32.mrf.mxu1  ;;  %v2057_v17 = vsel %vm135_vm0, %v5834_v22, -inf }
 0x167   :  { %v5866_v28 = vpop.eup %5104 }
 0x168   :  { %v2146_v29 = vmul.f32 1.442695, %v2101_v5  ;;  %v2144_v6 = vmul.f32 1.442695, %v2100_v23  ;;  %v2216_v32 = vsel %vm135_vm0, %v5866_v28, 0.0  ;;  %v4855_v37 = vpop.f32.mrf.mxu0  ;;  %v4861_v38 = vpop.f32.mrf.mxu1 }
 0x169   :  { %2217 = vadd.xlane.f32.xlu0 %v2216_v32  ;;  %v2063_v38 = vsel %vm135_vm0, %v5838_v34, -inf }
 0x16a   :  { %5112 = vpow2.f32 %v2144_v6 }
 0x16b   :  { %v5872_v44 = vpop.eup %5106  ;;  %5114 = vpow2.f32 %v2146_v29 }
 0x16c   :  { %v2219_v15 = vsel %vm135_vm0, %v5872_v44, 0.0 }
 0x16d   :  { %2220 = vadd.xlane.f32.xlu1 %v2219_v15  ;;  %v1999_v16 = vpop.xlane.xlu1 %1998  ;;  %v1996_v49 = vpop.xlane.xlu0 %1995  ;;  %2049 = vmax.xlane.f32.xlu0 %v2048_v41 }
 0x16e   :  { %v2103_v50 = vsub.f32 %v5758_v26, %v1999_v16  ;;  %v2102_v58 = vsub.f32 %v5756_v25, %v1996_v49 }
 0x16f   :  { %v5880_v52 = vpop.eup %5108 }
 0x170   :  { %v2150_v53 = vmul.f32 1.442695, %v2103_v50  ;;  %v2148_v60 = vmul.f32 1.442695, %v2102_v58  ;;  %v2222_v63 = vsel %vm135_vm0, %v5880_v52, 0.0  ;;  %v2066_v58 = vsel %vm135_vm0, %v5840_v47, -inf }
 0x171   :  { %2052 = vmax.xlane.f32.xlu1 %v2051_v51  ;;  %2223 = vadd.xlane.f32.xlu0 %v2222_v63  ;;  %v96_v63 = vld [vmem:[%s6608_s2 + $0x4] sm:$0xf] }
 0x172   :  { %5116 = vpow2.f32 %v2148_v60 }
 0x173   :  { %v5886_v59 = vpop.eup %5110  ;;  %5118 = vpow2.f32 %v2150_v53 }
 0x174   :  { %v2225_v25 = vsel %vm135_vm0, %v5886_v59, 0.0 }
 0x175   :  { %2226 = vadd.xlane.f32.xlu1 %v2225_v25  ;;  %v2005_v26 = vpop.xlane.xlu1 %2004  ;;  %v2002_v8 = vpop.xlane.xlu0 %2001  ;;  %2055 = vmax.xlane.f32.xlu0 %v2054_v1 }
 0x176   :  { %v2105_v11 = vsub.f32 %v5766_v36, %v2005_v26  ;;  %v2104_v14 = vsub.f32 %v5764_v35, %v2002_v8  ;;  %v2060_v36 = vsel %vm135_vm0, %v5836_v33, -inf  ;;  %v2069_v26 = vsel %vm135_vm0, %v5842_v48, -inf }
 0x177   :  { %v5894_v20 = vpop.eup %5112  ;;  %v2507_v8 = vsel %vm2459_vm2, %v96_v63, 0 }
 0x178   :  { %v2154_v5 = vmul.f32 1.442695, %v2105_v11  ;;  %v2152_v23 = vmul.f32 1.442695, %v2104_v14  ;;  %v5896_v24 = vpop.eup %5114  ;;  %v2228_v27 = vsel %vm135_vm0, %v5894_v20, 0.0  ;;  %4869 = vmatpush3.bf16.msra.mxu1 %v2507_v8 }
 0x179   :  { %2058 = vmax.xlane.f32.xlu1 %v2057_v17  ;;  %2229 = vadd.xlane.f32.xlu0 %v2228_v27  ;;  %v2231_v35 = vsel %vm135_vm0, %v5896_v24, 0.0 }
 0x17a   :  { %5120 = vpow2.f32 %v2152_v23  ;;  %4880 = vmatprep.subr.bf16.mxu1 %v5264_v0 }
 0x17b   :  { %5122 = vpow2.f32 %v2154_v5 }
 0x17d   :  { %2232 = vadd.xlane.f32.xlu1 %v2231_v35  ;;  %v2011_v29 = vpop.xlane.xlu1 %2010  ;;  %v2008_v6 = vpop.xlane.xlu0 %2007  ;;  %2061 = vmax.xlane.f32.xlu0 %v2060_v36 }
 0x17e   :  { %v2107_v32 = vsub.f32 %v5774_v46, %v2011_v29  ;;  %v2106_v37 = vsub.f32 %v5772_v45, %v2008_v6  ;;  %v95_v46 = vld [vmem:[%s6608_s2] sm:$0xf]  ;;  %v2075_v6 = vsel %vm135_vm0, %v5846_v62, -inf }
 0x17f   :  { %v5908_v41 = vpop.eup %5116  ;;  %v2461_v45 = vsel %vm2459_vm2, %v95_v46, 0 }
 0x180   :  { %v2158_v15 = vmul.f32 1.442695, %v2107_v32  ;;  %v2156_v16 = vmul.f32 1.442695, %v2106_v37  ;;  %v5910_v49 = vpop.eup %5118  ;;  %v2234_v50 = vsel %vm135_vm0, %v5908_v41, 0.0  ;;  %4863 = vmatpush3.bf16.msra.mxu0 %v2461_v45 }
 0x181   :  { %2064 = vmax.xlane.f32.xlu1 %v2063_v38  ;;  %2235 = vadd.xlane.f32.xlu0 %v2234_v50  ;;  %v2237_v51 = vsel %vm135_vm0, %v5910_v49, 0.0 }
 0x182   :  { %5124 = vpow2.f32 %v2156_v16  ;;  %4874 = vmatprep.subr.bf16.mxu0 %v5264_v0 }
 0x183   :  { %5126 = vpow2.f32 %v2158_v15 }
 0x185   :  { %2238 = vadd.xlane.f32.xlu1 %v2237_v51  ;;  %v2017_v53 = vpop.xlane.xlu1 %2016  ;;  %v2014_v60 = vpop.xlane.xlu0 %2013  ;;  %2067 = vmax.xlane.f32.xlu0 %v2066_v58  ;;  %v2081_v51 = vsel %vm135_vm0, %v5850_v13, -inf }
 0x186   :  { %v2109_v1 = vsub.f32 %v5782_v56, %v2017_v53  ;;  %v2108_v25 = vsub.f32 %v5780_v55, %v2014_v60  ;;  %v2072_v55 = vsel %vm135_vm0, %v5844_v61, -inf }
 0x187   :  { %v5931_v11 = vpop.eup %5120 }
 0x188   :  { %v2162_v14 = vmul.f32 1.442695, %v2109_v1  ;;  %v2160_v17 = vmul.f32 1.442695, %v2108_v25  ;;  %v5934_v5 = vpop.eup %5122  ;;  %v2240_v56 = vsel %vm135_vm0, %v5931_v11, 0.0 }
 0x189   :  { %2070 = vmax.xlane.f32.xlu1 %v2069_v26  ;;  %2241 = vadd.xlane.f32.xlu0 %v2240_v56  ;;  %v2243_v23 = vsel %vm135_vm0, %v5934_v5, 0.0  ;;  %v2087_v56 = vsel %vm135_vm0, %v5856_v40, -inf }
 0x18a   :  { %5128 = vpow2.f32 %v2160_v17 }
 0x18b   :  { %5130 = vpow2.f32 %v2162_v14 }
 0x18d   :  { %2244 = vadd.xlane.f32.xlu1 %v2243_v23  ;;  %v2023_v27 = vpop.xlane.xlu1 %2022  ;;  %v2020_v36 = vpop.xlane.xlu0 %2019  ;;  %2073 = vmax.xlane.f32.xlu0 %v2072_v55 }
 0x18e   :  { %v2111_v35 = vsub.f32 %v5790_v7, %v2023_v27  ;;  %v2110_v29 = vsub.f32 %v5788_v4, %v2020_v36  ;;  %v2078_v7 = vsel %vm135_vm0, %v5848_v12, -inf }
 0x18f   :  { %v5946_v32 = vpop.eup %5124 }
 0x190   :  { %v2166_v37 = vmul.f32 1.442695, %v2111_v35  ;;  %v2164_v38 = vmul.f32 1.442695, %v2110_v29  ;;  %v5948_v15 = vpop.eup %5126  ;;  %v2246_v16 = vsel %vm135_vm0, %v5946_v32, 0.0 }
 0x191   :  { %2076 = vmax.xlane.f32.xlu1 %v2075_v6  ;;  %2247 = vadd.xlane.f32.xlu0 %v2246_v16  ;;  %v2249_v4 = vsel %vm135_vm0, %v5948_v15, 0.0  ;;  %v2093_v16 = vsel %vm135_vm0, %v5862_v3, -inf }
 0x192   :  { %5132 = vpow2.f32 %v2164_v38 }
 0x193   :  { %5134 = vpow2.f32 %v2166_v37 }
 0x195   :  { %2250 = vadd.xlane.f32.xlu1 %v2249_v4  ;;  %v2029_v50 = vpop.xlane.xlu1 %2028  ;;  %v2026_v46 = vpop.xlane.xlu0 %2025  ;;  %2079 = vmax.xlane.f32.xlu0 %v2078_v7 }
 0x196   :  { %v2113_v45 = vsub.f32 %v5798_v19, %v2029_v50  ;;  %v2112_v58 = vsub.f32 %v5796_v18, %v2026_v46  ;;  %v2084_v19 = vsel %vm135_vm0, %v5854_v39, -inf }
 0x197   :  { %v5960_v53 = vpop.eup %5128 }
 0x198   :  { %v2170_v60 = vmul.f32 1.442695, %v2113_v45  ;;  %v2168_v63 = vmul.f32 1.442695, %v2112_v58  ;;  %v5962_v1 = vpop.eup %5130  ;;  %v2252_v25 = vsel %vm135_vm0, %v5960_v53, 0.0 }
 0x199   :  { %2082 = vmax.xlane.f32.xlu1 %v2081_v51  ;;  %2253 = vadd.xlane.f32.xlu0 %v2252_v25  ;;  %v2255_v18 = vsel %vm135_vm0, %v5962_v1, 0.0 }
 0x19a   :  { %5136 = vpow2.f32 %v2168_v63 }
 0x19b   :  { %5138 = vpow2.f32 %v2170_v60 }
 0x19d   :  { %2256 = vadd.xlane.f32.xlu1 %v2255_v18  ;;  %v2035_v26 = vpop.xlane.xlu1 %2034  ;;  %v2032_v8 = vpop.xlane.xlu0 %2031  ;;  %2085 = vmax.xlane.f32.xlu0 %v2084_v19 }
 0x19e   :  { %v2115_v14 = vsub.f32 %v5806_v31, %v2035_v26  ;;  %v2114_v17 = vsub.f32 %v5804_v30, %v2032_v8  ;;  %v2090_v30 = vsel %vm135_vm0, %v5860_v2, -inf }
 0x19f   :  { %v5974_v55 = vpop.eup %5132 }
 0x1a0   :  { %v2174_v23 = vmul.f32 1.442695, %v2115_v14  ;;  %v2172_v27 = vmul.f32 1.442695, %v2114_v17  ;;  %v5976_v36 = vpop.eup %5134  ;;  %v2258_v35 = vsel %vm135_vm0, %v5974_v55, 0.0 }
 0x1a1   :  { %2088 = vmax.xlane.f32.xlu1 %v2087_v56  ;;  %2259 = vadd.xlane.f32.xlu0 %v2258_v35  ;;  %v2261_v31 = vsel %vm135_vm0, %v5976_v36, 0.0 }
 0x1a2   :  { %5140 = vpow2.f32 %v2174_v23 }
 0x1a3   :  { %5142 = vpow2.f32 %v2172_v27 }
 0x1a5   :  { %2262 = vadd.xlane.f32.xlu1 %v2261_v31  ;;  %v2041_v29 = vpop.xlane.xlu1 %2040  ;;  %v2038_v6 = vpop.xlane.xlu0 %2037  ;;  %2091 = vmax.xlane.f32.xlu0 %v2090_v30 }
 0x1a6   :  { %v2117_v37 = vsub.f32 %v5814_v43, %v2041_v29  ;;  %v2116_v38 = vsub.f32 %v5812_v42, %v2038_v6 }
 0x1a7   :  { %v5988_v7 = vpop.eup %5136 }
 0x1a8   :  { %v2178_v4 = vmul.f32 1.442695, %v2117_v37  ;;  %v2176_v50 = vmul.f32 1.442695, %v2116_v38  ;;  %v5990_v46 = vpop.eup %5138  ;;  %v2264_v45 = vsel %vm135_vm0, %v5988_v7, 0.0 }
 0x1a9   :  { %2094 = vmax.xlane.f32.xlu1 %v2093_v16  ;;  %2265 = vadd.xlane.f32.xlu0 %v2264_v45  ;;  %v2267_v42 = vsel %vm135_vm0, %v5990_v46, 0.0 }
 0x1aa   :  { %5144 = vpow2.f32 %v2178_v4 }
 0x1ab   :  { %5146 = vpow2.f32 %v2176_v50 }
 0x1ad   :  { %2268 = vadd.xlane.f32.xlu1 %v2267_v42  ;;  %v2047_v43 = vpop.xlane.xlu1 %2046  ;;  %v2044_v58 = vpop.xlane.xlu0 %2043 }
 0x1ae   :  { %v2119_v51 = vsub.f32 %v5822_v57, %v2047_v43  ;;  %v2118_v60 = vsub.f32 %v5820_v54, %v2044_v58 }
 0x1af   :  { %v5998_v63 = vpop.eup %5140 }
 0x1b0   :  { %v6000_v25 = vpop.eup %5142  ;;  %v2182_v19 = vmul.f32 1.442695, %v2119_v51  ;;  %v2180_v18 = vmul.f32 1.442695, %v2118_v60  ;;  %v2273_v26 = vsel %vm135_vm0, %v5998_v63, 0.0 }
 0x1b1   :  { %2274 = vadd.xlane.f32.xlu1 %v2273_v26  ;;  %v2270_v8 = vsel %vm135_vm0, %v6000_v25, 0.0  ;;  %v97_v51 = vld [vmem:[%s6608_s2 + $0x8] sm:$0xf] }
 0x1b2   :  { %5148 = vpow2.f32 %v2182_v19  ;;  %2271 = vadd.xlane.f32.xlu0 %v2270_v8  ;;  %v2553_v8 = vsel %vm2459_vm2, %v97_v51, 0 }
 0x1b3   :  { %5150 = vpow2.f32 %v2180_v18 }
 0x1b7   :  { %v6006_v14 = vpop.eup %5144 }
 0x1b8   :  { %v6008_v57 = vpop.eup %5146  ;;  %v2279_v54 = vsel %vm135_vm0, %v6006_v14, 0.0 }
 0x1b9   :  { %2280 = vadd.xlane.f32.xlu1 %v2279_v54  ;;  %v2276_v17 = vsel %vm135_vm0, %v6008_v57, 0.0 }
 0x1ba   :  { %2277 = vadd.xlane.f32.xlu0 %v2276_v17 }
 0x1bf   :  { %v6014_v56 = vpop.eup %5148 }
 0x1c0   :  { %v6016_v23 = vpop.eup %5150  ;;  %v2285_v27 = vsel %vm135_vm0, %v6014_v56, 0.0 }
 0x1c1   :  { %2286 = vadd.xlane.f32.xlu1 %v2285_v27  ;;  %v2282_v35 = vsel %vm135_vm0, %v6016_v23, 0.0 }
 0x1c2   :  { %2283 = vadd.xlane.f32.xlu0 %v2282_v35 }
 0x1f2   :  { %v2218_v30 = vpop.xlane.xlu0 %2217 }
 0x1f3   :  { %5152 = vrcp.f32 %v2218_v30 }
 0x1f6   :  { %v2221_v31 = vpop.xlane.xlu1 %2220  ;;  %v2050_v29 = vpop.xlane.xlu0 %2049 }
 0x1f7   :  { %5154 = vrcp.f32 %v2221_v31  ;;  %v2120_v6 = vsub.f32 %v5828_v9, %v2050_v29 }
 0x1f9   :  { %v2184_v37 = vmul.f32 1.442695, %v2120_v6 }
 0x1fa   :  { %v2053_v38 = vpop.xlane.xlu1 %2052  ;;  %v2224_v16 = vpop.xlane.xlu0 %2223 }
 0x1fb   :  { %5156 = vpow2.f32 %v2184_v37  ;;  %v2121_v4 = vsub.f32 %v5830_v10, %v2053_v38  ;;  %v99_v37 = vld [vmem:[%s6608_s2 + $0x10] sm:$0xf] }
 0x1fc   :  { %5158 = vrcp.f32 %v2224_v16 }
 0x1fd   :  { %v2186_v50 = vmul.f32 1.442695, %v2121_v4 }
 0x1fe   :  { %v2227_v45 = vpop.xlane.xlu1 %2226  ;;  %v2056_v42 = vpop.xlane.xlu0 %2055 }
 0x1ff   :  { %5160 = vpow2.f32 %v2186_v50  ;;  %v2122_v43 = vsub.f32 %v5832_v21, %v2056_v42  ;;  %v98_v21 = vld [vmem:[%s6608_s2 + $0xc] sm:$0xf] }
 0x200   :  { %v5153_v58 = vpop.eup %5152  ;;  %5162 = vrcp.f32 %v2227_v45  ;;  %v2599_v30 = vsel %vm2459_vm2, %v98_v21, 0  ;;  %v101_v21 = vld [vmem:[%s6608_s2 + $0x18] sm:$0xf] }
 0x201   :  { %v2188_v9 = vmul.f32 1.442695, %v2122_v43  ;;  %v2376_v60 = vmul.f32 %v5153_v58, %v5866_v28  ;;  %v2645_v43 = vsel %vm2459_vm2, %v99_v37, 0 }
 0x202   :  { %v2059_v19 = vpop.xlane.xlu1 %2058  ;;  %v2230_v18 = vpop.xlane.xlu0 %2229 }
 0x203   :  { %5164 = vpow2.f32 %v2188_v9  ;;  %v2123_v10 = vsub.f32 %v5834_v22, %v2059_v19  ;;  %v2416_v26 = vpack.c.bf16 %v2376_v60, %v2376_v60 }
 0x204   :  { %v5155_v54 = vpop.eup %5154  ;;  %5166 = vrcp.f32 %v2230_v18 }
 0x205   :  { %v2190_v17 = vmul.f32 1.442695, %v2123_v10  ;;  %4865 = vmatmul.mubr.msk.bf16.vlgmr.msra.gmra.mxu0 %vm135_vm0, %v2416_v26  ;;  %v2377_v27 = vmul.f32 %v5155_v54, %v5872_v44 }
 0x206   :  { %v2233_v28 = vpop.xlane.xlu1 %2232  ;;  %4875 = vmatpush3.bf16.msra.mxu0 %v2553_v8  ;;  %4876 = vmatprep.mubr.msk.bf16.mxu0 %vm5265_vm1, %v5264_v0  ;;  %v2062_v22 = vpop.xlane.xlu0 %2061 }
 0x207   :  { %5168 = vpow2.f32 %v2190_v17  ;;  %v2417_v35 = vpack.c.bf16 %v2377_v27, %v2377_v27  ;;  %4886 = vmatprep.subr.bf16.mxu0 %v5264_v0  ;;  %v2124_v29 = vsub.f32 %v5836_v33, %v2062_v22 }
 0x208   :  { %v6040_v31 = vpop.eup %5156  ;;  %5170 = vrcp.f32 %v2233_v28 }
 0x209   :  { %v5159_v6 = vpop.eup %5158  ;;  %4871 = vmatmul.mubr.msk.bf16.vlgmr.msra.gmra.mxu1 %vm135_vm0, %v2417_v35  ;;  %v2288_v44 = vsel %vm135_vm0, %v6040_v31, 0.0  ;;  %v2192_v38 = vmul.f32 1.442695, %v2124_v29  ;;  %v2737_v29 = vsel %vm2459_vm2, %v101_v21, 0 }
 0x20a   :  { %v2065_v16 = vpop.xlane.xlu1 %2064  ;;  %2289 = vadd.xlane.f32.xlu0 %v2288_v44  ;;  %v2378_v4 = vmul.f32 %v5159_v6, %v5880_v52  ;;  %4881 = vmatpush3.bf16.msra.mxu1 %v2599_v30  ;;  %v2236_v45 = vpop.xlane.xlu0 %2235 }
 0x20b   :  { %v2125_v50 = vsub.f32 %v5838_v34, %v2065_v16  ;;  %4882 = vmatprep.mubr.msk.bf16.mxu1 %vm5265_vm1, %v5264_v0  ;;  %4892 = vmatprep.subr.bf16.mxu1 %v5264_v0  ;;  %5172 = vpow2.f32 %v2192_v38  ;;  %v100_v34 = vld [vmem:[%s6608_s2 + $0x14] sm:$0xf] }
 0x20c   :  { %v6054_v33 = vpop.eup %5160  ;;  %v2418_v42 = vpack.c.bf16 %v2378_v4, %v2378_v4  ;;  %5174 = vrcp.f32 %v2236_v45  ;;  %v2691_v8 = vsel %vm2459_vm2, %v100_v34, 0 }
 0x20d   :  { %v5163_v58 = vpop.eup %5162  ;;  %v2194_v51 = vmul.f32 1.442695, %v2125_v50  ;;  %v2291_v52 = vsel %vm135_vm0, %v6054_v33, 0.0 }
 0x20e   :  { %4877 = vmatmul.mubr.msk.bf16.vlgmr.msra.gmra.mxu0 %vm135_vm0, %v2418_v42  ;;  %2292 = vadd.xlane.f32.xlu1 %v2291_v52  ;;  %v2239_v9 = vpop.xlane.xlu1 %2238  ;;  %v2379_v60 = vmul.f32 %v5163_v58, %v5886_v59  ;;  %v2068_v19 = vpop.xlane.xlu0 %2067 }
 0x20f   :  { %5176 = vpow2.f32 %v2194_v51  ;;  %4887 = vmatpush3.bf16.msra.mxu0 %v2645_v43  ;;  %4888 = vmatprep.mubr.msk.bf16.mxu0 %vm5265_vm1, %v5264_v0  ;;  %v2126_v18 = vsub.f32 %v5840_v47, %v2068_v19 }
 0x210   :  { %v6066_v10 = vpop.eup %5164  ;;  %5178 = vrcp.f32 %v2239_v9  ;;  %v2419_v26 = vpack.c.bf16 %v2379_v60, %v2379_v60  ;;  %4898 = vmatprep.subr.bf16.mxu0 %v5264_v0 }
 0x211   :  { %v5167_v54 = vpop.eup %5166  ;;  %v2294_v59 = vsel %vm135_vm0, %v6066_v10, 0.0  ;;  %v2196_v17 = vmul.f32 1.442695, %v2126_v18 }
 0x212   :  { %4883 = vmatmul.mubr.msk.bf16.vlgmr.msra.gmra.mxu1 %vm135_vm0, %v2419_v26  ;;  %v2071_v27 = vpop.xlane.xlu1 %2070  ;;  %2295 = vadd.xlane.f32.xlu0 %v2294_v59  ;;  %v2380_v47 = vmul.f32 %v5167_v54, %v5894_v20  ;;  %v2242_v22 = vpop.xlane.xlu0 %2241 }
 0x213   :  { %v2127_v28 = vsub.f32 %v5842_v48, %v2071_v27  ;;  %4893 = vmatpush3.bf16.msra.mxu1 %v2691_v8  ;;  %4894 = vmatprep.mubr.msk.bf16.mxu1 %vm5265_vm1, %v5264_v0  ;;  %5180 = vpow2.f32 %v2196_v17  ;;  %v102_v48 = vld [vmem:[%s6608_s2 + $0x1c] sm:$0xf] }
 0x214   :  { %v6081_v35 = vpop.eup %5168  ;;  %v2420_v30 = vpack.c.bf16 %v2380_v47, %v2380_v47  ;;  %4904 = vmatprep.subr.bf16.mxu1 %v5264_v0  ;;  %5182 = vrcp.f32 %v2242_v22  ;;  %v2783_v45 = vsel %vm2459_vm2, %v102_v48, 0 }
 0x215   :  { %v5171_v6 = vpop.eup %5170  ;;  %v2198_v44 = vmul.f32 1.442695, %v2127_v28  ;;  %v2297_v20 = vsel %vm135_vm0, %v6081_v35, 0.0 }
 0x216   :  { %4889 = vmatmul.mubr.msk.bf16.vlgmr.msra.gmra.mxu0 %vm135_vm0, %v2420_v30  ;;  %2298 = vadd.xlane.f32.xlu1 %v2297_v20  ;;  %v2245_v37 = vpop.xlane.xlu1 %2244  ;;  %v2381_v38 = vmul.f32 %v5171_v6, %v5896_v24  ;;  %v2074_v16 = vpop.xlane.xlu0 %2073  ;;  %v103_v24 = vld [vmem:[%s6608_s2 + $0x20] sm:$0xf] }
 0x217   :  { %5184 = vpow2.f32 %v2198_v44  ;;  %4899 = vmatpush3.bf16.msra.mxu0 %v2737_v29  ;;  %4900 = vmatprep.mubr.msk.bf16.mxu0 %vm5265_vm1, %v5264_v0  ;;  %v2128_v4 = vsub.f32 %v5844_v61, %v2074_v16  ;;  %v2829_v19 = vsel %vm2459_vm2, %v103_v24, 0 }
 0x218   :  { %5186 = vrcp.f32 %v2245_v37  ;;  %v2421_v50 = vpack.c.bf16 %v2381_v38, %v2381_v38  ;;  %4910 = vmatprep.subr.bf16.mxu0 %v5264_v0  ;;  %v6097_v42 = vpop.eup %5172 }
 0x219   :  { %v5175_v43 = vpop.eup %5174  ;;  %v2200_v58 = vmul.f32 1.442695, %v2128_v4  ;;  %v2300_v52 = vsel %vm135_vm0, %v6097_v42, 0.0 }
 0x21a   :  { %4895 = vmatmul.mubr.msk.bf16.vlgmr.msra.gmra.mxu1 %vm135_vm0, %v2421_v50  ;;  %v2077_v51 = vpop.xlane.xlu1 %2076  ;;  %v2248_v34 = vpop.xlane.xlu0 %2247  ;;  %2301 = vadd.xlane.f32.xlu0 %v2300_v52  ;;  %v2382_v9 = vmul.f32 %v5175_v43, %v5908_v41  ;;  %v104_v41 = vld [vmem:[%s6608_s2 + $0x24] sm:$0xf] }
 0x21b   :  { %v2129_v61 = vsub.f32 %v5846_v62, %v2077_v51  ;;  %4905 = vmatpush3.bf16.msra.mxu1 %v2783_v45  ;;  %5188 = vpow2.f32 %v2200_v58  ;;  %4906 = vmatprep.mubr.msk.bf16.mxu1 %vm5265_vm1, %v5264_v0  ;;  %v2875_v47 = vsel %vm2459_vm2, %v104_v41, 0 }
 0x21c   :  { %v6107_v60 = vpop.eup %5176  ;;  %4916 = vmatprep.subr.bf16.mxu1 %v5264_v0  ;;  %5190 = vrcp.f32 %v2248_v34  ;;  %v2422_v8 = vpack.c.bf16 %v2382_v9, %v2382_v9 }
 0x21d   :  { %v5179_v18 = vpop.eup %5178  ;;  %v2202_v26 = vmul.f32 1.442695, %v2129_v61  ;;  %v2303_v62 = vsel %vm135_vm0, %v6107_v60, 0.0 }
 0x21e   :  { %2304 = vadd.xlane.f32.xlu1 %v2303_v62  ;;  %v2251_v54 = vpop.xlane.xlu1 %2250  ;;  %v2383_v59 = vmul.f32 %v5179_v18, %v5910_v49  ;;  %4901 = vmatmul.mubr.msk.bf16.vlgmr.msra.gmra.mxu0 %vm135_vm0, %v2422_v8  ;;  %v2080_v21 = vpop.xlane.xlu0 %2079  ;;  %v105_v49 = vld [vmem:[%s6608_s2 + $0x28] sm:$0xf] }
 0x21f   :  { %5192 = vpow2.f32 %v2202_v26  ;;  %v2130_v17 = vsub.f32 %v5848_v12, %v2080_v21  ;;  %4911 = vmatpush3.bf16.msra.mxu0 %v2829_v19  ;;  %4912 = vmatprep.mubr.msk.bf16.mxu0 %vm5265_vm1, %v5264_v0  ;;  %v2921_v37 = vsel %vm2459_vm2, %v105_v49, 0 }
 0x220   :  { %5194 = vrcp.f32 %v2251_v54  ;;  %v2423_v27 = vpack.c.bf16 %v2383_v59, %v2383_v59  ;;  %v6124_v28 = vpop.eup %5180  ;;  %4922 = vmatprep.subr.bf16.mxu0 %v5264_v0 }
 0x221   :  { %v5183_v22 = vpop.eup %5182  ;;  %v2204_v30 = vmul.f32 1.442695, %v2130_v17  ;;  %v2306_v29 = vsel %vm135_vm0, %v6124_v28, 0.0 }
 0x222   :  { %4907 = vmatmul.mubr.msk.bf16.vlgmr.msra.gmra.mxu1 %vm135_vm0, %v2423_v27  ;;  %v2083_v12 = vpop.xlane.xlu1 %2082  ;;  %v2254_v44 = vpop.xlane.xlu0 %2253  ;;  %2307 = vadd.xlane.f32.xlu0 %v2306_v29  ;;  %v2384_v20 = vmul.f32 %v5183_v22, %v5931_v11  ;;  %v106_v11 = vld [vmem:[%s6608_s2 + $0x2c] sm:$0xf] }
 0x223   :  { %v2131_v6 = vsub.f32 %v5850_v13, %v2083_v12  ;;  %4917 = vmatpush3.bf16.msra.mxu1 %v2875_v47  ;;  %5196 = vpow2.f32 %v2204_v30  ;;  %4918 = vmatprep.mubr.msk.bf16.mxu1 %vm5265_vm1, %v5264_v0  ;;  %v2967_v51 = vsel %vm2459_vm2, %v106_v11, 0 }
 0x224   :  { %v6135_v48 = vpop.eup %5184  ;;  %4928 = vmatprep.subr.bf16.mxu1 %v5264_v0  ;;  %5198 = vrcp.f32 %v2254_v44  ;;  %v2424_v4 = vpack.c.bf16 %v2384_v20, %v2384_v20 }
 0x225   :  { %v5187_v38 = vpop.eup %5186  ;;  %v2206_v16 = vmul.f32 1.442695, %v2131_v6  ;;  %v2309_v13 = vsel %vm135_vm0, %v6135_v48, 0.0 }
 0x226   :  { %2310 = vadd.xlane.f32.xlu1 %v2309_v13  ;;  %v2257_v50 = vpop.xlane.xlu1 %2256  ;;  %v2385_v45 = vmul.f32 %v5187_v38, %v5934_v5  ;;  %4913 = vmatmul.mubr.msk.bf16.vlgmr.msra.gmra.mxu0 %vm135_vm0, %v2424_v4  ;;  %v2086_v24 = vpop.xlane.xlu0 %2085  ;;  %v107_v5 = vld [vmem:[%s6608_s2 + $0x30] sm:$0xf] }
 0x227   :  { %5200 = vpow2.f32 %v2206_v16  ;;  %v2132_v43 = vsub.f32 %v5854_v39, %v2086_v24  ;;  %4923 = vmatpush3.bf16.msra.mxu0 %v2921_v37  ;;  %4924 = vmatprep.mubr.msk.bf16.mxu0 %vm5265_vm1, %v5264_v0  ;;  %v3013_v62 = vsel %vm2459_vm2, %v107_v5, 0 }
 0x228   :  { %5202 = vrcp.f32 %v2257_v50  ;;  %v2425_v58 = vpack.c.bf16 %v2385_v45, %v2385_v45  ;;  %v6152_v52 = vpop.eup %5188  ;;  %4934 = vmatprep.subr.bf16.mxu0 %v5264_v0 }
 0x229   :  { %v5191_v61 = vpop.eup %5190  ;;  %v2208_v34 = vmul.f32 1.442695, %v2132_v43  ;;  %v2312_v9 = vsel %vm135_vm0, %v6152_v52, 0.0 }
 0x22a   :  { %4919 = vmatmul.mubr.msk.bf16.vlgmr.msra.gmra.mxu1 %vm135_vm0, %v2425_v58  ;;  %v2089_v39 = vpop.xlane.xlu1 %2088  ;;  %v2260_v18 = vpop.xlane.xlu0 %2259  ;;  %2313 = vadd.xlane.f32.xlu0 %v2312_v9  ;;  %v2386_v26 = vmul.f32 %v5191_v61, %v5946_v32  ;;  %v108_v32 = vld [vmem:[%s6608_s2 + $0x34] sm:$0xf]  ;;  %v111_v61 = vld [vmem:[%s6608_s2 + $0x40] sm:$0xf] }
 0x22b   :  { %v2133_v19 = vsub.f32 %v5856_v40, %v2089_v39  ;;  %4929 = vmatpush3.bf16.msra.mxu1 %v2967_v51  ;;  %5204 = vpow2.f32 %v2208_v34  ;;  %4930 = vmatprep.mubr.msk.bf16.mxu1 %vm5265_vm1, %v5264_v0  ;;  %v3059_v22 = vsel %vm2459_vm2, %v108_v32, 0 }
 0x22c   :  { %v6163_v8 = vpop.eup %5192  ;;  %4940 = vmatprep.subr.bf16.mxu1 %v5264_v0  ;;  %5206 = vrcp.f32 %v2260_v18  ;;  %v2426_v59 = vpack.c.bf16 %v2386_v26, %v2386_v26 }
 0x22d   :  { %v5195_v41 = vpop.eup %5194  ;;  %v2210_v54 = vmul.f32 1.442695, %v2133_v19  ;;  %v2315_v40 = vsel %vm135_vm0, %v6163_v8, 0.0 }
 0x22e   :  { %2316 = vadd.xlane.f32.xlu1 %v2315_v40  ;;  %v2263_v21 = vpop.xlane.xlu1 %2262  ;;  %v2387_v17 = vmul.f32 %v5195_v41, %v5948_v15  ;;  %4925 = vmatmul.mubr.msk.bf16.vlgmr.msra.gmra.mxu0 %vm135_vm0, %v2426_v59  ;;  %v2092_v27 = vpop.xlane.xlu0 %2091  ;;  %v109_v15 = vld [vmem:[%s6608_s2 + $0x38] sm:$0xf] }
 0x22f   :  { %5208 = vpow2.f32 %v2210_v54  ;;  %v2134_v47 = vsub.f32 %v5860_v2, %v2092_v27  ;;  %4935 = vmatpush3.bf16.msra.mxu0 %v3013_v62  ;;  %4936 = vmatprep.mubr.msk.bf16.mxu0 %vm5265_vm1, %v5264_v0  ;;  %v3105_v16 = vsel %vm2459_vm2, %v109_v15, 0  ;;  %v3197_v62 = vsel %vm2459_vm2, %v111_v61, 0 }
 0x230   :  { %5210 = vrcp.f32 %v2263_v21  ;;  %v2427_v49 = vpack.c.bf16 %v2387_v17, %v2387_v17  ;;  %v6180_v30 = vpop.eup %5196  ;;  %4946 = vmatprep.subr.bf16.mxu0 %v5264_v0  ;;  %v113_v17 = vld [vmem:[%s6608_s2 + $0x48] sm:$0xf] }
 0x231   :  { %v5199_v12 = vpop.eup %5198  ;;  %v2212_v29 = vmul.f32 1.442695, %v2134_v47  ;;  %v2318_v6 = vsel %vm135_vm0, %v6180_v30, 0.0 }
 0x232   :  { %4931 = vmatmul.mubr.msk.bf16.vlgmr.msra.gmra.mxu1 %vm135_vm0, %v2427_v49  ;;  %v2095_v2 = vpop.xlane.xlu1 %2094  ;;  %2319 = vadd.xlane.f32.xlu0 %v2318_v6  ;;  %v2266_v20 = vpop.xlane.xlu0 %2265  ;;  %v2388_v37 = vmul.f32 %v5199_v12, %v5960_v53  ;;  %v110_v53 = vld [vmem:[%s6608_s2 + $0x3c] sm:$0xf] }
 0x233   :  { %v2135_v44 = vsub.f32 %v5862_v3, %v2095_v2  ;;  %4941 = vmatpush3.bf16.msra.mxu1 %v3059_v22  ;;  %5212 = vpow2.f32 %v2212_v29  ;;  %4942 = vmatprep.mubr.msk.bf16.mxu1 %vm5265_vm1, %v5264_v0  ;;  %v3151_v43 = vsel %vm2459_vm2, %v110_v53, 0  ;;  %v3289_v29 = vsel %vm2459_vm2, %v113_v17, 0  ;;  %v116_v53 = vld [vmem:[%s6608_s2 + $0x54] sm:$0xf] }
 0x234   :  { %v6191_v38 = vpop.eup %5200  ;;  %4952 = vmatprep.subr.bf16.mxu1 %v5264_v0  ;;  %5214 = vrcp.f32 %v2266_v20  ;;  %v2428_v11 = vpack.c.bf16 %v2388_v37, %v2388_v37 }
 0x235   :  { %v5203_v4 = vpop.eup %5202  ;;  %v2214_v13 = vmul.f32 1.442695, %v2135_v44  ;;  %v2321_v3 = vsel %vm135_vm0, %v6191_v38, 0.0 }
 0x236   :  { %2322 = vadd.xlane.f32.xlu1 %v2321_v3  ;;  %v2269_v50 = vpop.xlane.xlu1 %2268  ;;  %v2389_v45 = vmul.f32 %v5203_v4, %v5962_v1  ;;  %4937 = vmatmul.mubr.msk.bf16.vlgmr.msra.gmra.mxu0 %vm135_vm0, %v2428_v11 }
 0x237   :  { %5216 = vpow2.f32 %v2214_v13  ;;  %4947 = vmatpush3.bf16.msra.mxu0 %v3105_v16  ;;  %4948 = vmatprep.mubr.msk.bf16.mxu0 %vm5265_vm1, %v5264_v0 }
 0x238   :  { %5218 = vrcp.f32 %v2269_v50  ;;  %v2429_v24 = vpack.c.bf16 %v2389_v45, %v2389_v45  ;;  %v6207_v58 = vpop.eup %5204  ;;  %4958 = vmatprep.subr.bf16.mxu0 %v5264_v0 }
 0x239   :  { %v5207_v51 = vpop.eup %5206  ;;  %v2324_v1 = vsel %vm135_vm0, %v6207_v58, 0.0 }
 0x23a   :  { %4943 = vmatmul.mubr.msk.bf16.vlgmr.msra.gmra.mxu1 %vm135_vm0, %v2429_v24  ;;  %v2275_v5 = vpop.xlane.xlu1 %2274  ;;  %2325 = vadd.xlane.f32.xlu0 %v2324_v1  ;;  %v2390_v39 = vmul.f32 %v5207_v51, %v5974_v55  ;;  %v112_v55 = vld [vmem:[%s6608_s2 + $0x44] sm:$0xf]  ;;  %v117_v51 = vld [vmem:[%s6608_s2 + $0x58] sm:$0xf] }
 0x23b   :  { %5220 = vrcp.f32 %v2275_v5  ;;  %v2272_v34 = vpop.xlane.xlu0 %2271  ;;  %4953 = vmatpush3.bf16.msra.mxu1 %v3151_v43  ;;  %4954 = vmatprep.mubr.msk.bf16.mxu1 %vm5265_vm1, %v5264_v0  ;;  %v3243_v59 = vsel %vm2459_vm2, %v112_v55, 0  ;;  %v3473_v61 = vsel %vm2459_vm2, %v117_v51, 0 }
 0x23c   :  { %v6217_v9 = vpop.eup %5208  ;;  %5222 = vrcp.f32 %v2272_v34  ;;  %4964 = vmatprep.subr.bf16.mxu1 %v5264_v0  ;;  %v2430_v18 = vpack.c.bf16 %v2390_v39, %v2390_v39 }
 0x23d   :  { %v5211_v19 = vpop.eup %5210  ;;  %v2327_v26 = vsel %vm135_vm0, %v6217_v9, 0.0 }
 0x23e   :  { %2328 = vadd.xlane.f32.xlu1 %v2327_v26  ;;  %v2391_v41 = vmul.f32 %v5211_v19, %v5976_v36  ;;  %4949 = vmatmul.mubr.msk.bf16.vlgmr.msra.gmra.mxu0 %vm135_vm0, %v2430_v18  ;;  %v119_v26 = vld [vmem:[%s6608_s2 + $0x60] sm:$0xf] }
 0x23f   :  { %4959 = vmatpush3.bf16.msra.mxu0 %v3197_v62  ;;  %4960 = vmatprep.mubr.msk.bf16.mxu0 %vm5265_vm1, %v5264_v0 }
 0x240   :  { %v2431_v54 = vpack.c.bf16 %v2391_v41, %v2391_v41  ;;  %v6233_v40 = vpop.eup %5212  ;;  %4970 = vmatprep.subr.bf16.mxu0 %v5264_v0  ;;  %v3565_v41 = vsel %vm2459_vm2, %v119_v26, 0 }
 0x241   :  { %v5215_v32 = vpop.eup %5214  ;;  %v2330_v36 = vsel %vm135_vm0, %v6233_v40, 0.0 }
 0x242   :  { %4955 = vmatmul.mubr.msk.bf16.vlgmr.msra.gmra.mxu1 %vm135_vm0, %v2431_v54  ;;  %v2281_v21 = vpop.xlane.xlu1 %2280  ;;  %v2392_v27 = vmul.f32 %v5215_v32, %v5988_v7  ;;  %2331 = vadd.xlane.f32.xlu0 %v2330_v36  ;;  %v114_v7 = vld [vmem:[%s6608_s2 + $0x4c] sm:$0xf] }
 0x243   :  { %5224 = vrcp.f32 %v2281_v21  ;;  %v2278_v47 = vpop.xlane.xlu0 %2277  ;;  %4965 = vmatpush3.bf16.msra.mxu1 %v3243_v59  ;;  %4966 = vmatprep.mubr.msk.bf16.mxu1 %vm5265_vm1, %v5264_v0  ;;  %v3335_v20 = vsel %vm2459_vm2, %v114_v7, 0  ;;  %v122_v7 = vld [vmem:[%s6608_s2 + $0x6c] sm:$0xf] }
 0x244   :  { %v6243_v49 = vpop.eup %5216  ;;  %5226 = vrcp.f32 %v2278_v47  ;;  %4976 = vmatprep.subr.bf16.mxu1 %v5264_v0  ;;  %v2432_v15 = vpack.c.bf16 %v2392_v27, %v2392_v27  ;;  %v121_v27 = vld [vmem:[%s6608_s2 + $0x68] sm:$0xf] }
 0x245   :  { %v5219_v22 = vpop.eup %5218  ;;  %v2333_v12 = vsel %vm135_vm0, %v6243_v49, 0.0 }
 0x246   :  { %v2393_v2 = vmul.f32 %v5219_v22, %v5990_v46  ;;  %2334 = vadd.xlane.f32.xlu1 %v2333_v12  ;;  %4961 = vmatmul.mubr.msk.bf16.vlgmr.msra.gmra.mxu0 %vm135_vm0, %v2432_v15  ;;  %v115_v46 = vld [vmem:[%s6608_s2 + $0x50] sm:$0xf]  ;;  %v3657_v12 = vsel %vm2459_vm2, %v121_v27, 0  ;;  %v130_v27 = vld [vmem:[%s6608_s2 + $0x8c] sm:$0xf] }
 0x247   :  { %4971 = vmatpush3.bf16.msra.mxu0 %v3289_v29  ;;  %4972 = vmatprep.mubr.msk.bf16.mxu0 %vm5265_vm1, %v5264_v0 }
 0x248   :  { %v5221_v6 = vpop.eup %5220  ;;  %v2433_v44 = vpack.c.bf16 %v2393_v2, %v2393_v2  ;;  %4982 = vmatprep.subr.bf16.mxu0 %v5264_v0 }
 0x249   :  { %v5223_v37 = vpop.eup %5222  ;;  %v2395_v11 = vmul.f32 %v5221_v6, %v5998_v63  ;;  %v3427_v63 = vsel %vm2459_vm2, %v116_v53, 0 }
 0x24a   :  { %v2394_v16 = vmul.f32 %v5223_v37, %v6000_v25  ;;  %4967 = vmatmul.mubr.msk.bf16.vlgmr.msra.gmra.mxu1 %vm135_vm0, %v2433_v44  ;;  %v2287_v4 = vpop.xlane.xlu1 %2286  ;;  %v3381_v25 = vsel %vm2459_vm2, %v115_v46, 0  ;;  %v3703_v44 = vsel %vm2459_vm2, %v122_v7, 0  ;;  %v123_v37 = vld [vmem:[%s6608_s2 + $0x70] sm:$0xf] }
 0x24b   :  { %5228 = vrcp.f32 %v2287_v4  ;;  %v2284_v13 = vpop.xlane.xlu0 %2283  ;;  %4977 = vmatpush3.bf16.msra.mxu1 %v3335_v20  ;;  %4978 = vmatprep.mubr.msk.bf16.mxu1 %vm5265_vm1, %v5264_v0  ;;  %v2435_v45 = vpack.c.bf16 %v2395_v11, %v2395_v11  ;;  %v3749_v46 = vsel %vm2459_vm2, %v123_v37, 0  ;;  %v124_v11 = vld [vmem:[%s6608_s2 + $0x74] sm:$0xf] }
 0x24c   :  { %v2434_v3 = vpack.c.bf16 %v2394_v16, %v2394_v16  ;;  %5230 = vrcp.f32 %v2284_v13  ;;  %4988 = vmatprep.subr.bf16.mxu1 %v5264_v0  ;;  %v3795_v53 = vsel %vm2459_vm2, %v124_v11, 0 }
 0x24e   :  { %4973 = vmatmul.mubr.msk.bf16.vlgmr.msra.gmra.mxu0 %vm135_vm0, %v2434_v3 }
 0x24f   :  { %4983 = vmatpush3.bf16.msra.mxu0 %v3381_v25  ;;  %4984 = vmatprep.mubr.msk.bf16.mxu0 %vm5265_vm1, %v5264_v0 }
 0x250   :  { %v5225_v50 = vpop.eup %5224  ;;  %4994 = vmatprep.subr.bf16.mxu0 %v5264_v0 }
 0x251   :  { %v5227_v24 = vpop.eup %5226  ;;  %v2397_v5 = vmul.f32 %v5225_v50, %v6006_v14 }
 0x252   :  { %v2396_v43 = vmul.f32 %v5227_v24, %v6008_v57  ;;  %4979 = vmatmul.mubr.msk.bf16.vlgmr.msra.gmra.mxu1 %vm135_vm0, %v2435_v45  ;;  %v118_v57 = vld [vmem:[%s6608_s2 + $0x5c] sm:$0xf] }
 0x253   :  { %4989 = vmatpush3.bf16.msra.mxu1 %v3427_v63  ;;  %4990 = vmatprep.mubr.msk.bf16.mxu1 %vm5265_vm1, %v5264_v0  ;;  %v2437_v39 = vpack.c.bf16 %v2397_v5, %v2397_v5  ;;  %v3519_v19 = vsel %vm2459_vm2, %v118_v57, 0  ;;  %v126_v5 = vld [vmem:[%s6608_s2 + $0x7c] sm:$0xf] }
 0x254   :  { %v2436_v1 = vpack.c.bf16 %v2396_v43, %v2396_v43  ;;  %5000 = vmatprep.subr.bf16.mxu1 %v5264_v0  ;;  %v3887_v57 = vsel %vm2459_vm2, %v126_v5, 0 }
 0x256   :  { %4985 = vmatmul.mubr.msk.bf16.vlgmr.msra.gmra.mxu0 %vm135_vm0, %v2436_v1 }
 0x257   :  { %4995 = vmatpush3.bf16.msra.mxu0 %v3473_v61  ;;  %4996 = vmatprep.mubr.msk.bf16.mxu0 %vm5265_vm1, %v5264_v0 }
 0x258   :  { %v5229_v34 = vpop.eup %5228  ;;  %5006 = vmatprep.subr.bf16.mxu0 %v5264_v0 }
 0x259   :  { %v5231_v14 = vpop.eup %5230  ;;  %v2399_v62 = vmul.f32 %v5229_v34, %v6014_v56 }
 0x25a   :  { %v2398_v18 = vmul.f32 %v5231_v14, %v6016_v23  ;;  %4991 = vmatmul.mubr.msk.bf16.vlgmr.msra.gmra.mxu1 %vm135_vm0, %v2437_v39  ;;  %v120_v23 = vld [vmem:[%s6608_s2 + $0x64] sm:$0xf] }
 0x25b   :  { %5001 = vmatpush3.bf16.msra.mxu1 %v3519_v19  ;;  %5002 = vmatprep.mubr.msk.bf16.mxu1 %vm5265_vm1, %v5264_v0  ;;  %v2439_v54 = vpack.c.bf16 %v2399_v62, %v2399_v62  ;;  %v3611_v59 = vsel %vm2459_vm2, %v120_v23, 0  ;;  %v128_v62 = vld [vmem:[%s6608_s2 + $0x84] sm:$0xf] }
 0x25c   :  { %v2438_v55 = vpack.c.bf16 %v2398_v18, %v2398_v18  ;;  %5012 = vmatprep.subr.bf16.mxu1 %v5264_v0  ;;  %v3979_v23 = vsel %vm2459_vm2, %v128_v62, 0 }
 0x25e   :  { %4997 = vmatmul.mubr.msk.bf16.vlgmr.msra.gmra.mxu0 %vm135_vm0, %v2438_v55 }
 0x25f   :  { %5007 = vmatpush3.bf16.msra.mxu0 %v3565_v41  ;;  %5008 = vmatprep.mubr.msk.bf16.mxu0 %vm5265_vm1, %v5264_v0 }
 0x260   :  { %5018 = vmatprep.subr.bf16.mxu0 %v5264_v0 }
 0x262   :  { %5003 = vmatmul.mubr.msk.bf16.vlgmr.msra.gmra.mxu1 %vm135_vm0, %v2439_v54 }
 0x263   :  { %5013 = vmatpush3.bf16.msra.mxu1 %v3611_v59  ;;  %5014 = vmatprep.mubr.msk.bf16.mxu1 %vm5265_vm1, %v5264_v0 }
 0x264   :  { %5024 = vmatprep.subr.bf16.mxu1 %v5264_v0 }
 0x293   :  { %v2290_v56 = vpop.xlane.xlu0 %2289 }
 0x294   :  { %5232 = vrcp.f32 %v2290_v56 }
 0x297   :  { %v2293_v32 = vpop.xlane.xlu1 %2292 }
 0x298   :  { %5234 = vrcp.f32 %v2293_v32 }
 0x29b   :  { %v2296_v21 = vpop.xlane.xlu0 %2295 }
 0x29c   :  { %5236 = vrcp.f32 %v2296_v21 }
 0x29f   :  { %v2299_v36 = vpop.xlane.xlu1 %2298 }
 0x2a0   :  { %5238 = vrcp.f32 %v2299_v36 }
 0x2a1   :  { %v5233_v17 = vpop.eup %5232 }
 0x2a2   :  { %v2400_v47 = vmul.f32 %v5233_v17, %v6040_v31 }
 0x2a3   :  { %v2302_v15 = vpop.xlane.xlu0 %2301 }
 0x2a4   :  { %v2440_v22 = vpack.c.bf16 %v2400_v47, %v2400_v47  ;;  %5240 = vrcp.f32 %v2302_v15 }
 0x2a5   :  { %v5235_v29 = vpop.eup %5234 }
 0x2a6   :  { %v2401_v2 = vmul.f32 %v5235_v29, %v6054_v33  ;;  %5009 = vmatmul.mubr.msk.bf16.vlgmr.msra.gmra.mxu0 %vm135_vm0, %v2440_v22  ;;  %v4071_v29 = vsel %vm2459_vm2, %v130_v27, 0 }
 0x2a7   :  { %v2305_v6 = vpop.xlane.xlu1 %2304  ;;  %5019 = vmatpush3.bf16.msra.mxu0 %v3657_v12  ;;  %5020 = vmatprep.mubr.msk.bf16.mxu0 %vm5265_vm1, %v5264_v0 }
 0x2a8   :  { %v2441_v31 = vpack.c.bf16 %v2401_v2, %v2401_v2  ;;  %5242 = vrcp.f32 %v2305_v6  ;;  %5030 = vmatprep.subr.bf16.mxu0 %v5264_v0 }
 0x2a9   :  { %v5237_v20 = vpop.eup %5236 }
 0x2aa   :  { %v2402_v33 = vmul.f32 %v5237_v20, %v6066_v10  ;;  %5015 = vmatmul.mubr.msk.bf16.vlgmr.msra.gmra.mxu1 %vm135_vm0, %v2441_v31  ;;  %v131_v31 = vld [vmem:[%s6608_s2 + $0x90] sm:$0xf] }
 0x2ab   :  { %5025 = vmatpush3.bf16.msra.mxu1 %v3703_v44  ;;  %5026 = vmatprep.mubr.msk.bf16.mxu1 %vm5265_vm1, %v5264_v0  ;;  %v2308_v4 = vpop.xlane.xlu0 %2307 }
 0x2ac   :  { %v2442_v16 = vpack.c.bf16 %v2402_v33, %v2402_v33  ;;  %5036 = vmatprep.subr.bf16.mxu1 %v5264_v0  ;;  %5244 = vrcp.f32 %v2308_v4 }
 0x2ad   :  { %v5239_v13 = vpop.eup %5238 }
 0x2ae   :  { %v2403_v10 = vmul.f32 %v5239_v13, %v6081_v35  ;;  %5021 = vmatmul.mubr.msk.bf16.vlgmr.msra.gmra.mxu0 %vm135_vm0, %v2442_v16  ;;  %v125_v35 = vld [vmem:[%s6608_s2 + $0x78] sm:$0xf]  ;;  %v132_v13 = vld [vmem:[%s6608_s2 + $0x94] sm:$0xf] }
 0x2af   :  { %v2311_v3 = vpop.xlane.xlu1 %2310  ;;  %5031 = vmatpush3.bf16.msra.mxu0 %v3749_v46  ;;  %5032 = vmatprep.mubr.msk.bf16.mxu0 %vm5265_vm1, %v5264_v0  ;;  %v3841_v51 = vsel %vm2459_vm2, %v125_v35, 0 }
 0x2b0   :  { %v2443_v25 = vpack.c.bf16 %v2403_v10, %v2403_v10  ;;  %5246 = vrcp.f32 %v2311_v3  ;;  %5042 = vmatprep.subr.bf16.mxu0 %v5264_v0 }
 0x2b1   :  { %v5241_v50 = vpop.eup %5240 }
 0x2b2   :  { %5027 = vmatmul.mubr.msk.bf16.vlgmr.msra.gmra.mxu1 %vm135_vm0, %v2443_v25  ;;  %v2404_v45 = vmul.f32 %v5241_v50, %v6097_v42 }
 0x2b3   :  { %5037 = vmatpush3.bf16.msra.mxu1 %v3795_v53  ;;  %5038 = vmatprep.mubr.msk.bf16.mxu1 %vm5265_vm1, %v5264_v0  ;;  %v2314_v63 = vpop.xlane.xlu0 %2313 }
 0x2b4   :  { %5048 = vmatprep.subr.bf16.mxu1 %v5264_v0  ;;  %v2444_v43 = vpack.c.bf16 %v2404_v45, %v2404_v45  ;;  %5248 = vrcp.f32 %v2314_v63  ;;  %v4163_v45 = vsel %vm2459_vm2, %v132_v13, 0 }
 0x2b5   :  { %v5243_v24 = vpop.eup %5242 }
 0x2b6   :  { %v2405_v1 = vmul.f32 %v5243_v24, %v6107_v60  ;;  %5033 = vmatmul.mubr.msk.bf16.vlgmr.msra.gmra.mxu0 %vm135_vm0, %v2444_v43  ;;  %v127_v60 = vld [vmem:[%s6608_s2 + $0x80] sm:$0xf]  ;;  %v133_v43 = vld [vmem:[%s6608_s2 + $0x98] sm:$0xf] }
 0x2b7   :  { %v2317_v42 = vpop.xlane.xlu1 %2316  ;;  %5043 = vmatpush3.bf16.msra.mxu0 %v3841_v51  ;;  %5044 = vmatprep.mubr.msk.bf16.mxu0 %vm5265_vm1, %v5264_v0  ;;  %v3933_v26 = vsel %vm2459_vm2, %v127_v60, 0 }
 0x2b8   :  { %v2445_v61 = vpack.c.bf16 %v2405_v1, %v2405_v1  ;;  %5250 = vrcp.f32 %v2317_v42  ;;  %5054 = vmatprep.subr.bf16.mxu0 %v5264_v0 }
 0x2b9   :  { %v5245_v34 = vpop.eup %5244 }
 0x2ba   :  { %5039 = vmatmul.mubr.msk.bf16.vlgmr.msra.gmra.mxu1 %vm135_vm0, %v2445_v61  ;;  %v2406_v39 = vmul.f32 %v5245_v34, %v6124_v28  ;;  %v4209_v34 = vsel %vm2459_vm2, %v133_v43, 0 }
 0x2bb   :  { %5049 = vmatpush3.bf16.msra.mxu1 %v3887_v57  ;;  %5050 = vmatprep.mubr.msk.bf16.mxu1 %vm5265_vm1, %v5264_v0  ;;  %v2320_v19 = vpop.xlane.xlu0 %2319 }
 0x2bc   :  { %5060 = vmatprep.subr.bf16.mxu1 %v5264_v0  ;;  %v2446_v18 = vpack.c.bf16 %v2406_v39, %v2406_v39  ;;  %5252 = vrcp.f32 %v2320_v19 }
 0x2bd   :  { %v5247_v14 = vpop.eup %5246 }
 0x2be   :  { %v2407_v55 = vmul.f32 %v5247_v14, %v6135_v48  ;;  %5045 = vmatmul.mubr.msk.bf16.vlgmr.msra.gmra.mxu0 %vm135_vm0, %v2446_v18  ;;  %v129_v48 = vld [vmem:[%s6608_s2 + $0x88] sm:$0xf] }
 0x2bf   :  { %v2323_v28 = vpop.xlane.xlu1 %2322  ;;  %5055 = vmatpush3.bf16.msra.mxu0 %v3933_v26  ;;  %5056 = vmatprep.mubr.msk.bf16.mxu0 %vm5265_vm1, %v5264_v0  ;;  %v4025_v17 = vsel %vm2459_vm2, %v129_v48, 0 }
 0x2c0   :  { %v2447_v41 = vpack.c.bf16 %v2407_v55, %v2407_v55  ;;  %5254 = vrcp.f32 %v2323_v28  ;;  %5066 = vmatprep.subr.bf16.mxu0 %v5264_v0 }
 0x2c1   :  { %v5249_v54 = vpop.eup %5248 }
 0x2c2   :  { %5051 = vmatmul.mubr.msk.bf16.vlgmr.msra.gmra.mxu1 %vm135_vm0, %v2447_v41  ;;  %v2408_v59 = vmul.f32 %v5249_v54, %v6152_v52 }
 0x2c3   :  { %5061 = vmatpush3.bf16.msra.mxu1 %v3979_v23  ;;  %5062 = vmatprep.mubr.msk.bf16.mxu1 %vm5265_vm1, %v5264_v0  ;;  %v2326_v56 = vpop.xlane.xlu0 %2325 }
 0x2c4   :  { %5072 = vmatprep.subr.bf16.mxu1 %v5264_v0  ;;  %v2448_v21 = vpack.c.bf16 %v2408_v59, %v2408_v59  ;;  %5256 = vrcp.f32 %v2326_v56 }
 0x2c5   :  { %v5251_v32 = vpop.eup %5250  ;;  %v2497_v36 = vpop.f32.mrf.mxu0 }
 0x2c6   :  { %v2409_v52 = vmul.f32 %v5251_v32, %v6163_v8  ;;  %v4297_v47 = vpack.c.bf16 %v2497_v36, %v2497_v36  ;;  %5057 = vmatmul.mubr.msk.bf16.vlgmr.msra.gmra.mxu0 %vm135_vm0, %v2448_v21 }
 0x2c7   :  { %v2329_v22 = vpop.xlane.xlu1 %2328  ;;  %v4866_v15 = vpop.f32.mrf.mxu0  ;;  %5067 = vmatpush3.bf16.msra.mxu0 %v4025_v17  ;;  %5068 = vmatprep.mubr.msk.bf16.mxu0 %vm5265_vm1, %v5264_v0 }
 0x2c8   :  { %v2449_v12 = vpack.c.bf16 %v2409_v52, %v2409_v52  ;;  %4338 = vst.msk [vmem:[%s6609_s3] sm:$0xf] %vm4337_vm3, %v4297_v47  ;;  %5258 = vrcp.f32 %v2329_v22  ;;  %5078 = vmatprep.subr.bf16.mxu0 %v5264_v0 }
 0x2c9   :  { %v2500_v7 = vpop.f32.mrf.mxu0  ;;  %v2543_v8 = vpop.f32.mrf.mxu1 }
 0x2ca   :  { %v5253_v2 = vpop.eup %5252  ;;  %v4298_v6 = vpack.c.bf16 %v2543_v8, %v2543_v8  ;;  %5063 = vmatmul.mubr.msk.bf16.vlgmr.msra.gmra.mxu1 %vm135_vm0, %v2449_v12 }
 0x2cb   :  { %v2410_v44 = vmul.f32 %v5253_v2, %v6180_v30  ;;  %v4872_v20 = vpop.f32.mrf.mxu1  ;;  %5073 = vmatpush3.bf16.msra.mxu1 %v4071_v29  ;;  %v4867_v37 = vpop.f32.mrf.mxu0  ;;  %5074 = vmatprep.mubr.msk.bf16.mxu1 %vm5265_vm1, %v5264_v0  ;;  %v4117_v30 = vsel %vm2459_vm2, %v131_v31, 0 }
 0x2cc   :  { %4339 = vst.msk [vmem:[%s6609_s3 + $0x4] sm:$0xf] %vm4337_vm3, %v4298_v6  ;;  %v2332_v33 = vpop.xlane.xlu0 %2331  ;;  %5084 = vmatprep.subr.bf16.mxu1 %v5264_v0 }
 0x2cd   :  { %v5255_v16 = vpop.eup %5254  ;;  %v2450_v4 = vpack.c.bf16 %v2410_v44, %v2410_v44  ;;  %5260 = vrcp.f32 %v2332_v33  ;;  %v2546_v46 = vpop.f32.mrf.mxu1 }
 0x2ce   :  { %v2411_v11 = vmul.f32 %v5255_v16, %v6191_v38  ;;  %v2589_v10 = vpop.f32.mrf.mxu0 }
 0x2cf   :  { %v4299_v3 = vpack.c.bf16 %v2589_v10, %v2589_v10  ;;  %5069 = vmatmul.mubr.msk.bf16.vlgmr.msra.gmra.mxu0 %vm135_vm0, %v2450_v4  ;;  %v4873_v25 = vpop.f32.mrf.mxu1  ;;  %v2335_v53 = vpop.xlane.xlu1 %2334 }
 0x2d0   :  { %v2451_v50 = vpack.c.bf16 %v2411_v11, %v2411_v11  ;;  %5262 = vrcp.f32 %v2335_v53  ;;  %v4878_v35 = vpop.f32.mrf.mxu0  ;;  %5079 = vmatpush3.bf16.msra.mxu0 %v4117_v30  ;;  %5080 = vmatprep.mubr.msk.bf16.mxu0 %vm5265_vm1, %v5264_v0 }
 0x2d1   :  { %4340 = vst.msk [vmem:[%s6609_s3 + $0x8] sm:$0xf] %vm4337_vm3, %v4299_v3  ;;  %5090 = vmatprep.subr.bf16.mxu0 %v5264_v0  ;;  %v5257_v38 = vpop.eup %5256 }
 0x2d2   :  { %v2592_v63 = vpop.f32.mrf.mxu0  ;;  %v2635_v24 = vpop.f32.mrf.mxu1  ;;  %5075 = vmatmul.mubr.msk.bf16.vlgmr.msra.gmra.mxu1 %vm135_vm0, %v2451_v50  ;;  %v2412_v51 = vmul.f32 %v5257_v38, %v6207_v58  ;;  %v134_v58 = vld [vmem:[%s6608_s2 + $0x9c] sm:$0xf] }
 0x2d3   :  { %v4300_v5 = vpack.c.bf16 %v2635_v24, %v2635_v24  ;;  %5085 = vmatpush3.bf16.msra.mxu1 %v4163_v45  ;;  %5086 = vmatprep.mubr.msk.bf16.mxu1 %vm5265_vm1, %v5264_v0  ;;  %v4255_v55 = vsel %vm2459_vm2, %v134_v58, 0 }
 0x2d4   :  { %v4879_v1 = vpop.f32.mrf.mxu0  ;;  %v4884_v42 = vpop.f32.mrf.mxu1  ;;  %5096 = vmatprep.subr.bf16.mxu1 %v5264_v0  ;;  %v2452_v57 = vpack.c.bf16 %v2412_v51, %v2412_v51 }
 0x2d5   :  { %v5259_v61 = vpop.eup %5258  ;;  %4341 = vst.msk [vmem:[%s6609_s3 + $0xc] sm:$0xf] %vm4337_vm3, %v4300_v5 }
 0x2d6   :  { %v2413_v60 = vmul.f32 %v5259_v61, %v6217_v9  ;;  %v2638_v39 = vpop.f32.mrf.mxu1  ;;  %v2681_v19 = vpop.f32.mrf.mxu0 }
 0x2d7   :  { %v4301_v14 = vpack.c.bf16 %v2681_v19, %v2681_v19  ;;  %5081 = vmatmul.mubr.msk.bf16.vlgmr.msra.gmra.mxu0 %vm135_vm0, %v2452_v57 }
 0x2d8   :  { %v2453_v18 = vpack.c.bf16 %v2413_v60, %v2413_v60  ;;  %v4885_v26 = vpop.f32.mrf.mxu1  ;;  %v4890_v62 = vpop.f32.mrf.mxu0  ;;  %5091 = vmatpush3.bf16.msra.mxu0 %v4209_v34  ;;  %5092 = vmatprep.mubr.msk.bf16.mxu0 %vm5265_vm1, %v5264_v0 }
 0x2d9   :  { %4342 = vst.msk [vmem:[%s6609_s3 + $0x10] sm:$0xf] %vm4337_vm3, %v4301_v14 }
 0x2da   :  { %v5261_v9 = vpop.eup %5260  ;;  %v2684_v28 = vpop.f32.mrf.mxu0  ;;  %5087 = vmatmul.mubr.msk.bf16.vlgmr.msra.gmra.mxu1 %vm135_vm0, %v2453_v18 }
 0x2db   :  { %v2727_v41 = vpop.f32.mrf.mxu1  ;;  %v2414_v23 = vmul.f32 %v5261_v9, %v6233_v40  ;;  %5097 = vmatpush3.bf16.msra.mxu1 %v4255_v55  ;;  %5098 = vmatprep.mubr.msk.bf16.mxu1 %vm5265_vm1, %v5264_v0 }
 0x2dc   :  { %v4302_v54 = vpack.c.bf16 %v2727_v41, %v2727_v41  ;;  %v4891_v48 = vpop.f32.mrf.mxu0 }
 0x2dd   :  { %v4896_v59 = vpop.f32.mrf.mxu1  ;;  %v5263_v56 = vpop.eup %5262  ;;  %v2454_v32 = vpack.c.bf16 %v2414_v23, %v2414_v23 }
 0x2de   :  { %4343 = vst.msk [vmem:[%s6609_s3 + $0x14] sm:$0xf] %vm4337_vm3, %v4302_v54  ;;  %v2415_v21 = vmul.f32 %v5263_v56, %v6243_v49  ;;  %v2773_v17 = vpop.f32.mrf.mxu0 }
 0x2df   :  { %v2730_v36 = vpop.f32.mrf.mxu1  ;;  %5093 = vmatmul.mubr.msk.bf16.vlgmr.msra.gmra.mxu0 %vm135_vm0, %v2454_v32  ;;  %v4303_v27 = vpack.c.bf16 %v2773_v17, %v2773_v17 }
 0x2e0   :  { %v2455_v40 = vpack.c.bf16 %v2415_v21, %v2415_v21  ;;  %v4902_v47 = vpop.f32.mrf.mxu0 }
 0x2e1   :  { %v4897_v52 = vpop.f32.mrf.mxu1  ;;  %4344 = vst.msk [vmem:[%s6609_s3 + $0x18] sm:$0xf] %vm4337_vm3, %v4303_v27 }
 0x2e2   :  { %5099 = vmatmul.mubr.msk.bf16.vlgmr.msra.gmra.mxu1 %vm135_vm0, %v2455_v40  ;;  %v2776_v22 = vpop.f32.mrf.mxu0 }
 0x2e3   :  { %v2819_v0 = vpop.f32.mrf.mxu1 }
 0x2e4   :  { %v4304_v15 = vpack.c.bf16 %v2819_v0, %v2819_v0  ;;  %v4903_v49 = vpop.f32.mrf.mxu0 }
 0x2e5   :  { %v4908_v12 = vpop.f32.mrf.mxu1 }
 0x2e6   :  { %4345 = vst.msk [vmem:[%s6609_s3 + $0x1c] sm:$0xf] %vm4337_vm3, %v4304_v15  ;;  %v2865_v7 = vpop.f32.mrf.mxu0 }
 0x2e7   :  { %v2822_v29 = vpop.f32.mrf.mxu1  ;;  %v4305_v8 = vpack.c.bf16 %v2865_v7, %v2865_v7 }
 0x2e8   :  { %v4914_v6 = vpop.f32.mrf.mxu0 }
 0x2e9   :  { %v4909_v2 = vpop.f32.mrf.mxu1  ;;  %4346 = vst.msk [vmem:[%s6609_s3 + $0x20] sm:$0xf] %vm4337_vm3, %v4305_v8 }
 0x2ea   :  { %v2868_v44 = vpop.f32.mrf.mxu0 }
 0x2eb   :  { %v2911_v31 = vpop.f32.mrf.mxu1 }
 0x2ec   :  { %v4306_v20 = vpack.c.bf16 %v2911_v31, %v2911_v31  ;;  %v4915_v33 = vpop.f32.mrf.mxu0 }
 0x2ed   :  { %v4920_v37 = vpop.f32.mrf.mxu1 }
 0x2ee   :  { %4347 = vst.msk [vmem:[%s6609_s3 + $0x24] sm:$0xf] %vm4337_vm3, %v4306_v20  ;;  %v2957_v4 = vpop.f32.mrf.mxu0 }
 0x2ef   :  { %v2914_v16 = vpop.f32.mrf.mxu1  ;;  %v4307_v46 = vpack.c.bf16 %v2957_v4, %v2957_v4 }
 0x2f0   :  { %v4926_v13 = vpop.f32.mrf.mxu0 }
 0x2f1   :  { %v4921_v30 = vpop.f32.mrf.mxu1  ;;  %4348 = vst.msk [vmem:[%s6609_s3 + $0x28] sm:$0xf] %vm4337_vm3, %v4307_v46 }
 0x2f2   :  { %v2960_v10 = vpop.f32.mrf.mxu0 }
 0x2f3   :  { %v3003_v11 = vpop.f32.mrf.mxu1 }
 0x2f4   :  { %v4308_v3 = vpack.c.bf16 %v3003_v11, %v3003_v11  ;;  %v4927_v53 = vpop.f32.mrf.mxu0 }
 0x2f5   :  { %v4932_v25 = vpop.f32.mrf.mxu1 }
 0x2f6   :  { %4349 = vst.msk [vmem:[%s6609_s3 + $0x2c] sm:$0xf] %vm4337_vm3, %v4308_v3  ;;  %v3049_v35 = vpop.f32.mrf.mxu0 }
 0x2f7   :  { %v3006_v50 = vpop.f32.mrf.mxu1  ;;  %v4309_v45 = vpack.c.bf16 %v3049_v35, %v3049_v35 }
 0x2f8   :  { %v4938_v63 = vpop.f32.mrf.mxu0 }
 0x2f9   :  { %v4933_v38 = vpop.f32.mrf.mxu1  ;;  %4350 = vst.msk [vmem:[%s6609_s3 + $0x30] sm:$0xf] %vm4337_vm3, %v4309_v45 }
 0x2fa   :  { %v3052_v43 = vpop.f32.mrf.mxu0 }
 0x2fb   :  { %v3095_v24 = vpop.f32.mrf.mxu1 }
 0x2fc   :  { %v4310_v51 = vpack.c.bf16 %v3095_v24, %v3095_v24  ;;  %v4939_v1 = vpop.f32.mrf.mxu0 }
 0x2fd   :  { %v4944_v5 = vpop.f32.mrf.mxu1 }
 0x2fe   :  { %4351 = vst.msk [vmem:[%s6609_s3 + $0x34] sm:$0xf] %vm4337_vm3, %v4310_v51  ;;  %v3141_v61 = vpop.f32.mrf.mxu0 }
 0x2ff   :  { %v3098_v42 = vpop.f32.mrf.mxu1  ;;  %v4311_v57 = vpack.c.bf16 %v3141_v61, %v3141_v61 }
 0x300   :  { %v4950_v58 = vpop.f32.mrf.mxu0 }
 0x301   :  { %v4945_v34 = vpop.f32.mrf.mxu1  ;;  %4352 = vst.msk [vmem:[%s6609_s3 + $0x38] sm:$0xf] %vm4337_vm3, %v4311_v57 }
 0x302   :  { %v3144_v39 = vpop.f32.mrf.mxu0 }
 0x303   :  { %v3187_v60 = vpop.f32.mrf.mxu1 }
 0x304   :  { %v4312_v19 = vpack.c.bf16 %v3187_v60, %v3187_v60  ;;  %v4951_v18 = vpop.f32.mrf.mxu0 }
 0x305   :  { %v4956_v14 = vpop.f32.mrf.mxu1 }
 0x306   :  { %4353 = vst.msk [vmem:[%s6609_s3 + $0x3c] sm:$0xf] %vm4337_vm3, %v4312_v19  ;;  %v3233_v62 = vpop.f32.mrf.mxu0 }
 0x307   :  { %v3190_v26 = vpop.f32.mrf.mxu1  ;;  %v4313_v55 = vpack.c.bf16 %v3233_v62, %v3233_v62 }
 0x308   :  { %v4962_v28 = vpop.f32.mrf.mxu0 }
 0x309   :  { %v4957_v9 = vpop.f32.mrf.mxu1  ;;  %4354 = vst.msk [vmem:[%s6609_s3 + $0x40] sm:$0xf] %vm4337_vm3, %v4313_v55 }
 0x30a   :  { %v3236_v23 = vpop.f32.mrf.mxu0 }
 0x30b   :  { %v3279_v41 = vpop.f32.mrf.mxu1 }
 0x30c   :  { %v4314_v54 = vpack.c.bf16 %v3279_v41, %v3279_v41  ;;  %v4963_v59 = vpop.f32.mrf.mxu0 }
 0x30d   :  { %v4968_v48 = vpop.f32.mrf.mxu1 }
 0x30e   :  { %4355 = vst.msk [vmem:[%s6609_s3 + $0x44] sm:$0xf] %vm4337_vm3, %v4314_v54  ;;  %v3325_v32 = vpop.f32.mrf.mxu0 }
 0x30f   :  { %v3282_v56 = vpop.f32.mrf.mxu1  ;;  %v4315_v21 = vpack.c.bf16 %v3325_v32, %v3325_v32 }
 0x310   :  { %v4974_v17 = vpop.f32.mrf.mxu0 }
 0x311   :  { %v4969_v36 = vpop.f32.mrf.mxu1  ;;  %4356 = vst.msk [vmem:[%s6609_s3 + $0x48] sm:$0xf] %vm4337_vm3, %v4315_v21 }
 0x312   :  { %v3328_v27 = vpop.f32.mrf.mxu0 }
 0x313   :  { %v3371_v40 = vpop.f32.mrf.mxu1 }
 0x314   :  { %v4316_v52 = vpack.c.bf16 %v3371_v40, %v3371_v40  ;;  %v4975_v0 = vpop.f32.mrf.mxu0 }
 0x315   :  { %v4980_v47 = vpop.f32.mrf.mxu1 }
 0x316   :  { %4357 = vst.msk [vmem:[%s6609_s3 + $0x4c] sm:$0xf] %vm4337_vm3, %v4316_v52  ;;  %v3417_v15 = vpop.f32.mrf.mxu0 }
 0x317   :  { %v3374_v22 = vpop.f32.mrf.mxu1  ;;  %v4317_v12 = vpack.c.bf16 %v3417_v15, %v3417_v15 }
 0x318   :  { %v4986_v29 = vpop.f32.mrf.mxu0 }
 0x319   :  { %v4981_v49 = vpop.f32.mrf.mxu1  ;;  %4358 = vst.msk [vmem:[%s6609_s3 + $0x50] sm:$0xf] %vm4337_vm3, %v4317_v12 }
 0x31a   :  { %v3420_v8 = vpop.f32.mrf.mxu0 }
 0x31b   :  { %v3463_v7 = vpop.f32.mrf.mxu1 }
 0x31c   :  { %v4318_v2 = vpack.c.bf16 %v3463_v7, %v3463_v7  ;;  %v4987_v31 = vpop.f32.mrf.mxu0 }
 0x31d   :  { %v4992_v6 = vpop.f32.mrf.mxu1 }
 0x31e   :  { %4359 = vst.msk [vmem:[%s6609_s3 + $0x54] sm:$0xf] %vm4337_vm3, %v4318_v2  ;;  %v3509_v20 = vpop.f32.mrf.mxu0 }
 0x31f   :  { %v3466_v44 = vpop.f32.mrf.mxu1  ;;  %v4319_v37 = vpack.c.bf16 %v3509_v20, %v3509_v20 }
 0x320   :  { %v4998_v16 = vpop.f32.mrf.mxu0 }
 0x321   :  { %v4993_v33 = vpop.f32.mrf.mxu1  ;;  %4360 = vst.msk [vmem:[%s6609_s3 + $0x58] sm:$0xf] %vm4337_vm3, %v4319_v37 }
 0x322   :  { %v3512_v46 = vpop.f32.mrf.mxu0 }
 0x323   :  { %v3555_v4 = vpop.f32.mrf.mxu1 }
 0x324   :  { %v4320_v30 = vpack.c.bf16 %v3555_v4, %v3555_v4  ;;  %v4999_v11 = vpop.f32.mrf.mxu0 }
 0x325   :  { %v5004_v13 = vpop.f32.mrf.mxu1 }
 0x326   :  { %4361 = vst.msk [vmem:[%s6609_s3 + $0x5c] sm:$0xf] %vm4337_vm3, %v4320_v30 }
 0x327   :  { %v3558_v10 = vpop.f32.mrf.mxu1 }
 0x329   :  { %v5005_v3 = vpop.f32.mrf.mxu1 }
 0x366   :  { %v3601_v25 = vpop.f32.mrf.mxu0 }
 0x367   :  { %v4321_v53 = vpack.c.bf16 %v3601_v25, %v3601_v25 }
 0x368   :  { %v5010_v50 = vpop.f32.mrf.mxu0 }
 0x369   :  { %4362 = vst.msk [vmem:[%s6609_s3 + $0x60] sm:$0xf] %vm4337_vm3, %v4321_v53 }
 0x36a   :  { %v3604_v35 = vpop.f32.mrf.mxu0  ;;  %v3647_v45 = vpop.f32.mrf.mxu1 }
 0x36b   :  { %v4322_v38 = vpack.c.bf16 %v3647_v45, %v3647_v45 }
 0x36c   :  { %v5011_v63 = vpop.f32.mrf.mxu0  ;;  %v5016_v24 = vpop.f32.mrf.mxu1 }
 0x36d   :  { %4363 = vst.msk [vmem:[%s6609_s3 + $0x64] sm:$0xf] %vm4337_vm3, %v4322_v38 }
 0x36e   :  { %v3650_v43 = vpop.f32.mrf.mxu1  ;;  %v3693_v51 = vpop.f32.mrf.mxu0 }
 0x36f   :  { %v4323_v5 = vpack.c.bf16 %v3693_v51, %v3693_v51 }
 0x370   :  { %v5017_v1 = vpop.f32.mrf.mxu1  ;;  %v5022_v42 = vpop.f32.mrf.mxu0 }
 0x371   :  { %4364 = vst.msk [vmem:[%s6609_s3 + $0x68] sm:$0xf] %vm4337_vm3, %v4323_v5 }
 0x372   :  { %v3696_v61 = vpop.f32.mrf.mxu0  ;;  %v3739_v57 = vpop.f32.mrf.mxu1 }
 0x373   :  { %v4324_v34 = vpack.c.bf16 %v3739_v57, %v3739_v57 }
 0x374   :  { %v5023_v58 = vpop.f32.mrf.mxu0  ;;  %v5028_v60 = vpop.f32.mrf.mxu1 }
 0x375   :  { %4365 = vst.msk [vmem:[%s6609_s3 + $0x6c] sm:$0xf] %vm4337_vm3, %v4324_v34 }
 0x376   :  { %v3742_v39 = vpop.f32.mrf.mxu1  ;;  %v3785_v19 = vpop.f32.mrf.mxu0 }
 0x377   :  { %v4325_v14 = vpack.c.bf16 %v3785_v19, %v3785_v19 }
 0x378   :  { %v5029_v18 = vpop.f32.mrf.mxu1  ;;  %v5034_v26 = vpop.f32.mrf.mxu0 }
 0x379   :  { %4366 = vst.msk [vmem:[%s6609_s3 + $0x70] sm:$0xf] %vm4337_vm3, %v4325_v14 }
 0x37a   :  { %v3831_v62 = vpop.f32.mrf.mxu1  ;;  %v3788_v55 = vpop.f32.mrf.mxu0 }
 0x37b   :  { %v4326_v9 = vpack.c.bf16 %v3831_v62, %v3831_v62 }
 0x37c   :  { %v5040_v28 = vpop.f32.mrf.mxu1  ;;  %v5035_v41 = vpop.f32.mrf.mxu0 }
 0x37d   :  { %4367 = vst.msk [vmem:[%s6609_s3 + $0x74] sm:$0xf] %vm4337_vm3, %v4326_v9 }
 0x37e   :  { %v3834_v23 = vpop.f32.mrf.mxu1  ;;  %v3877_v54 = vpop.f32.mrf.mxu0 }
 0x37f   :  { %v4327_v48 = vpack.c.bf16 %v3877_v54, %v3877_v54 }
 0x380   :  { %v5041_v59 = vpop.f32.mrf.mxu1  ;;  %v5046_v56 = vpop.f32.mrf.mxu0 }
 0x381   :  { %4368 = vst.msk [vmem:[%s6609_s3 + $0x78] sm:$0xf] %vm4337_vm3, %v4327_v48 }
 0x382   :  { %v3923_v32 = vpop.f32.mrf.mxu1  ;;  %v3880_v21 = vpop.f32.mrf.mxu0 }
 0x383   :  { %v4328_v36 = vpack.c.bf16 %v3923_v32, %v3923_v32 }
 0x384   :  { %v5052_v17 = vpop.f32.mrf.mxu1  ;;  %v5047_v40 = vpop.f32.mrf.mxu0 }
 0x385   :  { %4369 = vst.msk [vmem:[%s6609_s3 + $0x7c] sm:$0xf] %vm4337_vm3, %v4328_v36 }
 0x386   :  { %v3926_v27 = vpop.f32.mrf.mxu1  ;;  %v3969_v52 = vpop.f32.mrf.mxu0 }
 0x387   :  { %v4329_v47 = vpack.c.bf16 %v3969_v52, %v3969_v52 }
 0x388   :  { %v5053_v0 = vpop.f32.mrf.mxu1  ;;  %v5058_v22 = vpop.f32.mrf.mxu0 }
 0x389   :  { %4370 = vst.msk [vmem:[%s6609_s3 + $0x80] sm:$0xf] %vm4337_vm3, %v4329_v47 }
 0x38a   :  { %v4015_v15 = vpop.f32.mrf.mxu1  ;;  %v3972_v12 = vpop.f32.mrf.mxu0 }
 0x38b   :  { %v4330_v49 = vpack.c.bf16 %v4015_v15, %v4015_v15 }
 0x38c   :  { %v5064_v29 = vpop.f32.mrf.mxu1  ;;  %v5059_v7 = vpop.f32.mrf.mxu0 }
 0x38d   :  { %4371 = vst.msk [vmem:[%s6609_s3 + $0x84] sm:$0xf] %vm4337_vm3, %v4330_v49 }
 0x38e   :  { %v4018_v8 = vpop.f32.mrf.mxu1 }
 0x38f   :  { %v4061_v2 = vpop.f32.mrf.mxu0 }
 0x390   :  { %v4331_v6 = vpack.c.bf16 %v4061_v2, %v4061_v2  ;;  %v5065_v31 = vpop.f32.mrf.mxu1 }
 0x391   :  { %v5070_v44 = vpop.f32.mrf.mxu0 }
 0x392   :  { %4372 = vst.msk [vmem:[%s6609_s3 + $0x88] sm:$0xf] %vm4337_vm3, %v4331_v6  ;;  %v4107_v20 = vpop.f32.mrf.mxu1 }
 0x393   :  { %v4064_v37 = vpop.f32.mrf.mxu0  ;;  %v4332_v33 = vpack.c.bf16 %v4107_v20, %v4107_v20 }
 0x394   :  { %v5076_v16 = vpop.f32.mrf.mxu1 }
 0x395   :  { %4373 = vst.msk [vmem:[%s6609_s3 + $0x8c] sm:$0xf] %vm4337_vm3, %v4332_v33  ;;  %v5071_v4 = vpop.f32.mrf.mxu0 }
 0x396   :  { %v4110_v46 = vpop.f32.mrf.mxu1 }
 0x397   :  { %v4153_v30 = vpop.f32.mrf.mxu0 }
 0x398   :  { %v4333_v13 = vpack.c.bf16 %v4153_v30, %v4153_v30  ;;  %v5077_v11 = vpop.f32.mrf.mxu1 }
 0x399   :  { %v5082_v10 = vpop.f32.mrf.mxu0 }
 0x39a   :  { %4374 = vst.msk [vmem:[%s6609_s3 + $0x90] sm:$0xf] %vm4337_vm3, %v4333_v13  ;;  %v4199_v3 = vpop.f32.mrf.mxu1 }
 0x39b   :  { %v4156_v25 = vpop.f32.mrf.mxu0  ;;  %v4334_v53 = vpack.c.bf16 %v4199_v3, %v4199_v3 }
 0x39c   :  { %v5088_v50 = vpop.f32.mrf.mxu1 }
 0x39d   :  { %4375 = vst.msk [vmem:[%s6609_s3 + $0x94] sm:$0xf] %vm4337_vm3, %v4334_v53  ;;  %v5083_v35 = vpop.f32.mrf.mxu0 }
 0x39e   :  { %v4202_v45 = vpop.f32.mrf.mxu1 }
 0x39f   :  { %v4245_v38 = vpop.f32.mrf.mxu0 }
 0x3a0   :  { %v4335_v63 = vpack.c.bf16 %v4245_v38, %v4245_v38  ;;  %v5089_v24 = vpop.f32.mrf.mxu1 }
 0x3a1   :  { %v5094_v43 = vpop.f32.mrf.mxu0 }
 0x3a2   :  { %4376 = vst.msk [vmem:[%s6609_s3 + $0x98] sm:$0xf] %vm4337_vm3, %v4335_v63  ;;  %v4291_v51 = vpop.f32.mrf.mxu1 }
 0x3a3   :  { %v4248_v5 = vpop.f32.mrf.mxu0  ;;  %v4336_v1 = vpack.c.bf16 %v4291_v51, %v4291_v51 }
 0x3a4   :  { %v5100_v42 = vpop.f32.mrf.mxu1 }
 0x3a5   :  { %4377 = vst.msk [vmem:[%s6609_s3 + $0x9c] sm:$0xf] %vm4337_vm3, %v4336_v1  ;;  %v5095_v61 = vpop.f32.mrf.mxu0 }
 0x3a6   :  { %v4294_v57 = vpop.f32.mrf.mxu1 }
 0x3a8   :  { %v5101_v34 = vpop.f32.mrf.mxu1 }

// kernel: _lambda_.37
= control target key start
LH: loop header
LB: loop body
LE: loop exit
PB: predicated region body
PF: predicated region fallthrough
CT: control target
= control target key end

     0   :  { %v463_v0 = vmov 0.0   ;;  %vm464_vm0 = vmmov 0   ;;  %s547_s1 = inlined_call_operand.vmem [shape: bf16[128,128], index: 1, kind: input, shape index: {}]   ;;  %s548_s0 = inlined_call_operand.vmem [shape: bf16[80,128], index: 0, kind: input, shape index: {}]   ;;  %s549_s2 = inlined_call_operand.vmem [shape: f32[1,128], index: 2, kind: input, shape index: {}]   ;;  %s550_s3 = inlined_call_operand.vmem [shape: bf16[80,128], index: 3, kind: output, shape index: {}]  }
   0x1   :  { %396 = vmatprep.subr.bf16.mxu0 %v463_v0  ;;  %v450_v1 = vld [vmem:[%s547_s1 + $0x38] sm:$0xff]   ;;  %432 = vmatprep.subr.bf16.mxu1 %v463_v0  ;;  %v451_v2 = vld [vmem:[%s547_s1 + $0x30] sm:$0xff]   ;;  %v452_v3 = vld [vmem:[%s547_s1 + $0x28] sm:$0xff]  }
   0x2   :  { %412 = vmatprep.mubr.msk.bf16.mxu0 %vm464_vm0, %v463_v0  ;;  %424 = vmatprep.mubr.msk.bf16.mxu1 %vm464_vm0, %v463_v0  ;;  %v453_v4 = vld [vmem:[%s547_s1 + $0x20] sm:$0xff]   ;;  %v454_v5 = vld [vmem:[%s547_s1 + $0x18] sm:$0xff]   ;;  %v455_v6 = vld [vmem:[%s547_s1 + $0x10] sm:$0xff]  }
   0x3   :  { %397 = vmatpush3.bf16.msra.mxu0 %v450_v1  ;;  %440 = vmatpush3.bf16.msra.mxu1 %v450_v1  ;;  %v456_v7 = vld [vmem:[%s547_s1 + $0x8] sm:$0xff]   ;;  %v457_v8 = vld [vmem:[%s547_s1] sm:$0xff]   ;;  %v459_v10 = vld [vmem:[%s548_s0 + $0x18] sm:$0xff]  }
   0x4   :  { %398 = vmatprep.subr.bf16.mxu0 %v463_v0  ;;  %433 = vmatprep.subr.bf16.mxu1 %v463_v0  ;;  %v458_v9 = vld [vmem:[%s548_s0] sm:$0xff]   ;;  %v460_v11 = vld [vmem:[%s548_s0 + $0x8] sm:$0xff]   ;;  %v462_v13 = vld [vmem:[%s548_s0 + $0x10] sm:$0xff]  }
   0x5   :  { %v461_v12 = vld [vmem:[%s548_s0 + $0x20] sm:$0xff]  }
   0x6   :  { %v333_v16 = vld [vmem:[%s549_s2] ss:$0 sm:$0xff] }
   0x7   :  { %399 = vmatpush3.bf16.msra.mxu0 %v451_v2  ;;  %441 = vmatpush3.bf16.msra.mxu1 %v451_v2 }
   0x8   :  { %400 = vmatprep.subr.bf16.mxu0 %v463_v0  ;;  %434 = vmatprep.subr.bf16.mxu1 %v463_v0 }
   0xb   :  { %401 = vmatpush3.bf16.msra.mxu0 %v452_v3  ;;  %442 = vmatpush3.bf16.msra.mxu1 %v452_v3 }
   0xc   :  { %402 = vmatprep.subr.bf16.mxu0 %v463_v0  ;;  %435 = vmatprep.subr.bf16.mxu1 %v463_v0 }
   0xf   :  { %403 = vmatpush3.bf16.msra.mxu0 %v453_v4  ;;  %443 = vmatpush3.bf16.msra.mxu1 %v453_v4 }
  0x10   :  { %404 = vmatprep.subr.bf16.mxu0 %v463_v0  ;;  %436 = vmatprep.subr.bf16.mxu1 %v463_v0 }
  0x13   :  { %405 = vmatpush3.bf16.msra.mxu0 %v454_v5  ;;  %444 = vmatpush3.bf16.msra.mxu1 %v454_v5 }
  0x14   :  { %406 = vmatprep.subr.bf16.mxu0 %v463_v0  ;;  %437 = vmatprep.subr.bf16.mxu1 %v463_v0 }
  0x17   :  { %407 = vmatpush3.bf16.msra.mxu0 %v455_v6  ;;  %445 = vmatpush3.bf16.msra.mxu1 %v455_v6 }
  0x18   :  { %408 = vmatprep.subr.bf16.mxu0 %v463_v0  ;;  %438 = vmatprep.subr.bf16.mxu1 %v463_v0 }
  0x1b   :  { %409 = vmatpush3.bf16.msra.mxu0 %v456_v7  ;;  %446 = vmatpush3.bf16.msra.mxu1 %v456_v7 }
  0x1c   :  { %410 = vmatprep.subr.bf16.mxu0 %v463_v0  ;;  %439 = vmatprep.subr.bf16.mxu1 %v463_v0 }
  0x1f   :  { %411 = vmatpush3.bf16.msra.mxu0 %v457_v8  ;;  %447 = vmatpush3.bf16.msra.mxu1 %v457_v8 }
  0x22   :  { %413 = vmatmul.mubr.bf16.vlgmr.msra.gmra.mxu0 %v458_v9  ;;  %425 = vmatmul.mubr.bf16.vlgmr.msra.gmra.mxu1 %v459_v10 }
  0x23   :  { %416 = vmatprep.mubr.msk.bf16.mxu0 %vm464_vm0, %v463_v0  ;;  %428 = vmatprep.mubr.msk.bf16.mxu1 %vm464_vm0, %v463_v0 }
  0x2a   :  { %417 = vmatmul.mubr.bf16.gmra.mxu0 %v460_v11  ;;  %429 = vmatmul.mubr.bf16.gmra.mxu1 %v461_v12 }
  0x2b   :  { %420 = vmatprep.mubr.msk.bf16.mxu0 %vm464_vm0, %v463_v0 }
  0x32   :  { %421 = vmatmul.mubr.bf16.gmra.mxu0 %v462_v13 }
  0xe2   :  { %v177_v14 = vpop.f32.mrf.mxu0  ;;  %v201_v15 = vpop.f32.mrf.mxu1 }
  0xe3   :  { %v262_v19 = vadd.f32 %v333_v16, %v201_v15  ;;  %v256_v22 = vadd.f32 %v333_v16, %v177_v14 }
  0xe4   :  { %v414_v17 = vpop.f32.mrf.mxu0  ;;  %v426_v18 = vpop.f32.mrf.mxu1 }
  0xe6   :  { %v180_v20 = vpop.f32.mrf.mxu0  ;;  %v204_v21 = vpop.f32.mrf.mxu1 }
  0xe7   :  { %v257_v23 = vadd.f32 %v333_v16, %v180_v20  ;;  %v263_v24 = vadd.f32 %v333_v16, %v204_v21 }
  0xe8   :  { %v415_v25 = vpop.f32.mrf.mxu0  ;;  %v427_v26 = vpop.f32.mrf.mxu1 }
  0xe9   :  { %v357_v27 = vpack.c.bf16 %v257_v23, %v256_v22  ;;  %v372_v28 = vpack.c.bf16 %v263_v24, %v262_v19 }
  0xea   :  { %v185_v29 = vpop.f32.mrf.mxu0  ;;  %v209_v30 = vpop.f32.mrf.mxu1 }
  0xeb   :  { %358 = vst [vmem:[%s550_s3] sm:$0xff] %v357_v27   ;;  %381 = vst [vmem:[%s550_s3 + $0x18] sm:$0xff] %v372_v28   ;;  %v264_v33 = vadd.f32 %v333_v16, %v209_v30  ;;  %v258_v36 = vadd.f32 %v333_v16, %v185_v29 }
  0xec   :  { %v418_v31 = vpop.f32.mrf.mxu0  ;;  %v430_v32 = vpop.f32.mrf.mxu1 }
  0xee   :  { %v188_v34 = vpop.f32.mrf.mxu0  ;;  %v212_v35 = vpop.f32.mrf.mxu1 }
  0xef   :  { %v259_v37 = vadd.f32 %v333_v16, %v188_v34  ;;  %v265_v38 = vadd.f32 %v333_v16, %v212_v35 }
  0xf0   :  { %v419_v39 = vpop.f32.mrf.mxu0  ;;  %v431_v40 = vpop.f32.mrf.mxu1 }
  0xf1   :  { %v362_v41 = vpack.c.bf16 %v259_v37, %v258_v36  ;;  %v377_v42 = vpack.c.bf16 %v265_v38, %v264_v33 }
  0xf2   :  { %v193_v43 = vpop.f32.mrf.mxu0 }
  0xf3   :  { %379 = vst [vmem:[%s550_s3 + $0x8] sm:$0xff] %v362_v41   ;;  %382 = vst [vmem:[%s550_s3 + $0x20] sm:$0xff] %v377_v42   ;;  %v260_v46 = vadd.f32 %v333_v16, %v193_v43 }
  0xf4   :  { %v422_v44 = vpop.f32.mrf.mxu0 }
  0xf6   :  { %v196_v45 = vpop.f32.mrf.mxu0 }
  0xf7   :  { %v261_v47 = vadd.f32 %v333_v16, %v196_v45 }
  0xf8   :  { %v423_v48 = vpop.f32.mrf.mxu0 }
  0xf9   :  { %v367_v49 = vpack.c.bf16 %v261_v47, %v260_v46 }
  0xfb   :  { %380 = vst [vmem:[%s550_s3 + $0x10] sm:$0xff] %v367_v49  }

// kernel: _lambda_.38
= control target key start
LH: loop header
LB: loop body
LE: loop exit
PB: predicated region body
PF: predicated region fallthrough
CT: control target
= control target key end

     0   :  { %v530_v0 = vmov 0.0   ;;  %vm531_vm0 = vmmov 0   ;;  %s646_s1 = inlined_call_operand.vmem [shape: bf16[128,128], index: 1, kind: input, shape index: {}]   ;;  %s647_s0 = inlined_call_operand.vmem [shape: bf16[80,128], index: 0, kind: input, shape index: {}]   ;;  %s648_s3 = inlined_call_operand.vmem [shape: bf16[80,128], index: 3, kind: input, shape index: {}]   ;;  %s649_s2 = inlined_call_operand.vmem [shape: f32[1,128], index: 2, kind: input, shape index: {}]   ;;  %s650_s4 = inlined_call_operand.vmem [shape: bf16[80,128], index: 4, kind: output, shape index: {}]  }
   0x1   :  { %463 = vmatprep.subr.bf16.mxu0 %v530_v0  ;;  %v517_v1 = vld [vmem:[%s646_s1 + $0x38] sm:$0xff]   ;;  %499 = vmatprep.subr.bf16.mxu1 %v530_v0  ;;  %v518_v2 = vld [vmem:[%s646_s1 + $0x30] sm:$0xff]   ;;  %v519_v3 = vld [vmem:[%s646_s1 + $0x28] sm:$0xff]  }
   0x2   :  { %479 = vmatprep.mubr.msk.bf16.mxu0 %vm531_vm0, %v530_v0  ;;  %491 = vmatprep.mubr.msk.bf16.mxu1 %vm531_vm0, %v530_v0  ;;  %v520_v4 = vld [vmem:[%s646_s1 + $0x20] sm:$0xff]   ;;  %v521_v5 = vld [vmem:[%s646_s1 + $0x18] sm:$0xff]   ;;  %v522_v6 = vld [vmem:[%s646_s1 + $0x10] sm:$0xff]  }
   0x3   :  { %464 = vmatpush3.bf16.msra.mxu0 %v517_v1  ;;  %507 = vmatpush3.bf16.msra.mxu1 %v517_v1  ;;  %v523_v7 = vld [vmem:[%s646_s1 + $0x8] sm:$0xff]   ;;  %v524_v8 = vld [vmem:[%s646_s1] sm:$0xff]   ;;  %v526_v10 = vld [vmem:[%s647_s0 + $0x18] sm:$0xff]  }
   0x4   :  { %465 = vmatprep.subr.bf16.mxu0 %v530_v0  ;;  %500 = vmatprep.subr.bf16.mxu1 %v530_v0  ;;  %v525_v9 = vld [vmem:[%s647_s0] sm:$0xff]   ;;  %v527_v11 = vld [vmem:[%s647_s0 + $0x8] sm:$0xff]   ;;  %v529_v13 = vld [vmem:[%s647_s0 + $0x10] sm:$0xff]  }
   0x5   :  { %v528_v12 = vld [vmem:[%s647_s0 + $0x20] sm:$0xff]   ;;  %v444_v14 = vld [vmem:[%s648_s3 + $0x18] sm:$0xff]   ;;  %v442_v34 = vld [vmem:[%s648_s3 + $0x8] sm:$0xff]  }
   0x6   :  { %v398_v15 = vld [vmem:[%s648_s3] sm:$0xff]   ;;  %v411_v17 = vunpack.c.l.bf16 %v444_v14  ;;  %v412_v27 = vunpack.c.h.bf16 %v444_v14  ;;  %v403_v43 = vunpack.c.l.bf16 %v442_v34  ;;  %v404_v50 = vunpack.c.h.bf16 %v442_v34  ;;  %v443_v61 = vld [vmem:[%s648_s3 + $0x10] sm:$0xff]  }
   0x7   :  { %466 = vmatpush3.bf16.msra.mxu0 %v518_v2  ;;  %508 = vmatpush3.bf16.msra.mxu1 %v518_v2  ;;  %v610_v16 = vld [vmem:[%s649_s2] ss:$0 sm:$0xff]  ;;  %v399_v19 = vunpack.c.l.bf16 %v398_v15  ;;  %v400_v26 = vunpack.c.h.bf16 %v398_v15 }
   0x8   :  { %467 = vmatprep.subr.bf16.mxu0 %v530_v0  ;;  %501 = vmatprep.subr.bf16.mxu1 %v530_v0  ;;  %v445_v31 = vld [vmem:[%s648_s3 + $0x20] sm:$0xff]  }
   0x9   :  { %v415_v40 = vunpack.c.l.bf16 %v445_v31  ;;  %v416_v55 = vunpack.c.h.bf16 %v445_v31 }
   0xb   :  { %468 = vmatpush3.bf16.msra.mxu0 %v519_v3  ;;  %509 = vmatpush3.bf16.msra.mxu1 %v519_v3 }
   0xc   :  { %469 = vmatprep.subr.bf16.mxu0 %v530_v0  ;;  %502 = vmatprep.subr.bf16.mxu1 %v530_v0 }
   0xf   :  { %470 = vmatpush3.bf16.msra.mxu0 %v520_v4  ;;  %510 = vmatpush3.bf16.msra.mxu1 %v520_v4  ;;  %v407_v4 = vunpack.c.l.bf16 %v443_v61 }
  0x10   :  { %471 = vmatprep.subr.bf16.mxu0 %v530_v0  ;;  %503 = vmatprep.subr.bf16.mxu1 %v530_v0 }
  0x13   :  { %472 = vmatpush3.bf16.msra.mxu0 %v521_v5  ;;  %511 = vmatpush3.bf16.msra.mxu1 %v521_v5 }
  0x14   :  { %473 = vmatprep.subr.bf16.mxu0 %v530_v0  ;;  %504 = vmatprep.subr.bf16.mxu1 %v530_v0 }
  0x17   :  { %474 = vmatpush3.bf16.msra.mxu0 %v522_v6  ;;  %512 = vmatpush3.bf16.msra.mxu1 %v522_v6 }
  0x18   :  { %475 = vmatprep.subr.bf16.mxu0 %v530_v0  ;;  %505 = vmatprep.subr.bf16.mxu1 %v530_v0 }
  0x1b   :  { %476 = vmatpush3.bf16.msra.mxu0 %v523_v7  ;;  %513 = vmatpush3.bf16.msra.mxu1 %v523_v7 }
  0x1c   :  { %477 = vmatprep.subr.bf16.mxu0 %v530_v0  ;;  %506 = vmatprep.subr.bf16.mxu1 %v530_v0 }
  0x1f   :  { %478 = vmatpush3.bf16.msra.mxu0 %v524_v8  ;;  %514 = vmatpush3.bf16.msra.mxu1 %v524_v8 }
  0x22   :  { %480 = vmatmul.mubr.bf16.vlgmr.msra.gmra.mxu0 %v525_v9  ;;  %492 = vmatmul.mubr.bf16.vlgmr.msra.gmra.mxu1 %v526_v10 }
  0x23   :  { %483 = vmatprep.mubr.msk.bf16.mxu0 %vm531_vm0, %v530_v0  ;;  %495 = vmatprep.mubr.msk.bf16.mxu1 %vm531_vm0, %v530_v0 }
  0x2a   :  { %484 = vmatmul.mubr.bf16.gmra.mxu0 %v527_v11  ;;  %496 = vmatmul.mubr.bf16.gmra.mxu1 %v528_v12  ;;  %v408_v12 = vunpack.c.h.bf16 %v443_v61 }
  0x2b   :  { %487 = vmatprep.mubr.msk.bf16.mxu0 %vm531_vm0, %v530_v0 }
  0x32   :  { %488 = vmatmul.mubr.bf16.gmra.mxu0 %v529_v13 }
  0xe2   :  { %v180_v18 = vpop.f32.mrf.mxu0  ;;  %v204_v20 = vpop.f32.mrf.mxu1 }
  0xe3   :  { %v259_v21 = vadd.f32 %v610_v16, %v180_v18  ;;  %v265_v22 = vadd.f32 %v610_v16, %v204_v20 }
  0xe4   :  { %v481_v23 = vpop.f32.mrf.mxu0  ;;  %v493_v24 = vpop.f32.mrf.mxu1 }
  0xe5   :  { %v295_v25 = vadd.f32 %v411_v17, %v265_v22  ;;  %v289_v28 = vadd.f32 %v399_v19, %v259_v21 }
  0xe6   :  { %v183_v29 = vpop.f32.mrf.mxu0  ;;  %v207_v30 = vpop.f32.mrf.mxu1 }
  0xe7   :  { %v260_v32 = vadd.f32 %v610_v16, %v183_v29  ;;  %v266_v33 = vadd.f32 %v610_v16, %v207_v30  ;;  %v305_v37 = vmax.f32 %v295_v25, 0.0  ;;  %v299_v41 = vmax.f32 %v289_v28, 0.0 }
  0xe8   :  { %v482_v35 = vpop.f32.mrf.mxu0  ;;  %v494_v36 = vpop.f32.mrf.mxu1 }
  0xe9   :  { %v290_v38 = vadd.f32 %v400_v26, %v260_v32  ;;  %v296_v39 = vadd.f32 %v412_v27, %v266_v33 }
  0xea   :  { %v188_v42 = vpop.f32.mrf.mxu0  ;;  %v212_v44 = vpop.f32.mrf.mxu1 }
  0xeb   :  { %v300_v45 = vmax.f32 %v290_v38, 0.0  ;;  %v306_v46 = vmax.f32 %v296_v39, 0.0  ;;  %v261_v47 = vadd.f32 %v610_v16, %v188_v42  ;;  %v267_v48 = vadd.f32 %v610_v16, %v212_v44 }
  0xec   :  { %v485_v49 = vpop.f32.mrf.mxu0  ;;  %v497_v51 = vpop.f32.mrf.mxu1 }
  0xed   :  { %v420_v52 = vpack.c.bf16 %v300_v45, %v299_v41  ;;  %v435_v53 = vpack.c.bf16 %v306_v46, %v305_v37  ;;  %v297_v54 = vadd.f32 %v415_v40, %v267_v48  ;;  %v291_v58 = vadd.f32 %v403_v43, %v261_v47 }
  0xee   :  { %v191_v56 = vpop.f32.mrf.mxu0  ;;  %v215_v57 = vpop.f32.mrf.mxu1 }
  0xef   :  { %421 = vst [vmem:[%s650_s4] sm:$0xff] %v420_v52   ;;  %448 = vst [vmem:[%s650_s4 + $0x18] sm:$0xff] %v435_v53   ;;  %v262_v59 = vadd.f32 %v610_v16, %v191_v56  ;;  %v268_v60 = vadd.f32 %v610_v16, %v215_v57  ;;  %v307_v0 = vmax.f32 %v297_v54, 0.0  ;;  %v301_v5 = vmax.f32 %v291_v58, 0.0 }
  0xf0   :  { %v486_v62 = vpop.f32.mrf.mxu0  ;;  %v498_v63 = vpop.f32.mrf.mxu1 }
  0xf1   :  { %v292_v1 = vadd.f32 %v404_v50, %v262_v59  ;;  %v298_v2 = vadd.f32 %v416_v55, %v268_v60 }
  0xf2   :  { %v196_v3 = vpop.f32.mrf.mxu0 }
  0xf3   :  { %v302_v6 = vmax.f32 %v292_v1, 0.0  ;;  %v308_v7 = vmax.f32 %v298_v2, 0.0  ;;  %v263_v8 = vadd.f32 %v610_v16, %v196_v3 }
  0xf4   :  { %v489_v9 = vpop.f32.mrf.mxu0 }
  0xf5   :  { %v425_v10 = vpack.c.bf16 %v302_v6, %v301_v5  ;;  %v440_v11 = vpack.c.bf16 %v308_v7, %v307_v0  ;;  %v293_v14 = vadd.f32 %v407_v4, %v263_v8 }
  0xf6   :  { %v199_v13 = vpop.f32.mrf.mxu0 }
  0xf7   :  { %446 = vst [vmem:[%s650_s4 + $0x8] sm:$0xff] %v425_v10   ;;  %449 = vst [vmem:[%s650_s4 + $0x20] sm:$0xff] %v440_v11   ;;  %v264_v15 = vadd.f32 %v610_v16, %v199_v13  ;;  %v303_v19 = vmax.f32 %v293_v14, 0.0 }
  0xf8   :  { %v490_v17 = vpop.f32.mrf.mxu0 }
  0xf9   :  { %v294_v18 = vadd.f32 %v408_v12, %v264_v15 }
  0xfb   :  { %v304_v20 = vmax.f32 %v294_v18, 0.0 }
  0xfd   :  { %v430_v21 = vpack.c.bf16 %v304_v20, %v303_v19 }
  0xff   :  { %447 = vst [vmem:[%s650_s4 + $0x10] sm:$0xff] %v430_v21  }

// kernel: _lambda_.39
= control target key start
LH: loop header
LB: loop body
LE: loop exit
PB: predicated region body
PF: predicated region fallthrough
CT: control target
= control target key end

     0   :  { %v193_v0 = vmov 0.0   ;;  %vm194_vm0 = vmmov 0   ;;  %s248_s1 = inlined_call_operand.vmem [shape: bf16[128,128], index: 1, kind: input, shape index: {}]   ;;  %s249_s0 = inlined_call_operand.vmem [shape: bf16[8,128], index: 0, kind: input, shape index: {}]   ;;  %s250_s2 = inlined_call_operand.vmem [shape: f32[1,128], index: 2, kind: input, shape index: {}]   ;;  %s251_s3 = inlined_call_operand.vmem [shape: f32[8,128], index: 3, kind: output, shape index: {}]  }
   0x1   :  { %163 = vmatprep.subr.bf16.mxu0 %v193_v0  ;;  %v185_v1 = vld [vmem:[%s248_s1 + $0x38] sm:$0xff]   ;;  %179 = vmatprep.mubr.msk.bf16.mxu0 %vm194_vm0, %v193_v0  ;;  %v186_v2 = vld [vmem:[%s248_s1 + $0x30] sm:$0xff]   ;;  %v187_v3 = vld [vmem:[%s248_s1 + $0x28] sm:$0xff]  }
   0x2   :  { %164 = vmatpush3.bf16.msra.mxu0 %v185_v1  ;;  %v188_v4 = vld [vmem:[%s248_s1 + $0x20] sm:$0xff]   ;;  %v189_v5 = vld [vmem:[%s248_s1 + $0x18] sm:$0xff]   ;;  %v190_v6 = vld [vmem:[%s248_s1 + $0x10] sm:$0xff]  }
   0x3   :  { %165 = vmatprep.subr.bf16.mxu0 %v193_v0  ;;  %v191_v7 = vld [vmem:[%s248_s1 + $0x8] sm:$0xff]   ;;  %v192_v8 = vld [vmem:[%s248_s1] sm:$0xff]  }
   0x4   :  { %v20_v9 = vld [vmem:[%s249_s0] sm:$0xf] }
   0x5   :  { %v153_v10 = vld [vmem:[%s250_s2] ss:$0 sm:$0xff] }
   0x6   :  { %166 = vmatpush3.bf16.msra.mxu0 %v186_v2 }
   0x7   :  { %167 = vmatprep.subr.bf16.mxu0 %v193_v0 }
   0xa   :  { %168 = vmatpush3.bf16.msra.mxu0 %v187_v3 }
   0xb   :  { %169 = vmatprep.subr.bf16.mxu0 %v193_v0 }
   0xe   :  { %170 = vmatpush3.bf16.msra.mxu0 %v188_v4 }
   0xf   :  { %171 = vmatprep.subr.bf16.mxu0 %v193_v0 }
  0x12   :  { %172 = vmatpush3.bf16.msra.mxu0 %v189_v5 }
  0x13   :  { %173 = vmatprep.subr.bf16.mxu0 %v193_v0 }
  0x16   :  { %174 = vmatpush3.bf16.msra.mxu0 %v190_v6 }
  0x17   :  { %175 = vmatprep.subr.bf16.mxu0 %v193_v0 }
  0x1a   :  { %176 = vmatpush3.bf16.msra.mxu0 %v191_v7 }
  0x1b   :  { %177 = vmatprep.subr.bf16.mxu0 %v193_v0 }
  0x1e   :  { %178 = vmatpush3.bf16.msra.mxu0 %v192_v8 }
  0x21   :  { %180 = vmatmul.mubr.bf16.vlgmr.msra.gmra.mxu0 %v20_v9 }
  0xe1   :  { %v120_v11 = vpop.f32.mrf.mxu0 }
  0xe2   :  { %v139_v12 = vadd.f32 %v153_v10, %v120_v11 }
  0xe3   :  { %v181_v13 = vpop.f32.mrf.mxu0 }
  0xe4   :  { %140 = vst [vmem:[%s251_s3] sm:$0xff] %v139_v12 }
  0xe5   :  { %v123_v14 = vpop.f32.mrf.mxu0 }
  0xe7   :  { %v182_v15 = vpop.f32.mrf.mxu0 }

</bundles_post_ra>
